<compile_context>
chip_gen: v7x
topology: tpu7x:2x2x1
jax: 0.10.0
libtpu: 0.0.40
codegen_flags: <defaults>
</compile_context>

<pallas_src>
import jax
import jax.numpy as jnp
from jax.experimental import pallas as pl
from jax.experimental.pallas import tpu as pltpu


def _gnn_kernel(masks_ref, featsa_ref, self_ref, pre_ref, w_ref, out_ref, acc_ref):
    """Fused mean-aggregation + GNNLayer for one (node-tile, neighbour-tile).

    masks_ref  : (L, TN, TK)     int8 per-hop adjacency rows for this tile pair
    featsa_ref : (TK, D+1)       bf16 node features + ones column (degree)
    self_ref   : (TN, D)         f32 raw features of this tile's nodes ("self")
    pre_ref    : (TN, D)         f32 pre_latent_feats rows for this tile
    w_ref      : ((L+2)*D, D)    f32 GNNLayer weight
    out_ref    : (TN, D)         output hidden embeddings for this tile
    acc_ref    : (L*TN, D+1)     f32 accumulator (scratch, persists over k)
    """
    num_hops, tn, tk = masks_ref.shape
    d_aug = featsa_ref.shape[-1]
    d = d_aug - 1
    k = pl.program_id(1)

    @pl.when(k == 0)
    def _init():
        acc_ref[...] = jnp.zeros_like(acc_ref)

    # All L hop aggregations fused into ONE bf16 MXU matmul (f32 accumulate).
    # The appended ones column of feats accumulates the neighbour count.
    m = masks_ref[...].astype(jnp.bfloat16).reshape(num_hops * tn, tk)
    acc_ref[...] += jnp.dot(m, featsa_ref[...], preferred_element_type=jnp.float32)

    @pl.when(k == pl.num_programs(1) - 1)
    def _finalize():
        acc = acc_ref[...].reshape(num_hops, tn, d_aug)
        deg = acc[:, :, d:]                        # (L, TN, 1) neighbour counts
        inv = 1.0 / jnp.maximum(deg, 1.0)          # mean-normalise AFTER matmul
        agg = acc[:, :, :d] * inv                  # (L, TN, D)

        parts = [self_ref[...]] + [agg[l] for l in range(num_hops)] + [pre_ref[...]]
        combined = jnp.concatenate(parts, axis=-1)  # (TN, (L+2)*D)
        # Single fused weight matmul with K = (L+2)*D instead of L+2 tiny dots.
        res = jnp.dot(combined, w_ref[...], preferred_element_type=jnp.float32)
        out_ref[...] = jnp.maximum(res, 0.0).astype(out_ref.dtype)


def build_layer_adjs(adj, num_layers, dtype=jnp.int8):
    """Reproduce GNN.__init__'s layer_adj construction (elementwise torch.pow).

    Returned as int8 (values are exact 0/+-1): these masks are the dominant
    HBM traffic of the forward pass, so narrow storage is the biggest lever.
    """
    ones = jnp.ones_like(adj)
    zeros = jnp.zeros_like(adj)
    adjs = [adj]
    for index in range(2, num_layers + 1):
        cur_adj = jnp.where(jnp.power(adj, index) > 0, ones, zeros)
        prev_adj = jnp.where(jnp.power(adj, index - 1) > 0, ones, zeros)
        adjs.append(cur_adj - prev_adj)
    return jnp.stack(adjs, axis=0).astype(dtype)  # (L, N, N)


def gnn_forward(layer_adjs, raw_features, pre_latent_feats, weight, *,
                tile_n=256, tile_k=512, vmem_limit_bytes=48 * 1024 * 1024):
    L, N, N2 = layer_adjs.shape
    assert N == N2
    D = raw_features.shape[1]
    assert weight.shape == ((L + 2) * D, D)

    tile_n = min(tile_n, N)
    tile_k = min(tile_k, N)
    assert N % tile_n == 0 and N % tile_k == 0
    # int8 mask tiles: sublane dim multiple of 32, lane dim multiple of 128
    # (or the full extent).
    assert (tile_n % 32 == 0 or tile_n == N) and (tile_k % 128 == 0 or tile_k == N)

    masks = layer_adjs.astype(jnp.int8)             # exact 0/+-1 values
    feats = raw_features.astype(jnp.float32)
    # Ones column folds the per-hop degree computation into the same matmul.
    feats_aug = jnp.concatenate(
        [feats, jnp.ones((N, 1), jnp.float32)], axis=1).astype(jnp.bfloat16)
    pre = pre_latent_feats.astype(jnp.float32)
    w = weight.astype(jnp.float32)

    out = pl.pallas_call(
        _gnn_kernel,
        out_shape=jax.ShapeDtypeStruct((N, D), jnp.float32),
        grid_spec=pltpu.PrefetchScalarGridSpec(
            num_scalar_prefetch=0,
            grid=(N // tile_n, N // tile_k),        # (node tiles, neighbour tiles)
            in_specs=[
                # per-hop adjacency rows for this (node-tile, k-tile): int8 stream
                pl.BlockSpec((L, tile_n, tile_k), lambda i, k: (0, i, k)),
                # bf16 feature slab (+ ones column) for this neighbour tile
                pl.BlockSpec((tile_k, D + 1), lambda i, k: (k, 0)),
                # this tile's own feature rows ("self") — independent of k
                pl.BlockSpec((tile_n, D), lambda i, k: (i, 0)),
                # pre_latent rows for this tile — independent of k
                pl.BlockSpec((tile_n, D), lambda i, k: (i, 0)),
                # GNNLayer weight (constant block index -> fetched once)
                pl.BlockSpec(((L + 2) * D, D), lambda i, k: (0, 0)),
            ],
            out_specs=pl.BlockSpec((tile_n, D), lambda i, k: (i, 0)),
            scratch_shapes=[pltpu.VMEM((L * tile_n, D + 1), jnp.float32)],
        ),
        compiler_params=pltpu.CompilerParams(
            dimension_semantics=("parallel", "arbitrary"),
            vmem_limit_bytes=vmem_limit_bytes,
        ),
    )(masks, feats_aug, feats, pre, w)
    return out


def gnn_forward_ref(layer_adjs, raw_features, pre_latent_feats, weight):
    """Pure-JAX reference mirroring the PyTorch forward (f32 throughout)."""
    L = layer_adjs.shape[0]
    feats = raw_features.astype(jnp.float32)
    masks = layer_adjs.astype(jnp.float32)
    aggregated = []
    for l in range(L):
        mask = masks[l]
        num_neigh = mask.sum(axis=1, keepdims=True)
        num_neigh = jnp.where(num_neigh > 0, num_neigh, jnp.ones_like(num_neigh))
        mask = mask / num_neigh
        aggregated.append(mask @ feats)
    combined = jnp.concatenate(
        [feats] + aggregated + [pre_latent_feats.astype(jnp.float32)], axis=1)
    return jnp.maximum(combined @ weight.astype(jnp.float32), 0.0)


if __name__ == "__main__":
    # Small, deterministic configuration.
    num_layers = 3      # number of GNN hops (L)
    N = 512             # number of nodes
    D = 32              # out_size / hidden size

    key = jax.random.PRNGKey(0)
    k_adj, k_feat, k_pre, k_w = jax.random.split(key, 4)

    # Deterministic binary adjacency (symmetric).
    adj = (jax.random.uniform(k_adj, (N, N)) < 0.05).astype(jnp.float32)
    adj = jnp.maximum(adj, adj.T)

    # NOTE: mirrors the original elementwise torch.pow construction, so hop
    # masks for k >= 2 come out identically zero (inherited semantics).
    layer_adjs = build_layer_adjs(adj, num_layers)                    # (L, N, N) int8
    raw_features = jax.random.normal(k_feat, (N, D), dtype=jnp.float32)
    pre_latent_feats = jax.random.normal(k_pre, (N, D), dtype=jnp.float32)

    # GNNLayer weight: maps concat([self, L hops, pre_latent]) -> out_size.
    fan_in = (num_layers + 2) * D
    weight = jax.random.normal(k_w, (fan_in, D), dtype=jnp.float32) / jnp.sqrt(fan_in)

    # tile_k=256 -> 2 k-steps: exercises the accumulator init/finalize path.
    out = gnn_forward(layer_adjs, raw_features, pre_latent_feats, weight,
                      tile_n=256, tile_k=256)
    out = jax.block_until_ready(out)

    ref = gnn_forward_ref(layer_adjs, raw_features, pre_latent_feats, weight)
    assert out.shape == (N, D)
    # bf16 feature rounding in the aggregation matmul vs the f32 reference.
    max_err = float(jnp.max(jnp.abs(out - ref)))
    assert jnp.allclose(out, ref, atol=2e-2, rtol=2e-2), f"max abs err {max_err}"

    print("KERNEL_OK")
</pallas_src>

<mosaic_0001>
module attributes {stable_mosaic.version = 11 : i64} {
  func.func @_gnn_kernel(%arg0: i32, %arg1: i32, %arg2: memref<3x256x256xi8, #tpu.memory_space<vmem>>, %arg3: memref<256x33xbf16, #tpu.memory_space<vmem>>, %arg4: memref<256x32xf32, #tpu.memory_space<vmem>>, %arg5: memref<256x32xf32, #tpu.memory_space<vmem>>, %arg6: memref<160x32xf32, #tpu.memory_space<vmem>>, %arg7: memref<256x32xf32, #tpu.memory_space<vmem>>, %arg8: memref<768x33xf32, #tpu.memory_space<vmem>>) attributes {dimension_semantics = [#tpu.dimension_semantics<parallel>, #tpu.dimension_semantics<arbitrary>], iteration_bounds = array<i64: 2, 2>, scalar_prefetch = 0 : i64, scratch_operands = 1 : i64, tpu.core_type = #tpu.core_type<tc>, window_params = [{transform_indices = @transform_0, window_bounds = array<i64: 3, 256, 256>}, {transform_indices = @transform_1, window_bounds = array<i64: 256, 33>}, {transform_indices = @transform_2, window_bounds = array<i64: 256, 32>}, {transform_indices = @transform_3, window_bounds = array<i64: 256, 32>}, {pipeline_mode = #tpu.pipeline_mode<synchronous>, transform_indices = @transform_4, window_bounds = array<i64: 160, 32>}, {transform_indices = @transform_5, window_bounds = array<i64: 256, 32>}]} {
    %c0_i32 = arith.constant 0 : i32
    %0 = arith.cmpi eq, %arg1, %c0_i32 : i32
    %1 = arith.extui %0 : i1 to i32
    %c0_i32_0 = arith.constant 0 : i32
    %2 = arith.cmpi ne, %1, %c0_i32_0 : i32
    scf.if %2 {
      %cst_10 = arith.constant 0.000000e+00 : f32
      %14 = vector.broadcast %cst_10 : f32 to vector<768x33xf32>
      %c0_11 = arith.constant 0 : index
      %c0_12 = arith.constant 0 : index
      %15 = vector.load %arg8[%c0_11, %c0_12] : memref<768x33xf32, #tpu.memory_space<vmem>>, vector<768x33xf32>
      tpu.vector_store %arg8[%c0_11, %c0_12], %14 {strides = array<i32>} : memref<768x33xf32, #tpu.memory_space<vmem>>, vector<768x33xf32>,
    } else {
    }
    %c0 = arith.constant 0 : index
    %c0_1 = arith.constant 0 : index
    %c0_2 = arith.constant 0 : index
    %3 = vector.load %arg2[%c0, %c0_1, %c0_2] : memref<3x256x256xi8, #tpu.memory_space<vmem>>, vector<3x256x256xi8>
    %4 = arith.sitofp %3 : vector<3x256x256xi8> to vector<3x256x256xbf16>
    %5 = vector.shape_cast %4 : vector<3x256x256xbf16> to vector<768x256xbf16>
    %c0_3 = arith.constant 0 : index
    %c0_4 = arith.constant 0 : index
    %6 = vector.load %arg8[%c0_3, %c0_4] : memref<768x33xf32, #tpu.memory_space<vmem>>, vector<768x33xf32>
    %c0_5 = arith.constant 0 : index
    %c0_6 = arith.constant 0 : index
    %7 = vector.load %arg3[%c0_5, %c0_6] : memref<256x33xbf16, #tpu.memory_space<vmem>>, vector<256x33xbf16>
    %cst = arith.constant dense<0.000000e+00> : vector<768x33xf32>
    %8 = tpu.matmul %5, %7, %cst {dimension_numbers = #tpu.dot_dimension_numbers<[1], [0], [0], [1], [0, 0, 1, 1], [], []>} : vector<768x256xbf16>, vector<256x33xbf16>, vector<768x33xf32> -> vector<768x33xf32>
    %9 = arith.addf %6, %8 : vector<768x33xf32>
    %c0_7 = arith.constant 0 : index
    %c0_8 = arith.constant 0 : index
    %10 = vector.load %arg8[%c0_7, %c0_8] : memref<768x33xf32, #tpu.memory_space<vmem>>, vector<768x33xf32>
    tpu.vector_store %arg8[%c0_7, %c0_8], %9 {strides = array<i32>} : memref<768x33xf32, #tpu.memory_space<vmem>>, vector<768x33xf32>,
    %c1_i32 = arith.constant 1 : i32
    %11 = arith.cmpi eq, %arg1, %c1_i32 : i32
    %12 = arith.extui %11 : i1 to i32
    %c0_i32_9 = arith.constant 0 : i32
    %13 = arith.cmpi ne, %12, %c0_i32_9 : i32
    scf.if %13 {
      %c0_10 = arith.constant 0 : index
      %c0_11 = arith.constant 0 : index
      %14 = vector.load %arg8[%c0_10, %c0_11] : memref<768x33xf32, #tpu.memory_space<vmem>>, vector<768x33xf32>
      %15 = vector.shape_cast %14 : vector<768x33xf32> to vector<3x256x33xf32>
      %16 = vector.extract_strided_slice %15 {offsets = [0, 0, 32], sizes = [3, 256, 1], strides = [1, 1, 1]} : vector<3x256x33xf32> to vector<3x256x1xf32>
      %cst_12 = arith.constant 1.000000e+00 : f32
      %17 = vector.broadcast %cst_12 : f32 to vector<3x256x1xf32>
      %18 = arith.maximumf %16, %17 : vector<3x256x1xf32>
      %cst_13 = arith.constant 1.000000e+00 : f32
      %19 = vector.broadcast %cst_13 : f32 to vector<3x256x1xf32>
      %20 = arith.divf %19, %18 : vector<3x256x1xf32>
      %21 = vector.extract_strided_slice %15 {offsets = [0, 0, 0], sizes = [3, 256, 32], strides = [1, 1, 1]} : vector<3x256x33xf32> to vector<3x256x32xf32>
      %22 = vector.broadcast %20 : vector<3x256x1xf32> to vector<3x256x32xf32>
      %23 = arith.mulf %21, %22 : vector<3x256x32xf32>
      %c0_14 = arith.constant 0 : index
      %c0_15 = arith.constant 0 : index
      %24 = vector.load %arg4[%c0_14, %c0_15] : memref<256x32xf32, #tpu.memory_space<vmem>>, vector<256x32xf32>
      %25 = vector.extract_strided_slice %23 {offsets = [0, 0, 0], sizes = [1, 256, 32], strides = [1, 1, 1]} : vector<3x256x32xf32> to vector<1x256x32xf32>
      %26 = vector.shape_cast %25 : vector<1x256x32xf32> to vector<256x32xf32>
      %27 = vector.extract_strided_slice %23 {offsets = [1, 0, 0], sizes = [1, 256, 32], strides = [1, 1, 1]} : vector<3x256x32xf32> to vector<1x256x32xf32>
      %28 = vector.shape_cast %27 : vector<1x256x32xf32> to vector<256x32xf32>
      %29 = vector.extract_strided_slice %23 {offsets = [2, 0, 0], sizes = [1, 256, 32], strides = [1, 1, 1]} : vector<3x256x32xf32> to vector<1x256x32xf32>
      %30 = vector.shape_cast %29 : vector<1x256x32xf32> to vector<256x32xf32>
      %c0_16 = arith.constant 0 : index
      %c0_17 = arith.constant 0 : index
      %31 = vector.load %arg5[%c0_16, %c0_17] : memref<256x32xf32, #tpu.memory_space<vmem>>, vector<256x32xf32>
      %32 = tpu.concatenate %24, %26, %28, %30, %31 in 1 : vector<256x32xf32>, vector<256x32xf32>, vector<256x32xf32>, vector<256x32xf32>, vector<256x32xf32> -> vector<256x160xf32>
      %c0_18 = arith.constant 0 : index
      %c0_19 = arith.constant 0 : index
      %33 = vector.load %arg6[%c0_18, %c0_19] : memref<160x32xf32, #tpu.memory_space<vmem>>, vector<160x32xf32>
      %cst_20 = arith.constant dense<0.000000e+00> : vector<256x32xf32>
      %34 = tpu.matmul %32, %33, %cst_20 {dimension_numbers = #tpu.dot_dimension_numbers<[1], [0], [0], [1], [0, 0, 1, 1], [], []>} : vector<256x160xf32>, vector<160x32xf32>, vector<256x32xf32> -> vector<256x32xf32>
      %cst_21 = arith.constant 0.000000e+00 : f32
      %35 = vector.broadcast %cst_21 : f32 to vector<256x32xf32>
      %36 = arith.maximumf %34, %35 : vector<256x32xf32>
      %c0_22 = arith.constant 0 : index
      %c0_23 = arith.constant 0 : index
      %37 = vector.load %arg7[%c0_22, %c0_23] : memref<256x32xf32, #tpu.memory_space<vmem>>, vector<256x32xf32>
      tpu.vector_store %arg7[%c0_22, %c0_23], %36 {strides = array<i32>} : memref<256x32xf32, #tpu.memory_space<vmem>>, vector<256x32xf32>,
    } else {
    }
    return
  }
  func.func @transform_0(%arg0: i32, %arg1: i32) -> (i32, i32, i32) {
    %c0_i32 = arith.constant 0 : i32
    %c0_i32_0 = arith.constant 0 : i32
    return %c0_i32, %arg0, %arg1 : i32, i32, i32
  }
  func.func @transform_1(%arg0: i32, %arg1: i32) -> (i32, i32) {
    %c0_i32 = arith.constant 0 : i32
    %c0_i32_0 = arith.constant 0 : i32
    return %arg1, %c0_i32 : i32, i32
  }
  func.func @transform_2(%arg0: i32, %arg1: i32) -> (i32, i32) {
    %c0_i32 = arith.constant 0 : i32
    %c0_i32_0 = arith.constant 0 : i32
    return %arg0, %c0_i32 : i32, i32
  }
  func.func @transform_3(%arg0: i32, %arg1: i32) -> (i32, i32) {
    %c0_i32 = arith.constant 0 : i32
    %c0_i32_0 = arith.constant 0 : i32
    return %arg0, %c0_i32 : i32, i32
  }
  func.func @transform_4(%arg0: i32, %arg1: i32) -> (i32, i32) {
    %c0_i32 = arith.constant 0 : i32
    %c0_i32_0 = arith.constant 0 : i32
    %c0_i32_1 = arith.constant 0 : i32
    return %c0_i32, %c0_i32_0 : i32, i32
  }
  func.func @transform_5(%arg0: i32, %arg1: i32) -> (i32, i32) {
    %c0_i32 = arith.constant 0 : i32
    %c0_i32_0 = arith.constant 0 : i32
    return %arg0, %c0_i32 : i32, i32
  }
}

</mosaic_0001>

<bundles_post_ra>
// kernel: tpu_custom_call.1
= control target key start
LH: loop header
LB: loop body
LE: loop exit
PB: predicated region body
PF: predicated region fallthrough
CT: control target
= control target key end

     0   :  { %s4332_s18 = smov 0   ;;  %s4334_s19 = smov 0   ;;  %s5679_s0 = inlined_call_operand.vmem [shape: s8[3,512,512], index: 0, kind: input, shape index: {}]   ;;  %s5680_s1 = inlined_call_operand.vmem [shape: bf16[512,33], index: 1, kind: input, shape index: {}]   ;;  %s5681_s2 = inlined_call_operand.vmem [shape: f32[512,32], index: 2, kind: input, shape index: {}]   ;;  %s5682_s3 = inlined_call_operand.vmem [shape: f32[512,32], index: 3, kind: input, shape index: {}]   ;;  %s5683_s4 = inlined_call_operand.vmem [shape: f32[160,32], index: 4, kind: input, shape index: {}]   ;;  %s5684_s5 = inlined_call_operand.vmem [shape: f32[512,32], index: 5, kind: output, shape index: {}]  }
   0x1   :  { %s4336_s20 = smov 0   ;;  %s4338_s21 = smov 0  }
   0x2   :  { %s4340_s22 = smov 0   ;;  %s4342_s23 = smov 0  }
   0x3   :  { %s4344_s24 = smov 0  }
   0x4 LB: > { %s24_s25 = sadd.s32 1, %s4285_s22  ;;  %s27_s26 = sadd.s32 1, %s4289_s23  ;;  %s4293_s24 = sphi %s4344_s24, %s15_s24   ;;  %s4289_s23 = sphi %s4342_s23, %s5817_s23   ;;  %s4285_s22 = sphi %s4340_s22, %s5816_s22   ;;  %s4281_s21 = sphi %s4338_s21, %s5815_s21   ;;  %s4277_s20 = sphi %s4336_s20, %s5814_s20   ;;  %s4273_s19 = sphi %s4334_s19, %s5813_s19   ;;  %s4269_s18 = sphi %s4332_s18, %s5812_s18  }
   0x5   : > { %p25_p0 = scmp.ge.s32.totalorder %s24_s25, 2  ;;  %p43_p1 = scmp.ne.s32.totalorder %s4273_s19, %s4269_s18 }
   0x6   : > { %p44_p2 = scmp.eq.s32.totalorder %s4293_s24, 0  ;;  %s36_s30 = sadd.s32 1, %s4273_s19 }
   0x7   : > { %s5819_s25 = smov (%p25_p0, %s24_s25), 0  ;;  %s5821_s26 = smov (!%p25_p0, %s27_s26), %s4289_s23 }
   0x8   : > { %p45_p3 = por %p44_p2, %p43_p1  ;;  %p29_p4 = scmp.ge.s32.totalorder %s5821_s26, 2 }
   0x9   : > { %s32_s27 = ssub.s32 %s4285_s22, %s5819_s25  ;;  %p3537_p6 = scmp.ge.s32.totalorder %s4293_s24, 4 }
   0xa   : > { %s5823_s26 = smov (%p29_p4, %s5821_s26), 0 }
   0xb   : > { %s31_s28 = ssub.s32 %s4289_s23, %s5823_s26  ;;  %197 = sbr.rel (%p3537_p6) target bundleno = 49 (0x31), region = 20 }
   0xc   : > { %s33_s29 = sor.u32 %s32_s27, %s31_s28 }
   0xd   : > { %p34_p5 = scmp.eq.s32.totalorder %s33_s29, 0 }
   0xf   : > { %s4383_s6 = scalar_select %p34_p5, %s4273_s19, %s36_s30  }
  0x12   : > { %200 = sbr.rel (!%p45_p3) target bundleno = 49 (0x31), region = 24  ;;  %s202_s7 = sand.u32 (%p45_p3), 1, %s4273_s19  }
  0x13   : > { %s3539_s8 = sshll.u32 (%p45_p3), %s4285_s22, 1  ;;  %s3686_s9 = smul.u32 (%p45_p3), 384, %s202_s7 }
  0x14   : > { %s3603_s10 = sshll.u32 (%p45_p3), %s4289_s23, 5 }
  0x15   : > { %s208_s11 = sadd.s32 (%p45_p3), %s3603_s10, %s3539_s8  ;;  %s4397_s16 = scalar_lea.vmem (%p45_p3), [#allocation3], %s3686_s9 }
  0x16   : > { %s3541_s12 = sshll.u32 (%p45_p3), %s208_s11, 3 }
  0x17   : > { %s4392_s15 = scalar_lea.vmem (%p45_p3), %s5679_s0, %s3541_s12 }
  0x18   : > { %v223_v0 = vld [vmem:[%s4392_s15] sm:$0xff] (%p45_p3)  ;;  %v225_v1 = vld [vmem:[%s4392_s15 + $0x8] sm:$0xff] (%p45_p3) }
  0x19   : > { %v227_v2 = vld [vmem:[%s4392_s15 + $0x20] sm:$0xff]  ;;  %224 = vst [vmem:[%s4397_s16] sm:$0xff] %v223_v0  ;;  %226 = vst [vmem:[%s4397_s16 + $0x8] sm:$0xff] %v225_v1  ;;  %v229_v3 = vld [vmem:[%s4392_s15 + $0x28] sm:$0xff] }
  0x1a   : > { %228 = vst [vmem:[%s4397_s16 + $0x10] sm:$0xff] %v227_v2  ;;  %v231_v4 = vld [vmem:[%s4392_s15 + $0x40] sm:$0xff]  ;;  %v233_v5 = vld [vmem:[%s4392_s15 + $0x48] sm:$0xff]  ;;  %230 = vst [vmem:[%s4397_s16 + $0x18] sm:$0xff] %v229_v3 }
  0x1b   : > { %232 = vst [vmem:[%s4397_s16 + $0x20] sm:$0xff] %v231_v4  ;;  %234 = vst [vmem:[%s4397_s16 + $0x28] sm:$0xff] %v233_v5  ;;  %v235_v6 = vld [vmem:[%s4392_s15 + $0x60] sm:$0xff]  ;;  %v237_v7 = vld [vmem:[%s4392_s15 + $0x68] sm:$0xff] }
  0x1c   : > { %v239_v8 = vld [vmem:[%s4392_s15 + $0x80] sm:$0xff]  ;;  %236 = vst [vmem:[%s4397_s16 + $0x30] sm:$0xff] %v235_v6  ;;  %238 = vst [vmem:[%s4397_s16 + $0x38] sm:$0xff] %v237_v7  ;;  %v241_v9 = vld [vmem:[%s4392_s15 + $0x88] sm:$0xff] }
  0x1d   : > { %240 = vst [vmem:[%s4397_s16 + $0x40] sm:$0xff] %v239_v8  ;;  %v243_v10 = vld [vmem:[%s4392_s15 + $0xa0] sm:$0xff]  ;;  %v245_v11 = vld [vmem:[%s4392_s15 + $0xa8] sm:$0xff]  ;;  %242 = vst [vmem:[%s4397_s16 + $0x48] sm:$0xff] %v241_v9 }
  0x1e   : > { %244 = vst [vmem:[%s4397_s16 + $0x50] sm:$0xff] %v243_v10  ;;  %246 = vst [vmem:[%s4397_s16 + $0x58] sm:$0xff] %v245_v11  ;;  %v247_v12 = vld [vmem:[%s4392_s15 + $0xc0] sm:$0xff]  ;;  %v249_v13 = vld [vmem:[%s4392_s15 + $0xc8] sm:$0xff] }
  0x1f   : > { %v251_v14 = vld [vmem:[%s4392_s15 + $0xe0] sm:$0xff]  ;;  %248 = vst [vmem:[%s4397_s16 + $0x60] sm:$0xff] %v247_v12  ;;  %250 = vst [vmem:[%s4397_s16 + $0x68] sm:$0xff] %v249_v13  ;;  %v253_v15 = vld [vmem:[%s4392_s15 + $0xe8] sm:$0xff] }
  0x20   : > { %252 = vst [vmem:[%s4397_s16 + $0x70] sm:$0xff] %v251_v14  ;;  %v255_v16 = vld [vmem:[%s4392_s15 + $0x200] sm:$0xff]  ;;  %v257_v17 = vld [vmem:[%s4392_s15 + $0x208] sm:$0xff]  ;;  %254 = vst [vmem:[%s4397_s16 + $0x78] sm:$0xff] %v253_v15 }
  0x21   : > { %256 = vst [vmem:[%s4397_s16 + $0x80] sm:$0xff] %v255_v16  ;;  %258 = vst [vmem:[%s4397_s16 + $0x88] sm:$0xff] %v257_v17  ;;  %v259_v18 = vld [vmem:[%s4392_s15 + $0x220] sm:$0xff]  ;;  %v261_v19 = vld [vmem:[%s4392_s15 + $0x228] sm:$0xff] }
  0x22   : > { %v263_v20 = vld [vmem:[%s4392_s15 + $0x240] sm:$0xff]  ;;  %260 = vst [vmem:[%s4397_s16 + $0x90] sm:$0xff] %v259_v18  ;;  %262 = vst [vmem:[%s4397_s16 + $0x98] sm:$0xff] %v261_v19  ;;  %v265_v21 = vld [vmem:[%s4392_s15 + $0x248] sm:$0xff] }
  0x23   : > { %264 = vst [vmem:[%s4397_s16 + $0xa0] sm:$0xff] %v263_v20  ;;  %v267_v22 = vld [vmem:[%s4392_s15 + $0x260] sm:$0xff]  ;;  %v269_v23 = vld [vmem:[%s4392_s15 + $0x268] sm:$0xff]  ;;  %266 = vst [vmem:[%s4397_s16 + $0xa8] sm:$0xff] %v265_v21 }
  0x24   : > { %268 = vst [vmem:[%s4397_s16 + $0xb0] sm:$0xff] %v267_v22  ;;  %270 = vst [vmem:[%s4397_s16 + $0xb8] sm:$0xff] %v269_v23  ;;  %v271_v24 = vld [vmem:[%s4392_s15 + $0x280] sm:$0xff]  ;;  %v273_v25 = vld [vmem:[%s4392_s15 + $0x288] sm:$0xff] }
  0x25   : > { %v275_v26 = vld [vmem:[%s4392_s15 + $0x2a0] sm:$0xff]  ;;  %272 = vst [vmem:[%s4397_s16 + $0xc0] sm:$0xff] %v271_v24  ;;  %274 = vst [vmem:[%s4397_s16 + $0xc8] sm:$0xff] %v273_v25  ;;  %v277_v27 = vld [vmem:[%s4392_s15 + $0x2a8] sm:$0xff] }
  0x26   : > { %276 = vst [vmem:[%s4397_s16 + $0xd0] sm:$0xff] %v275_v26  ;;  %v279_v28 = vld [vmem:[%s4392_s15 + $0x2c0] sm:$0xff]  ;;  %v281_v29 = vld [vmem:[%s4392_s15 + $0x2c8] sm:$0xff]  ;;  %278 = vst [vmem:[%s4397_s16 + $0xd8] sm:$0xff] %v277_v27 }
  0x27   : > { %280 = vst [vmem:[%s4397_s16 + $0xe0] sm:$0xff] %v279_v28  ;;  %282 = vst [vmem:[%s4397_s16 + $0xe8] sm:$0xff] %v281_v29  ;;  %v283_v30 = vld [vmem:[%s4392_s15 + $0x2e0] sm:$0xff]  ;;  %v285_v31 = vld [vmem:[%s4392_s15 + $0x2e8] sm:$0xff] }
  0x28   : > { %v287_v32 = vld [vmem:[%s4392_s15 + $0x400] sm:$0xff]  ;;  %284 = vst [vmem:[%s4397_s16 + $0xf0] sm:$0xff] %v283_v30  ;;  %286 = vst [vmem:[%s4397_s16 + $0xf8] sm:$0xff] %v285_v31  ;;  %v289_v33 = vld [vmem:[%s4392_s15 + $0x408] sm:$0xff] }
  0x29   : > { %288 = vst [vmem:[%s4397_s16 + $0x100] sm:$0xff] %v287_v32  ;;  %v291_v34 = vld [vmem:[%s4392_s15 + $0x420] sm:$0xff]  ;;  %v293_v35 = vld [vmem:[%s4392_s15 + $0x428] sm:$0xff]  ;;  %290 = vst [vmem:[%s4397_s16 + $0x108] sm:$0xff] %v289_v33 }
  0x2a   : > { %292 = vst [vmem:[%s4397_s16 + $0x110] sm:$0xff] %v291_v34  ;;  %294 = vst [vmem:[%s4397_s16 + $0x118] sm:$0xff] %v293_v35  ;;  %v295_v36 = vld [vmem:[%s4392_s15 + $0x440] sm:$0xff]  ;;  %v297_v37 = vld [vmem:[%s4392_s15 + $0x448] sm:$0xff] }
  0x2b   : > { %v299_v38 = vld [vmem:[%s4392_s15 + $0x460] sm:$0xff]  ;;  %296 = vst [vmem:[%s4397_s16 + $0x120] sm:$0xff] %v295_v36  ;;  %298 = vst [vmem:[%s4397_s16 + $0x128] sm:$0xff] %v297_v37  ;;  %v301_v39 = vld [vmem:[%s4392_s15 + $0x468] sm:$0xff] }
  0x2c   : > { %300 = vst [vmem:[%s4397_s16 + $0x130] sm:$0xff] %v299_v38  ;;  %v303_v40 = vld [vmem:[%s4392_s15 + $0x480] sm:$0xff]  ;;  %v305_v41 = vld [vmem:[%s4392_s15 + $0x488] sm:$0xff]  ;;  %302 = vst [vmem:[%s4397_s16 + $0x138] sm:$0xff] %v301_v39 }
  0x2d   : > { %304 = vst [vmem:[%s4397_s16 + $0x140] sm:$0xff] %v303_v40  ;;  %306 = vst [vmem:[%s4397_s16 + $0x148] sm:$0xff] %v305_v41  ;;  %v307_v42 = vld [vmem:[%s4392_s15 + $0x4a0] sm:$0xff]  ;;  %v309_v43 = vld [vmem:[%s4392_s15 + $0x4a8] sm:$0xff] }
  0x2e   : > { %v311_v44 = vld [vmem:[%s4392_s15 + $0x4c0] sm:$0xff]  ;;  %308 = vst [vmem:[%s4397_s16 + $0x150] sm:$0xff] %v307_v42  ;;  %310 = vst [vmem:[%s4397_s16 + $0x158] sm:$0xff] %v309_v43  ;;  %v313_v45 = vld [vmem:[%s4392_s15 + $0x4c8] sm:$0xff] }
  0x2f   : > { %312 = vst [vmem:[%s4397_s16 + $0x160] sm:$0xff] %v311_v44  ;;  %v315_v46 = vld [vmem:[%s4392_s15 + $0x4e0] sm:$0xff]  ;;  %v317_v47 = vld [vmem:[%s4392_s15 + $0x4e8] sm:$0xff]  ;;  %314 = vst [vmem:[%s4397_s16 + $0x168] sm:$0xff] %v313_v45 }
  0x30   : > { %316 = vst [vmem:[%s4397_s16 + $0x170] sm:$0xff] %v315_v46  ;;  %318 = vst [vmem:[%s4397_s16 + $0x178] sm:$0xff] %v317_v47 }
  0x31 PF: > { %p3542_p7 = scmp.ge.s32.totalorder %s4293_s24, 1  ;;  %p350_p8 = scmp.lt.s32.totalorder %s4293_s24, 5 }
  0x33   : > { %p351_p9 = pnand %p3542_p7, %p350_p8 }
  0x34   : > { %s357_s17 = sand.u32 (!%p351_p9), 1, %s4269_s18   ;;  %s3543_s27 = sshll.u32 (!%p351_p9), %s4277_s20, 5 }
  0x35   : > { %354 = sbr.rel (%p351_p9) target bundleno = 1244 (0x4dc), region = 59  ;;  %p402_p10 = scmp.lt.s32.totalorder (!%p351_p9), %s3543_s27, 63 }
  0x36   : > { %s3687_s28 = smul.u32 (!%p351_p9), 384, %s357_s17  ;;  %s3545_s29 = sshll.u32 (!%p351_p9), %s4281_s21, 5 }
  0x37   : > { %p408_p11 = scmp.lt.s32.totalorder (!%p351_p9), %s3545_s29, 63  ;;  %p3551_p12 = scmp.ne.s32.totalorder (!%p351_p9), %s4277_s20, 0 }
  0x3c   : > { %s5825_s27 = smov (!%p402_p10, %s3543_s27), 63  ;;  %s5827_s29 = smov (!%p408_p11, %s3545_s29), 63 }
  0x3d   : > { %s3544_s30 = sshll.u32 %s5825_s27, 2  ;;  %s3546_s10 = sshll.u32 %s5827_s29, 3  ;;  %vm430_vm0 = vcmask (!%p3551_p12), 269312   ;;  %v4295_v48 = vmov (!%p3551_p12), 0.0  }
  0x3e   : > { %s4500_s9 = scalar_lea.vmem %s5680_s1, %s3544_s30  ;;  %s4505_s13 = scalar_lea.vmem %s5681_s2, %s3546_s10  ;;  %431 = vst.msk [vmem:[#allocation2] sm:$0xff] (!%p3551_p12), %vm430_vm0, %v4295_v48  ;;  %432 = vst.msk [vmem:[#allocation2 + $0x8] sm:$0xff] (!%p3551_p12), %vm430_vm0, %v4295_v48 }
  0x3f   : > { %s4510_s15 = scalar_lea.vmem %s5682_s3, %s3546_s10  ;;  %s4515_s17 = scalar_lea.vmem %s5684_s5, %s3546_s10  ;;  %433 = vst.msk [vmem:[#allocation2 + $0x10] sm:$0xff] (!%p3551_p12), %vm430_vm0, %v4295_v48  ;;  %434 = vst.msk [vmem:[#allocation2 + $0x18] sm:$0xff] (!%p3551_p12), %vm430_vm0, %v4295_v48 }
  0x40   : > { %s4517_s27 = scalar_lea.vmem [#allocation3], %s3687_s28  ;;  %429 = sbr.rel (%p3551_p12) target bundleno = 110 (0x6e), region = 67  ;;  %435 = vst.msk [vmem:[#allocation2 + $0x20] sm:$0xff] (!%p3551_p12), %vm430_vm0, %v4295_v48  ;;  %436 = vst.msk [vmem:[#allocation2 + $0x28] sm:$0xff] (!%p3551_p12), %vm430_vm0, %v4295_v48 }
  0x41   : > { %437 = vst.msk [vmem:[#allocation2 + $0x30] sm:$0xff] (!%p3551_p12), %vm430_vm0, %v4295_v48  ;;  %438 = vst.msk [vmem:[#allocation2 + $0x38] sm:$0xff] (!%p3551_p12), %vm430_vm0, %v4295_v48 }
  0x42   : > { %439 = vst.msk [vmem:[#allocation2 + $0x40] sm:$0xff] (!%p3551_p12), %vm430_vm0, %v4295_v48  ;;  %440 = vst.msk [vmem:[#allocation2 + $0x48] sm:$0xff] (!%p3551_p12), %vm430_vm0, %v4295_v48 }
  0x43   : > { %441 = vst.msk [vmem:[#allocation2 + $0x50] sm:$0xff] (!%p3551_p12), %vm430_vm0, %v4295_v48  ;;  %442 = vst.msk [vmem:[#allocation2 + $0x58] sm:$0xff] (!%p3551_p12), %vm430_vm0, %v4295_v48 }
  0x44   : > { %443 = vst.msk [vmem:[#allocation2 + $0x60] sm:$0xff] (!%p3551_p12), %vm430_vm0, %v4295_v48  ;;  %444 = vst.msk [vmem:[#allocation2 + $0x68] sm:$0xff] (!%p3551_p12), %vm430_vm0, %v4295_v48 }
  0x45   : > { %445 = vst.msk [vmem:[#allocation2 + $0x70] sm:$0xff] (!%p3551_p12), %vm430_vm0, %v4295_v48  ;;  %446 = vst.msk [vmem:[#allocation2 + $0x78] sm:$0xff] (!%p3551_p12), %vm430_vm0, %v4295_v48 }
  0x46   : > { %447 = vst.msk [vmem:[#allocation2 + $0x80] sm:$0xff] (!%p3551_p12), %vm430_vm0, %v4295_v48  ;;  %448 = vst.msk [vmem:[#allocation2 + $0x88] sm:$0xff] (!%p3551_p12), %vm430_vm0, %v4295_v48 }
  0x47   : > { %449 = vst.msk [vmem:[#allocation2 + $0x90] sm:$0xff] %vm430_vm0, %v4295_v48  ;;  %450 = vst.msk [vmem:[#allocation2 + $0x98] sm:$0xff] %vm430_vm0, %v4295_v48 }
  0x48   : > { %451 = vst.msk [vmem:[#allocation2 + $0xa0] sm:$0xff] %vm430_vm0, %v4295_v48  ;;  %452 = vst.msk [vmem:[#allocation2 + $0xa8] sm:$0xff] %vm430_vm0, %v4295_v48 }
  0x49   : > { %453 = vst.msk [vmem:[#allocation2 + $0xb0] sm:$0xff] %vm430_vm0, %v4295_v48  ;;  %454 = vst.msk [vmem:[#allocation2 + $0xb8] sm:$0xff] %vm430_vm0, %v4295_v48 }
  0x4a   : > { %455 = vst.msk [vmem:[#allocation2 + $0xc0] sm:$0xff] %vm430_vm0, %v4295_v48  ;;  %456 = vst.msk [vmem:[#allocation2 + $0xc8] sm:$0xff] %vm430_vm0, %v4295_v48 }
  0x4b   : > { %457 = vst.msk [vmem:[#allocation2 + $0xd0] sm:$0xff] %vm430_vm0, %v4295_v48  ;;  %458 = vst.msk [vmem:[#allocation2 + $0xd8] sm:$0xff] %vm430_vm0, %v4295_v48 }
  0x4c   : > { %459 = vst.msk [vmem:[#allocation2 + $0xe0] sm:$0xff] %vm430_vm0, %v4295_v48  ;;  %460 = vst.msk [vmem:[#allocation2 + $0xe8] sm:$0xff] %vm430_vm0, %v4295_v48 }
  0x4d   : > { %461 = vst.msk [vmem:[#allocation2 + $0xf0] sm:$0xff] %vm430_vm0, %v4295_v48  ;;  %462 = vst.msk [vmem:[#allocation2 + $0xf8] sm:$0xff] %vm430_vm0, %v4295_v48 }
  0x4e   : > { %463 = vst.msk [vmem:[#allocation2 + $0x100] sm:$0xff] %vm430_vm0, %v4295_v48  ;;  %464 = vst.msk [vmem:[#allocation2 + $0x108] sm:$0xff] %vm430_vm0, %v4295_v48 }
  0x4f   : > { %465 = vst.msk [vmem:[#allocation2 + $0x110] sm:$0xff] %vm430_vm0, %v4295_v48  ;;  %466 = vst.msk [vmem:[#allocation2 + $0x118] sm:$0xff] %vm430_vm0, %v4295_v48 }
  0x50   : > { %467 = vst.msk [vmem:[#allocation2 + $0x120] sm:$0xff] %vm430_vm0, %v4295_v48  ;;  %468 = vst.msk [vmem:[#allocation2 + $0x128] sm:$0xff] %vm430_vm0, %v4295_v48 }
  0x51   : > { %469 = vst.msk [vmem:[#allocation2 + $0x130] sm:$0xff] %vm430_vm0, %v4295_v48  ;;  %470 = vst.msk [vmem:[#allocation2 + $0x138] sm:$0xff] %vm430_vm0, %v4295_v48 }
  0x52   : > { %471 = vst.msk [vmem:[#allocation2 + $0x140] sm:$0xff] %vm430_vm0, %v4295_v48  ;;  %472 = vst.msk [vmem:[#allocation2 + $0x148] sm:$0xff] %vm430_vm0, %v4295_v48 }
  0x53   : > { %473 = vst.msk [vmem:[#allocation2 + $0x150] sm:$0xff] %vm430_vm0, %v4295_v48  ;;  %474 = vst.msk [vmem:[#allocation2 + $0x158] sm:$0xff] %vm430_vm0, %v4295_v48 }
  0x54   : > { %475 = vst.msk [vmem:[#allocation2 + $0x160] sm:$0xff] %vm430_vm0, %v4295_v48  ;;  %476 = vst.msk [vmem:[#allocation2 + $0x168] sm:$0xff] %vm430_vm0, %v4295_v48 }
  0x55   : > { %477 = vst.msk [vmem:[#allocation2 + $0x170] sm:$0xff] %vm430_vm0, %v4295_v48  ;;  %478 = vst.msk [vmem:[#allocation2 + $0x178] sm:$0xff] %vm430_vm0, %v4295_v48 }
  0x56   : > { %479 = vst.msk [vmem:[#allocation2 + $0x180] sm:$0xff] %vm430_vm0, %v4295_v48  ;;  %480 = vst.msk [vmem:[#allocation2 + $0x188] sm:$0xff] %vm430_vm0, %v4295_v48 }
  0x57   : > { %481 = vst.msk [vmem:[#allocation2 + $0x190] sm:$0xff] %vm430_vm0, %v4295_v48  ;;  %482 = vst.msk [vmem:[#allocation2 + $0x198] sm:$0xff] %vm430_vm0, %v4295_v48 }
  0x58   : > { %483 = vst.msk [vmem:[#allocation2 + $0x1a0] sm:$0xff] %vm430_vm0, %v4295_v48  ;;  %484 = vst.msk [vmem:[#allocation2 + $0x1a8] sm:$0xff] %vm430_vm0, %v4295_v48 }
  0x59   : > { %485 = vst.msk [vmem:[#allocation2 + $0x1b0] sm:$0xff] %vm430_vm0, %v4295_v48  ;;  %486 = vst.msk [vmem:[#allocation2 + $0x1b8] sm:$0xff] %vm430_vm0, %v4295_v48 }
  0x5a   : > { %487 = vst.msk [vmem:[#allocation2 + $0x1c0] sm:$0xff] %vm430_vm0, %v4295_v48  ;;  %488 = vst.msk [vmem:[#allocation2 + $0x1c8] sm:$0xff] %vm430_vm0, %v4295_v48 }
  0x5b   : > { %489 = vst.msk [vmem:[#allocation2 + $0x1d0] sm:$0xff] %vm430_vm0, %v4295_v48  ;;  %490 = vst.msk [vmem:[#allocation2 + $0x1d8] sm:$0xff] %vm430_vm0, %v4295_v48 }
  0x5c   : > { %491 = vst.msk [vmem:[#allocation2 + $0x1e0] sm:$0xff] %vm430_vm0, %v4295_v48  ;;  %492 = vst.msk [vmem:[#allocation2 + $0x1e8] sm:$0xff] %vm430_vm0, %v4295_v48 }
  0x5d   : > { %493 = vst.msk [vmem:[#allocation2 + $0x1f0] sm:$0xff] %vm430_vm0, %v4295_v48  ;;  %494 = vst.msk [vmem:[#allocation2 + $0x1f8] sm:$0xff] %vm430_vm0, %v4295_v48 }
  0x5e   : > { %495 = vst.msk [vmem:[#allocation2 + $0x200] sm:$0xff] %vm430_vm0, %v4295_v48  ;;  %496 = vst.msk [vmem:[#allocation2 + $0x208] sm:$0xff] %vm430_vm0, %v4295_v48 }
  0x5f   : > { %497 = vst.msk [vmem:[#allocation2 + $0x210] sm:$0xff] %vm430_vm0, %v4295_v48  ;;  %498 = vst.msk [vmem:[#allocation2 + $0x218] sm:$0xff] %vm430_vm0, %v4295_v48 }
  0x60   : > { %499 = vst.msk [vmem:[#allocation2 + $0x220] sm:$0xff] %vm430_vm0, %v4295_v48  ;;  %500 = vst.msk [vmem:[#allocation2 + $0x228] sm:$0xff] %vm430_vm0, %v4295_v48 }
  0x61   : > { %501 = vst.msk [vmem:[#allocation2 + $0x230] sm:$0xff] %vm430_vm0, %v4295_v48  ;;  %502 = vst.msk [vmem:[#allocation2 + $0x238] sm:$0xff] %vm430_vm0, %v4295_v48 }
  0x62   : > { %503 = vst.msk [vmem:[#allocation2 + $0x240] sm:$0xff] %vm430_vm0, %v4295_v48  ;;  %504 = vst.msk [vmem:[#allocation2 + $0x248] sm:$0xff] %vm430_vm0, %v4295_v48 }
  0x63   : > { %505 = vst.msk [vmem:[#allocation2 + $0x250] sm:$0xff] %vm430_vm0, %v4295_v48  ;;  %506 = vst.msk [vmem:[#allocation2 + $0x258] sm:$0xff] %vm430_vm0, %v4295_v48 }
  0x64   : > { %507 = vst.msk [vmem:[#allocation2 + $0x260] sm:$0xff] %vm430_vm0, %v4295_v48  ;;  %508 = vst.msk [vmem:[#allocation2 + $0x268] sm:$0xff] %vm430_vm0, %v4295_v48 }
  0x65   : > { %509 = vst.msk [vmem:[#allocation2 + $0x270] sm:$0xff] %vm430_vm0, %v4295_v48  ;;  %510 = vst.msk [vmem:[#allocation2 + $0x278] sm:$0xff] %vm430_vm0, %v4295_v48 }
  0x66   : > { %511 = vst.msk [vmem:[#allocation2 + $0x280] sm:$0xff] %vm430_vm0, %v4295_v48  ;;  %512 = vst.msk [vmem:[#allocation2 + $0x288] sm:$0xff] %vm430_vm0, %v4295_v48 }
  0x67   : > { %513 = vst.msk [vmem:[#allocation2 + $0x290] sm:$0xff] %vm430_vm0, %v4295_v48  ;;  %514 = vst.msk [vmem:[#allocation2 + $0x298] sm:$0xff] %vm430_vm0, %v4295_v48 }
  0x68   : > { %515 = vst.msk [vmem:[#allocation2 + $0x2a0] sm:$0xff] %vm430_vm0, %v4295_v48  ;;  %516 = vst.msk [vmem:[#allocation2 + $0x2a8] sm:$0xff] %vm430_vm0, %v4295_v48 }
  0x69   : > { %517 = vst.msk [vmem:[#allocation2 + $0x2b0] sm:$0xff] %vm430_vm0, %v4295_v48  ;;  %518 = vst.msk [vmem:[#allocation2 + $0x2b8] sm:$0xff] %vm430_vm0, %v4295_v48 }
  0x6a   : > { %519 = vst.msk [vmem:[#allocation2 + $0x2c0] sm:$0xff] %vm430_vm0, %v4295_v48  ;;  %520 = vst.msk [vmem:[#allocation2 + $0x2c8] sm:$0xff] %vm430_vm0, %v4295_v48 }
  0x6b   : > { %521 = vst.msk [vmem:[#allocation2 + $0x2d0] sm:$0xff] %vm430_vm0, %v4295_v48  ;;  %522 = vst.msk [vmem:[#allocation2 + $0x2d8] sm:$0xff] %vm430_vm0, %v4295_v48 }
  0x6c   : > { %523 = vst.msk [vmem:[#allocation2 + $0x2e0] sm:$0xff] %vm430_vm0, %v4295_v48  ;;  %524 = vst.msk [vmem:[#allocation2 + $0x2e8] sm:$0xff] %vm430_vm0, %v4295_v48 }
  0x6d   : > { %525 = vst.msk [vmem:[#allocation2 + $0x2f0] sm:$0xff] %vm430_vm0, %v4295_v48  ;;  %526 = vst.msk [vmem:[#allocation2 + $0x2f8] sm:$0xff] %vm430_vm0, %v4295_v48 }
  0x6e PF: > { %v3751_v49 = vld [vmem:[%s4500_s9] sm:$0xff]   ;;  %v4296_v50 = vmov 0   ;;  %v3752_v51 = vld [vmem:[%s4500_s9 + $0x8] sm:$0xff]   ;;  %v3753_v52 = vld [vmem:[%s4500_s9 + $0x10] sm:$0xff]   ;;  %vm1408_vm1 = vcmask 269312   ;;  %p3568_p13 = scmp.ne.s32.totalorder %s4277_s20, 1 }
  0x6f   : > { %895 = vmatprep.subr.bf16.mxu0 %v4296_v50  ;;  %3634 = vmatprep.subr.bf16.mxu1 %v4296_v50  ;;  %v3754_v53 = vld [vmem:[%s4500_s9 + $0x18] sm:$0xff]   ;;  %v3755_v54 = vld [vmem:[%s4500_s9 + $0x20] sm:$0xff]   ;;  %v4728_v55 = vld [vmem:[%s4517_s27 + $0x8] sm:$0xff] }
  0x70   : > { %896 = vmatpush1.bf16.msra.mxu0 %v3751_v49  ;;  %3650 = vmatpush1.bf16.msra.mxu1 %v3751_v49  ;;  %v4731_v56 = vld [vmem:[%s4517_s27 + $0xc8] sm:$0xff]  ;;  %v576_v57 = vunpack.c.l.s8.bf16 %v4728_v55  ;;  %v3757_v60 = vld [vmem:[%s4500_s9 + $0x30] sm:$0xff]   ;;  %v3758_v61 = vld [vmem:[%s4500_s9 + $0x38] sm:$0xff]   ;;  %v578_v10 = vunpack.c.h.s8.bf16 %v4728_v55 }
  0x71   : > { %897 = vmatprep.subr.bf16.mxu0 %v4296_v50  ;;  %3635 = vmatprep.subr.bf16.mxu1 %v4296_v50  ;;  %v624_v58 = vunpack.c.l.s8.bf16 %v4731_v56  ;;  %v3756_v59 = vld [vmem:[%s4500_s9 + $0x28] sm:$0xff]   ;;  %v3759_v62 = vld [vmem:[%s4500_s9 + $0x40] sm:$0xff]   ;;  %v3761_v0 = vld [vmem:[%s4500_s9 + $0x50] sm:$0xff]   ;;  %v626_v11 = vunpack.c.h.s8.bf16 %v4731_v56 }
  0x72   : > { %927 = vmatprep.mubr.bf16.mxu0 %v576_v57  ;;  %v3760_v63 = vld [vmem:[%s4500_s9 + $0x48] sm:$0xff]   ;;  %v3762_v1 = vld [vmem:[%s4500_s9 + $0x58] sm:$0xff]   ;;  %v3763_v2 = vld [vmem:[%s4500_s9 + $0x60] sm:$0xff]  }
  0x73   : > { %1119 = vmatprep.mubr.bf16.mxu1 %v624_v58  ;;  %v3764_v3 = vld [vmem:[%s4500_s9 + $0x68] sm:$0xff]   ;;  %v3765_v4 = vld [vmem:[%s4500_s9 + $0x70] sm:$0xff]   ;;  %v3766_v5 = vld [vmem:[%s4500_s9 + $0x78] sm:$0xff]  }
  0x74   : > { %898 = vmatpush1.bf16.msra.mxu0 %v3752_v51  ;;  %3651 = vmatpush1.bf16.msra.mxu1 %v3752_v51  ;;  %v527_v6 = vld [vmem:[%s4517_s27] sm:$0xff]  ;;  %v530_v12 = vld [vmem:[%s4517_s27 + $0x18] sm:$0xff]  ;;  %v529_v18 = vld [vmem:[%s4517_s27 + $0x10] sm:$0xff] }
  0x75   : > { %899 = vmatprep.subr.bf16.mxu0 %v4296_v50  ;;  %3636 = vmatprep.subr.bf16.mxu1 %v4296_v50  ;;  %v551_v7 = vld [vmem:[%s4517_s27 + $0xc0] sm:$0xff]  ;;  %v575_v8 = vunpack.c.l.s8.bf16 %v527_v6  ;;  %v554_v13 = vld [vmem:[%s4517_s27 + $0xd8] sm:$0xff]  ;;  %v577_v14 = vunpack.c.h.s8.bf16 %v527_v6  ;;  %v580_v16 = vunpack.c.l.s8.bf16 %v530_v12  ;;  %v553_v19 = vld [vmem:[%s4517_s27 + $0xd0] sm:$0xff]  ;;  %v579_v20 = vunpack.c.l.s8.bf16 %v529_v18 }
  0x76   : > { %v623_v9 = vunpack.c.l.s8.bf16 %v551_v7  ;;  %v625_v15 = vunpack.c.h.s8.bf16 %v551_v7  ;;  %v628_v17 = vunpack.c.l.s8.bf16 %v554_v13  ;;  %v627_v21 = vunpack.c.l.s8.bf16 %v553_v19  ;;  %v532_v24 = vld [vmem:[%s4517_s27 + $0x28] sm:$0xff]  ;;  %v531_v30 = vld [vmem:[%s4517_s27 + $0x20] sm:$0xff]  ;;  %v534_v36 = vld [vmem:[%s4517_s27 + $0x38] sm:$0xff] }
  0x77   : > { %v582_v22 = vunpack.c.h.s8.bf16 %v530_v12  ;;  %v630_v23 = vunpack.c.h.s8.bf16 %v554_v13  ;;  %v556_v25 = vld [vmem:[%s4517_s27 + $0xe8] sm:$0xff]  ;;  %v581_v26 = vunpack.c.h.s8.bf16 %v529_v18  ;;  %v629_v27 = vunpack.c.h.s8.bf16 %v553_v19  ;;  %v555_v31 = vld [vmem:[%s4517_s27 + $0xe0] sm:$0xff]  ;;  %v558_v37 = vld [vmem:[%s4517_s27 + $0xf8] sm:$0xff] }
  0x78   : > { %900 = vmatpush1.bf16.msra.mxu0 %v3753_v52  ;;  %3652 = vmatpush1.bf16.msra.mxu1 %v3753_v52  ;;  %v584_v28 = vunpack.c.l.s8.bf16 %v532_v24  ;;  %v632_v29 = vunpack.c.l.s8.bf16 %v556_v25  ;;  %v583_v32 = vunpack.c.l.s8.bf16 %v531_v30  ;;  %v631_v33 = vunpack.c.l.s8.bf16 %v555_v31  ;;  %v533_v42 = vld [vmem:[%s4517_s27 + $0x30] sm:$0xff]  ;;  %v536_v48 = vld [vmem:[%s4517_s27 + $0x48] sm:$0xff]  ;;  %v559_v55 = vld [vmem:[%s4517_s27 + $0x100] sm:$0xff] }
  0x79   : > { %901 = vmatprep.subr.bf16.mxu0 %v4296_v50  ;;  %3637 = vmatprep.subr.bf16.mxu1 %v4296_v50  ;;  %v586_v34 = vunpack.c.h.s8.bf16 %v532_v24  ;;  %v634_v35 = vunpack.c.h.s8.bf16 %v556_v25  ;;  %v585_v38 = vunpack.c.h.s8.bf16 %v531_v30  ;;  %v633_v39 = vunpack.c.h.s8.bf16 %v555_v31  ;;  %v557_v43 = vld [vmem:[%s4517_s27 + $0xf0] sm:$0xff]  ;;  %v560_v49 = vld [vmem:[%s4517_s27 + $0x108] sm:$0xff] }
  0x7a   : > { %v588_v40 = vunpack.c.l.s8.bf16 %v534_v36  ;;  %v636_v41 = vunpack.c.l.s8.bf16 %v558_v37  ;;  %v587_v44 = vunpack.c.l.s8.bf16 %v533_v42  ;;  %v635_v45 = vunpack.c.l.s8.bf16 %v557_v43 }
  0x7b   : > { %v590_v46 = vunpack.c.h.s8.bf16 %v534_v36  ;;  %v638_v47 = vunpack.c.h.s8.bf16 %v558_v37  ;;  %v637_v51 = vunpack.c.h.s8.bf16 %v557_v43  ;;  %v592_v52 = vunpack.c.l.s8.bf16 %v536_v48 }
  0x7c   : > { %902 = vmatpush1.bf16.msra.mxu0 %v3754_v53  ;;  %3653 = vmatpush1.bf16.msra.mxu1 %v3754_v53  ;;  %v640_v53 = vunpack.c.l.s8.bf16 %v560_v49  ;;  %v639_v57 = vunpack.c.l.s8.bf16 %v559_v55  ;;  %v594_v58 = vunpack.c.h.s8.bf16 %v536_v48 }
  0x7d   : > { %903 = vmatprep.subr.bf16.mxu0 %v4296_v50  ;;  %3638 = vmatprep.subr.bf16.mxu1 %v4296_v50 }
  0x80   : > { %904 = vmatpush1.bf16.msra.mxu0 %v3755_v54  ;;  %3654 = vmatpush1.bf16.msra.mxu1 %v3755_v54  ;;  %v535_v54 = vld [vmem:[%s4517_s27 + $0x40] sm:$0xff] }
  0x81   : > { %905 = vmatprep.subr.bf16.mxu0 %v4296_v50  ;;  %3639 = vmatprep.subr.bf16.mxu1 %v4296_v50  ;;  %v591_v56 = vunpack.c.l.s8.bf16 %v535_v54 }
  0x84   : > { %906 = vmatpush1.bf16.msra.mxu0 %v3756_v59  ;;  %3655 = vmatpush1.bf16.msra.mxu1 %v3756_v59  ;;  %v642_v59 = vunpack.c.h.s8.bf16 %v560_v49 }
  0x85   : > { %907 = vmatprep.subr.bf16.mxu0 %v4296_v50  ;;  %3640 = vmatprep.subr.bf16.mxu1 %v4296_v50 }
  0x88   : > { %908 = vmatpush1.bf16.msra.mxu0 %v3757_v60  ;;  %3656 = vmatpush1.bf16.msra.mxu1 %v3757_v60  ;;  %v538_v60 = vld [vmem:[%s4517_s27 + $0x58] sm:$0xff] }
  0x89   : > { %909 = vmatprep.subr.bf16.mxu0 %v4296_v50  ;;  %3641 = vmatprep.subr.bf16.mxu1 %v4296_v50  ;;  %v598_v6 = vunpack.c.h.s8.bf16 %v538_v60 }
  0x8c   : > { %910 = vmatpush1.bf16.msra.mxu0 %v3758_v61  ;;  %3657 = vmatpush1.bf16.msra.mxu1 %v3758_v61  ;;  %v562_v61 = vld [vmem:[%s4517_s27 + $0x118] sm:$0xff] }
  0x8d   : > { %911 = vmatprep.subr.bf16.mxu0 %v4296_v50  ;;  %3642 = vmatprep.subr.bf16.mxu1 %v4296_v50  ;;  %v646_v7 = vunpack.c.h.s8.bf16 %v562_v61 }
  0x90   : > { %912 = vmatpush1.bf16.msra.mxu0 %v3759_v62  ;;  %3658 = vmatpush1.bf16.msra.mxu1 %v3759_v62  ;;  %v593_v62 = vunpack.c.h.s8.bf16 %v535_v54 }
  0x91   : > { %913 = vmatprep.subr.bf16.mxu0 %v4296_v50  ;;  %3643 = vmatprep.subr.bf16.mxu1 %v4296_v50 }
  0x94   : > { %914 = vmatpush1.bf16.msra.mxu0 %v3760_v63  ;;  %3659 = vmatpush1.bf16.msra.mxu1 %v3760_v63  ;;  %v641_v63 = vunpack.c.h.s8.bf16 %v559_v55 }
  0x95   : > { %915 = vmatprep.subr.bf16.mxu0 %v4296_v50  ;;  %3644 = vmatprep.subr.bf16.mxu1 %v4296_v50 }
  0x98   : > { %916 = vmatpush1.bf16.msra.mxu0 %v3761_v0  ;;  %3660 = vmatpush1.bf16.msra.mxu1 %v3761_v0  ;;  %v596_v0 = vunpack.c.l.s8.bf16 %v538_v60 }
  0x99   : > { %917 = vmatprep.subr.bf16.mxu0 %v4296_v50  ;;  %3645 = vmatprep.subr.bf16.mxu1 %v4296_v50 }
  0x9c   : > { %918 = vmatpush1.bf16.msra.mxu0 %v3762_v1  ;;  %3661 = vmatpush1.bf16.msra.mxu1 %v3762_v1  ;;  %v644_v1 = vunpack.c.l.s8.bf16 %v562_v61 }
  0x9d   : > { %919 = vmatprep.subr.bf16.mxu0 %v4296_v50  ;;  %3646 = vmatprep.subr.bf16.mxu1 %v4296_v50 }
  0xa0   : > { %920 = vmatpush1.bf16.msra.mxu0 %v3763_v2  ;;  %3662 = vmatpush1.bf16.msra.mxu1 %v3763_v2  ;;  %v537_v2 = vld [vmem:[%s4517_s27 + $0x50] sm:$0xff] }
  0xa1   : > { %921 = vmatprep.subr.bf16.mxu0 %v4296_v50  ;;  %3647 = vmatprep.subr.bf16.mxu1 %v4296_v50 }
  0xa4   : > { %922 = vmatpush1.bf16.msra.mxu0 %v3764_v3  ;;  %3663 = vmatpush1.bf16.msra.mxu1 %v3764_v3  ;;  %v561_v3 = vld [vmem:[%s4517_s27 + $0x110] sm:$0xff] }
  0xa5   : > { %923 = vmatprep.subr.bf16.mxu0 %v4296_v50  ;;  %3648 = vmatprep.subr.bf16.mxu1 %v4296_v50 }
  0xa8   : > { %924 = vmatpush1.bf16.msra.mxu0 %v3765_v4  ;;  %3664 = vmatpush1.bf16.msra.mxu1 %v3765_v4  ;;  %v595_v4 = vunpack.c.l.s8.bf16 %v537_v2 }
  0xa9   : > { %925 = vmatprep.subr.bf16.mxu0 %v4296_v50  ;;  %3649 = vmatprep.subr.bf16.mxu1 %v4296_v50  ;;  %v589_v50 = vunpack.c.h.s8.bf16 %v533_v42 }
  0xac   : > { %926 = vmatpush1.bf16.msra.mxu0 %v3766_v5  ;;  %3665 = vmatpush1.bf16.msra.mxu1 %v3766_v5  ;;  %v643_v5 = vunpack.c.l.s8.bf16 %v561_v3 }
  0xaf   : > { %928 = vmatmul.mubr.bf16.vlgmr.msra.gmra.mrb[0].mxu0 %v575_v8  ;;  %1120 = vmatmul.mubr.bf16.vlgmr.msra.gmra.mrb[0].mxu1 %v623_v9  ;;  %v540_v8 = vld [vmem:[%s4517_s27 + $0x68] sm:$0xff] }
  0xb0   : > { %935 = vmatprep.mubr.bf16.mxu0 %v578_v10  ;;  %1127 = vmatprep.mubr.bf16.mxu1 %v626_v11  ;;  %v564_v9 = vld [vmem:[%s4517_s27 + $0x128] sm:$0xff]  ;;  %v597_v10 = vunpack.c.h.s8.bf16 %v537_v2  ;;  %v645_v11 = vunpack.c.h.s8.bf16 %v561_v3  ;;  %v600_v12 = vunpack.c.l.s8.bf16 %v540_v8  ;;  %v602_v18 = vunpack.c.h.s8.bf16 %v540_v8 }
  0xb1   : > { %v648_v13 = vunpack.c.l.s8.bf16 %v564_v9  ;;  %v650_v19 = vunpack.c.h.s8.bf16 %v564_v9 }
  0xb7   : > { %936 = vmatmul.mubr.bf16.gmra.mrb[4].mxu0 %v577_v14  ;;  %1128 = vmatmul.mubr.bf16.gmra.mrb[4].mxu1 %v625_v15  ;;  %v539_v14 = vld [vmem:[%s4517_s27 + $0x60] sm:$0xff] }
  0xb8   : > { %943 = vmatprep.mubr.bf16.mxu0 %v580_v16  ;;  %1135 = vmatprep.mubr.bf16.mxu1 %v628_v17  ;;  %v563_v15 = vld [vmem:[%s4517_s27 + $0x120] sm:$0xff]  ;;  %v599_v16 = vunpack.c.l.s8.bf16 %v539_v14 }
  0xb9   : > { %v647_v17 = vunpack.c.l.s8.bf16 %v563_v15 }
  0xbf   : > { %944 = vmatmul.mubr.bf16.gmra.mrb[8].mxu0 %v579_v20  ;;  %1136 = vmatmul.mubr.bf16.gmra.mrb[8].mxu1 %v627_v21  ;;  %v542_v20 = vld [vmem:[%s4517_s27 + $0x78] sm:$0xff] }
  0xc0   : > { %951 = vmatprep.mubr.bf16.mxu0 %v582_v22  ;;  %1143 = vmatprep.mubr.bf16.mxu1 %v630_v23  ;;  %v566_v21 = vld [vmem:[%s4517_s27 + $0x138] sm:$0xff]  ;;  %v601_v22 = vunpack.c.h.s8.bf16 %v539_v14  ;;  %v649_v23 = vunpack.c.h.s8.bf16 %v563_v15  ;;  %v604_v24 = vunpack.c.l.s8.bf16 %v542_v20  ;;  %v606_v30 = vunpack.c.h.s8.bf16 %v542_v20 }
  0xc1   : > { %v652_v25 = vunpack.c.l.s8.bf16 %v566_v21  ;;  %v654_v31 = vunpack.c.h.s8.bf16 %v566_v21 }
  0xc7   : > { %952 = vmatmul.mubr.bf16.gmra.mrb[12].mxu0 %v581_v26  ;;  %1144 = vmatmul.mubr.bf16.gmra.mrb[12].mxu1 %v629_v27  ;;  %v541_v26 = vld [vmem:[%s4517_s27 + $0x70] sm:$0xff] }
  0xc8   : > { %959 = vmatprep.mubr.bf16.mxu0 %v584_v28  ;;  %1151 = vmatprep.mubr.bf16.mxu1 %v632_v29  ;;  %v565_v27 = vld [vmem:[%s4517_s27 + $0x130] sm:$0xff]  ;;  %v603_v28 = vunpack.c.l.s8.bf16 %v541_v26 }
  0xc9   : > { %v651_v29 = vunpack.c.l.s8.bf16 %v565_v27 }
  0xcf   : > { %960 = vmatmul.mubr.bf16.gmra.mrb[16].mxu0 %v583_v32  ;;  %1152 = vmatmul.mubr.bf16.gmra.mrb[16].mxu1 %v631_v33  ;;  %v544_v32 = vld [vmem:[%s4517_s27 + $0x88] sm:$0xff] }
  0xd0   : > { %967 = vmatprep.mubr.bf16.mxu0 %v586_v34  ;;  %1159 = vmatprep.mubr.bf16.mxu1 %v634_v35  ;;  %v568_v33 = vld [vmem:[%s4517_s27 + $0x148] sm:$0xff]  ;;  %v605_v34 = vunpack.c.h.s8.bf16 %v541_v26  ;;  %v653_v35 = vunpack.c.h.s8.bf16 %v565_v27  ;;  %v608_v36 = vunpack.c.l.s8.bf16 %v544_v32  ;;  %v610_v42 = vunpack.c.h.s8.bf16 %v544_v32 }
  0xd1   : > { %v656_v37 = vunpack.c.l.s8.bf16 %v568_v33  ;;  %v658_v43 = vunpack.c.h.s8.bf16 %v568_v33 }
  0xd7   : > { %968 = vmatmul.mubr.bf16.gmra.mrb[20].mxu0 %v585_v38  ;;  %1160 = vmatmul.mubr.bf16.gmra.mrb[20].mxu1 %v633_v39  ;;  %v543_v38 = vld [vmem:[%s4517_s27 + $0x80] sm:$0xff] }
  0xd8   : > { %975 = vmatprep.mubr.bf16.mxu0 %v588_v40  ;;  %1167 = vmatprep.mubr.bf16.mxu1 %v636_v41  ;;  %v567_v39 = vld [vmem:[%s4517_s27 + $0x140] sm:$0xff]  ;;  %v607_v40 = vunpack.c.l.s8.bf16 %v543_v38 }
  0xd9   : > { %v655_v41 = vunpack.c.l.s8.bf16 %v567_v39 }
  0xdf   : > { %976 = vmatmul.mubr.bf16.gmra.mrb[24].mxu0 %v587_v44  ;;  %1168 = vmatmul.mubr.bf16.gmra.mrb[24].mxu1 %v635_v45  ;;  %v546_v44 = vld [vmem:[%s4517_s27 + $0x98] sm:$0xff] }
  0xe0   : > { %983 = vmatprep.mubr.bf16.mxu0 %v590_v46  ;;  %1175 = vmatprep.mubr.bf16.mxu1 %v638_v47  ;;  %v570_v45 = vld [vmem:[%s4517_s27 + $0x158] sm:$0xff]  ;;  %v609_v46 = vunpack.c.h.s8.bf16 %v543_v38  ;;  %v657_v47 = vunpack.c.h.s8.bf16 %v567_v39  ;;  %v612_v48 = vunpack.c.l.s8.bf16 %v546_v44  ;;  %v614_v54 = vunpack.c.h.s8.bf16 %v546_v44 }
  0xe1   : > { %v660_v49 = vunpack.c.l.s8.bf16 %v570_v45  ;;  %v662_v55 = vunpack.c.h.s8.bf16 %v570_v45  ;;  %v674_v38 = vld [vmem:[#allocation2 + $0x18] sm:$0xff] }
  0xe2   : > { %v722_v39 = vld [vmem:[#allocation2 + $0x198] sm:$0xff] }
  0xe7   : > { %984 = vmatmul.mubr.bf16.gmra.mrb[28].mxu0 %v589_v50  ;;  %1176 = vmatmul.mubr.bf16.gmra.mrb[28].mxu1 %v637_v51  ;;  %v545_v50 = vld [vmem:[%s4517_s27 + $0x90] sm:$0xff] }
  0xe8   : > { %991 = vmatprep.mubr.bf16.mxu0 %v592_v52  ;;  %1183 = vmatprep.mubr.bf16.mxu1 %v640_v53  ;;  %v569_v51 = vld [vmem:[%s4517_s27 + $0x150] sm:$0xff]  ;;  %v611_v52 = vunpack.c.l.s8.bf16 %v545_v50 }
  0xe9   : > { %v659_v53 = vunpack.c.l.s8.bf16 %v569_v51 }
  0xef   : > { %992 = vmatmul.mubr.bf16.gmra.mrb[32].mxu0 %v591_v56  ;;  %1184 = vmatmul.mubr.bf16.gmra.mrb[32].mxu1 %v639_v57  ;;  %v548_v56 = vld [vmem:[%s4517_s27 + $0xa8] sm:$0xff] }
  0xf0   : > { %999 = vmatprep.mubr.bf16.mxu0 %v594_v58  ;;  %1191 = vmatprep.mubr.bf16.mxu1 %v642_v59  ;;  %v572_v57 = vld [vmem:[%s4517_s27 + $0x168] sm:$0xff]  ;;  %v613_v58 = vunpack.c.h.s8.bf16 %v545_v50  ;;  %v661_v59 = vunpack.c.h.s8.bf16 %v569_v51  ;;  %v616_v60 = vunpack.c.l.s8.bf16 %v548_v56  ;;  %v618_v2 = vunpack.c.h.s8.bf16 %v548_v56  ;;  %v675_v50 = vld [vmem:[#allocation2 + $0x20] sm:$0xff] }
  0xf1   : > { %v664_v61 = vunpack.c.l.s8.bf16 %v572_v57  ;;  %v666_v3 = vunpack.c.h.s8.bf16 %v572_v57  ;;  %v723_v51 = vld [vmem:[#allocation2 + $0x1a0] sm:$0xff] }
  0xf7   : > { %1000 = vmatmul.mubr.bf16.gmra.mrb[36].mxu0 %v593_v62  ;;  %1192 = vmatmul.mubr.bf16.gmra.mrb[36].mxu1 %v641_v63  ;;  %v547_v62 = vld [vmem:[%s4517_s27 + $0xa0] sm:$0xff] }
  0xf8   : > { %1007 = vmatprep.mubr.bf16.mxu0 %v596_v0  ;;  %1199 = vmatprep.mubr.bf16.mxu1 %v644_v1  ;;  %v571_v63 = vld [vmem:[%s4517_s27 + $0x160] sm:$0xff]  ;;  %v615_v0 = vunpack.c.l.s8.bf16 %v547_v62 }
  0xf9   : > { %v663_v1 = vunpack.c.l.s8.bf16 %v571_v63 }
  0xff   : > { %1008 = vmatmul.mubr.bf16.gmra.mrb[40].mxu0 %v595_v4  ;;  %1200 = vmatmul.mubr.bf16.gmra.mrb[40].mxu1 %v643_v5  ;;  %v550_v4 = vld [vmem:[%s4517_s27 + $0xb8] sm:$0xff] }
 0x100   : > { %1015 = vmatprep.mubr.bf16.mxu0 %v598_v6  ;;  %1207 = vmatprep.mubr.bf16.mxu1 %v646_v7  ;;  %v574_v5 = vld [vmem:[%s4517_s27 + $0x178] sm:$0xff]  ;;  %v617_v6 = vunpack.c.h.s8.bf16 %v547_v62  ;;  %v665_v7 = vunpack.c.h.s8.bf16 %v571_v63  ;;  %v620_v8 = vunpack.c.l.s8.bf16 %v550_v4  ;;  %v622_v14 = vunpack.c.h.s8.bf16 %v550_v4 }
 0x101   : > { %v668_v9 = vunpack.c.l.s8.bf16 %v574_v5  ;;  %v670_v15 = vunpack.c.h.s8.bf16 %v574_v5 }
 0x107   : > { %1016 = vmatmul.mubr.bf16.gmra.mrb[44].mxu0 %v597_v10  ;;  %1208 = vmatmul.mubr.bf16.gmra.mrb[44].mxu1 %v645_v11  ;;  %v549_v10 = vld [vmem:[%s4517_s27 + $0xb0] sm:$0xff] }
 0x108   : > { %1023 = vmatprep.mubr.bf16.mxu0 %v600_v12  ;;  %1215 = vmatprep.mubr.bf16.mxu1 %v648_v13  ;;  %v573_v11 = vld [vmem:[%s4517_s27 + $0x170] sm:$0xff]  ;;  %v619_v12 = vunpack.c.l.s8.bf16 %v549_v10 }
 0x109   : > { %v667_v13 = vunpack.c.l.s8.bf16 %v573_v11 }
 0x10f   : > { %1024 = vmatmul.mubr.bf16.gmra.mrb[48].mxu0 %v599_v16  ;;  %1216 = vmatmul.mubr.bf16.gmra.mrb[48].mxu1 %v647_v17  ;;  %v621_v16 = vunpack.c.h.s8.bf16 %v549_v10  ;;  %v669_v17 = vunpack.c.h.s8.bf16 %v573_v11 }
 0x110   : > { %1031 = vmatprep.mubr.bf16.mxu0 %v602_v18  ;;  %1223 = vmatprep.mubr.bf16.mxu1 %v650_v19  ;;  %v671_v18 = vld [vmem:[#allocation2] sm:$0xff] }
 0x111   : > { %v719_v19 = vld [vmem:[#allocation2 + $0x180] sm:$0xff] }
 0x117   : > { %1032 = vmatmul.mubr.bf16.gmra.mrb[52].mxu0 %v601_v22  ;;  %1224 = vmatmul.mubr.bf16.gmra.mrb[52].mxu1 %v649_v23  ;;  %v672_v22 = vld [vmem:[#allocation2 + $0x8] sm:$0xff] }
 0x118   : > { %1039 = vmatprep.mubr.bf16.mxu0 %v604_v24  ;;  %1231 = vmatprep.mubr.bf16.mxu1 %v652_v25  ;;  %v720_v23 = vld [vmem:[#allocation2 + $0x188] sm:$0xff] }
 0x11f   : > { %1040 = vmatmul.mubr.bf16.gmra.mrb[56].mxu0 %v603_v28  ;;  %1232 = vmatmul.mubr.bf16.gmra.mrb[56].mxu1 %v651_v29 }
 0x120   : > { %1047 = vmatprep.mubr.bf16.mxu0 %v606_v30  ;;  %1239 = vmatprep.mubr.bf16.mxu1 %v654_v31 }
 0x127   : > { %1048 = vmatmul.mubr.bf16.gmra.mrb[60].mxu0 %v605_v34  ;;  %1240 = vmatmul.mubr.bf16.gmra.mrb[60].mxu1 %v653_v35  ;;  %v673_v34 = vld [vmem:[#allocation2 + $0x10] sm:$0xff] }
 0x128   : > { %1055 = vmatprep.mubr.bf16.mxu0 %v608_v36  ;;  %1247 = vmatprep.mubr.bf16.mxu1 %v656_v37  ;;  %v721_v35 = vld [vmem:[#allocation2 + $0x190] sm:$0xff] }
 0x12f   : > { %1056 = vmatmul.mubr.bf16.gmra.mrb[64].mxu0 %v607_v40  ;;  %1248 = vmatmul.mubr.bf16.gmra.mrb[64].mxu1 %v655_v41 }
 0x130   : > { %1063 = vmatprep.mubr.bf16.mxu0 %v610_v42  ;;  %1255 = vmatprep.mubr.bf16.mxu1 %v658_v43 }
 0x137   : > { %1064 = vmatmul.mubr.bf16.gmra.mrb[68].mxu0 %v609_v46  ;;  %1256 = vmatmul.mubr.bf16.gmra.mrb[68].mxu1 %v657_v47 }
 0x138   : > { %1071 = vmatprep.mubr.bf16.mxu0 %v612_v48  ;;  %1263 = vmatprep.mubr.bf16.mxu1 %v660_v49 }
 0x13f   : > { %1072 = vmatmul.mubr.bf16.gmra.mrb[72].mxu0 %v611_v52  ;;  %1264 = vmatmul.mubr.bf16.gmra.mrb[72].mxu1 %v659_v53 }
 0x140   : > { %1079 = vmatprep.mubr.bf16.mxu0 %v614_v54  ;;  %1271 = vmatprep.mubr.bf16.mxu1 %v662_v55  ;;  %v676_v54 = vld [vmem:[#allocation2 + $0x28] sm:$0xff] }
 0x141   : > { %v724_v55 = vld [vmem:[#allocation2 + $0x1a8] sm:$0xff] }
 0x147   : > { %1080 = vmatmul.mubr.bf16.gmra.mrb[76].mxu0 %v613_v58  ;;  %1272 = vmatmul.mubr.bf16.gmra.mrb[76].mxu1 %v661_v59 }
 0x148   : > { %1087 = vmatprep.mubr.bf16.mxu0 %v616_v60  ;;  %1279 = vmatprep.mubr.bf16.mxu1 %v664_v61 }
 0x14f   : > { %1088 = vmatmul.mubr.bf16.gmra.mrb[80].mxu0 %v615_v0  ;;  %1280 = vmatmul.mubr.bf16.gmra.mrb[80].mxu1 %v663_v1 }
 0x150   : > { %1095 = vmatprep.mubr.bf16.mxu0 %v618_v2  ;;  %1287 = vmatprep.mubr.bf16.mxu1 %v666_v3  ;;  %v677_v2 = vld [vmem:[#allocation2 + $0x30] sm:$0xff] }
 0x151   : > { %v725_v3 = vld [vmem:[#allocation2 + $0x1b0] sm:$0xff] }
 0x157   : > { %1096 = vmatmul.mubr.bf16.gmra.mrb[84].mxu0 %v617_v6  ;;  %1288 = vmatmul.mubr.bf16.gmra.mrb[84].mxu1 %v665_v7  ;;  %v678_v6 = vld [vmem:[#allocation2 + $0x38] sm:$0xff] }
 0x158   : > { %1103 = vmatprep.mubr.bf16.mxu0 %v620_v8  ;;  %1295 = vmatprep.mubr.bf16.mxu1 %v668_v9  ;;  %v726_v7 = vld [vmem:[#allocation2 + $0x1b8] sm:$0xff] }
 0x15f   : > { %1104 = vmatmul.mubr.bf16.gmra.mrb[88].mxu0 %v619_v12  ;;  %1296 = vmatmul.mubr.bf16.gmra.mrb[88].mxu1 %v667_v13 }
 0x160   : > { %1111 = vmatprep.mubr.bf16.mxu0 %v622_v14  ;;  %1303 = vmatprep.mubr.bf16.mxu1 %v670_v15 }
 0x167   : > { %1112 = vmatmul.mubr.bf16.gmra.mrb[92].mxu0 %v621_v16  ;;  %1304 = vmatmul.mubr.bf16.gmra.mrb[92].mxu1 %v669_v17 }
 0x182   : > { %v929_v20 = vpop.f32.mrb[0].mxu0  ;;  %v1121_v21 = vpop.f32.mrb[0].mxu1 }
 0x183   : > { %v1312_v24 = vadd.f32 %v929_v20, %v671_v18  ;;  %v1360_v25 = vadd.f32 %v1121_v21, %v719_v19  ;;  %v931_v26 = vpop.f32.mrb[1].mxu0  ;;  %v1123_v27 = vpop.f32.mrb[1].mxu1  ;;  %v679_v18 = vld [vmem:[#allocation2 + $0x40] sm:$0xff] }
 0x184   : > { %v932_v28 = vpop.f32.mrb[2].mxu0  ;;  %v1124_v29 = vpop.f32.mrb[2].mxu1  ;;  %v727_v19 = vld [vmem:[#allocation2 + $0x1c0] sm:$0xff] }
 0x185   : > { %1409 = vst.msk [vmem:[#allocation2] sm:$0xff] %vm1408_vm1, %v1312_v24  ;;  %1457 = vst.msk [vmem:[#allocation2 + $0x180] sm:$0xff] %vm1408_vm1, %v1360_v25  ;;  %v1313_v30 = vadd.f32 %v932_v28, %v672_v22  ;;  %v1361_v31 = vadd.f32 %v1124_v29, %v720_v23  ;;  %v934_v32 = vpop.f32.mrb[3].mxu0  ;;  %v1126_v33 = vpop.f32.mrb[3].mxu1  ;;  %v680_v22 = vld [vmem:[#allocation2 + $0x48] sm:$0xff] }
 0x186   : > { %v728_v23 = vld [vmem:[#allocation2 + $0x1c8] sm:$0xff] }
 0x187   : > { %1410 = vst.msk [vmem:[#allocation2 + $0x8] sm:$0xff] %vm1408_vm1, %v1313_v30  ;;  %1458 = vst.msk [vmem:[#allocation2 + $0x188] sm:$0xff] %vm1408_vm1, %v1361_v31 }
 0x18a   : > { %v937_v36 = vpop.f32.mrb[4].mxu0  ;;  %v1129_v37 = vpop.f32.mrb[4].mxu1 }
 0x18b   : > { %v1314_v40 = vadd.f32 %v937_v36, %v673_v34  ;;  %v1362_v41 = vadd.f32 %v1129_v37, %v721_v35  ;;  %v939_v42 = vpop.f32.mrb[5].mxu0  ;;  %v1131_v43 = vpop.f32.mrb[5].mxu1  ;;  %v681_v34 = vld [vmem:[#allocation2 + $0x50] sm:$0xff] }
 0x18c   : > { %v940_v44 = vpop.f32.mrb[6].mxu0  ;;  %v1132_v45 = vpop.f32.mrb[6].mxu1  ;;  %v729_v35 = vld [vmem:[#allocation2 + $0x1d0] sm:$0xff] }
 0x18d   : > { %1411 = vst.msk [vmem:[#allocation2 + $0x10] sm:$0xff] %vm1408_vm1, %v1314_v40  ;;  %1459 = vst.msk [vmem:[#allocation2 + $0x190] sm:$0xff] %vm1408_vm1, %v1362_v41  ;;  %v1315_v46 = vadd.f32 %v940_v44, %v674_v38  ;;  %v1363_v47 = vadd.f32 %v1132_v45, %v722_v39  ;;  %v942_v48 = vpop.f32.mrb[7].mxu0  ;;  %v1134_v49 = vpop.f32.mrb[7].mxu1  ;;  %v682_v38 = vld [vmem:[#allocation2 + $0x58] sm:$0xff] }
 0x18e   : > { %v730_v39 = vld [vmem:[#allocation2 + $0x1d8] sm:$0xff] }
 0x18f   : > { %1412 = vst.msk [vmem:[#allocation2 + $0x18] sm:$0xff] %vm1408_vm1, %v1315_v46  ;;  %1460 = vst.msk [vmem:[#allocation2 + $0x198] sm:$0xff] %vm1408_vm1, %v1363_v47 }
 0x192   : > { %v945_v52 = vpop.f32.mrb[8].mxu0  ;;  %v1137_v53 = vpop.f32.mrb[8].mxu1 }
 0x193   : > { %v1316_v56 = vadd.f32 %v945_v52, %v675_v50  ;;  %v1364_v57 = vadd.f32 %v1137_v53, %v723_v51  ;;  %v947_v58 = vpop.f32.mrb[9].mxu0  ;;  %v1139_v59 = vpop.f32.mrb[9].mxu1  ;;  %v683_v50 = vld [vmem:[#allocation2 + $0x60] sm:$0xff] }
 0x194   : > { %v948_v60 = vpop.f32.mrb[10].mxu0  ;;  %v1140_v61 = vpop.f32.mrb[10].mxu1  ;;  %v731_v51 = vld [vmem:[#allocation2 + $0x1e0] sm:$0xff] }
 0x195   : > { %1413 = vst.msk [vmem:[#allocation2 + $0x20] sm:$0xff] %vm1408_vm1, %v1316_v56  ;;  %1461 = vst.msk [vmem:[#allocation2 + $0x1a0] sm:$0xff] %vm1408_vm1, %v1364_v57  ;;  %v1317_v62 = vadd.f32 %v948_v60, %v676_v54  ;;  %v1365_v63 = vadd.f32 %v1140_v61, %v724_v55  ;;  %v950_v0 = vpop.f32.mrb[11].mxu0  ;;  %v1142_v1 = vpop.f32.mrb[11].mxu1  ;;  %v684_v54 = vld [vmem:[#allocation2 + $0x68] sm:$0xff] }
 0x196   : > { %v732_v55 = vld [vmem:[#allocation2 + $0x1e8] sm:$0xff] }
 0x197   : > { %1414 = vst.msk [vmem:[#allocation2 + $0x28] sm:$0xff] %vm1408_vm1, %v1317_v62  ;;  %1462 = vst.msk [vmem:[#allocation2 + $0x1a8] sm:$0xff] %vm1408_vm1, %v1365_v63 }
 0x19a   : > { %v953_v4 = vpop.f32.mrb[12].mxu0  ;;  %v1145_v5 = vpop.f32.mrb[12].mxu1 }
 0x19b   : > { %v1318_v8 = vadd.f32 %v953_v4, %v677_v2  ;;  %v1366_v9 = vadd.f32 %v1145_v5, %v725_v3  ;;  %v955_v10 = vpop.f32.mrb[13].mxu0  ;;  %v1147_v11 = vpop.f32.mrb[13].mxu1  ;;  %v685_v2 = vld [vmem:[#allocation2 + $0x70] sm:$0xff] }
 0x19c   : > { %v956_v12 = vpop.f32.mrb[14].mxu0  ;;  %v1148_v13 = vpop.f32.mrb[14].mxu1  ;;  %v733_v3 = vld [vmem:[#allocation2 + $0x1f0] sm:$0xff] }
 0x19d   : > { %1415 = vst.msk [vmem:[#allocation2 + $0x30] sm:$0xff] %vm1408_vm1, %v1318_v8  ;;  %1463 = vst.msk [vmem:[#allocation2 + $0x1b0] sm:$0xff] %vm1408_vm1, %v1366_v9  ;;  %v1319_v14 = vadd.f32 %v956_v12, %v678_v6  ;;  %v1367_v15 = vadd.f32 %v1148_v13, %v726_v7  ;;  %v958_v16 = vpop.f32.mrb[15].mxu0  ;;  %v1150_v17 = vpop.f32.mrb[15].mxu1  ;;  %v686_v6 = vld [vmem:[#allocation2 + $0x78] sm:$0xff] }
 0x19e   : > { %v734_v7 = vld [vmem:[#allocation2 + $0x1f8] sm:$0xff] }
 0x19f   : > { %1416 = vst.msk [vmem:[#allocation2 + $0x38] sm:$0xff] %vm1408_vm1, %v1319_v14  ;;  %1464 = vst.msk [vmem:[#allocation2 + $0x1b8] sm:$0xff] %vm1408_vm1, %v1367_v15 }
 0x1a2   : > { %v961_v20 = vpop.f32.mrb[16].mxu0  ;;  %v1153_v21 = vpop.f32.mrb[16].mxu1 }
 0x1a3   : > { %v1320_v24 = vadd.f32 %v961_v20, %v679_v18  ;;  %v1368_v25 = vadd.f32 %v1153_v21, %v727_v19  ;;  %v963_v26 = vpop.f32.mrb[17].mxu0  ;;  %v1155_v27 = vpop.f32.mrb[17].mxu1  ;;  %v687_v18 = vld [vmem:[#allocation2 + $0x80] sm:$0xff] }
 0x1a4   : > { %v964_v28 = vpop.f32.mrb[18].mxu0  ;;  %v1156_v29 = vpop.f32.mrb[18].mxu1  ;;  %v735_v19 = vld [vmem:[#allocation2 + $0x200] sm:$0xff] }
 0x1a5   : > { %1417 = vst.msk [vmem:[#allocation2 + $0x40] sm:$0xff] %vm1408_vm1, %v1320_v24  ;;  %1465 = vst.msk [vmem:[#allocation2 + $0x1c0] sm:$0xff] %vm1408_vm1, %v1368_v25  ;;  %v1321_v30 = vadd.f32 %v964_v28, %v680_v22  ;;  %v1369_v31 = vadd.f32 %v1156_v29, %v728_v23  ;;  %v966_v32 = vpop.f32.mrb[19].mxu0  ;;  %v1158_v33 = vpop.f32.mrb[19].mxu1  ;;  %v688_v22 = vld [vmem:[#allocation2 + $0x88] sm:$0xff] }
 0x1a6   : > { %v736_v23 = vld [vmem:[#allocation2 + $0x208] sm:$0xff] }
 0x1a7   : > { %1418 = vst.msk [vmem:[#allocation2 + $0x48] sm:$0xff] %vm1408_vm1, %v1321_v30  ;;  %1466 = vst.msk [vmem:[#allocation2 + $0x1c8] sm:$0xff] %vm1408_vm1, %v1369_v31 }
 0x1aa   : > { %v969_v36 = vpop.f32.mrb[20].mxu0  ;;  %v1161_v37 = vpop.f32.mrb[20].mxu1 }
 0x1ab   : > { %v1322_v40 = vadd.f32 %v969_v36, %v681_v34  ;;  %v1370_v41 = vadd.f32 %v1161_v37, %v729_v35  ;;  %v971_v42 = vpop.f32.mrb[21].mxu0  ;;  %v1163_v43 = vpop.f32.mrb[21].mxu1  ;;  %v689_v34 = vld [vmem:[#allocation2 + $0x90] sm:$0xff] }
 0x1ac   : > { %v972_v44 = vpop.f32.mrb[22].mxu0  ;;  %v1164_v45 = vpop.f32.mrb[22].mxu1  ;;  %v737_v35 = vld [vmem:[#allocation2 + $0x210] sm:$0xff] }
 0x1ad   : > { %1419 = vst.msk [vmem:[#allocation2 + $0x50] sm:$0xff] %vm1408_vm1, %v1322_v40  ;;  %1467 = vst.msk [vmem:[#allocation2 + $0x1d0] sm:$0xff] %vm1408_vm1, %v1370_v41  ;;  %v1323_v46 = vadd.f32 %v972_v44, %v682_v38  ;;  %v1371_v47 = vadd.f32 %v1164_v45, %v730_v39  ;;  %v974_v48 = vpop.f32.mrb[23].mxu0  ;;  %v1166_v49 = vpop.f32.mrb[23].mxu1  ;;  %v690_v38 = vld [vmem:[#allocation2 + $0x98] sm:$0xff] }
 0x1ae   : > { %v738_v39 = vld [vmem:[#allocation2 + $0x218] sm:$0xff] }
 0x1af   : > { %1420 = vst.msk [vmem:[#allocation2 + $0x58] sm:$0xff] %vm1408_vm1, %v1323_v46  ;;  %1468 = vst.msk [vmem:[#allocation2 + $0x1d8] sm:$0xff] %vm1408_vm1, %v1371_v47 }
 0x1b2   : > { %v977_v52 = vpop.f32.mrb[24].mxu0  ;;  %v1169_v53 = vpop.f32.mrb[24].mxu1 }
 0x1b3   : > { %v1324_v56 = vadd.f32 %v977_v52, %v683_v50  ;;  %v1372_v57 = vadd.f32 %v1169_v53, %v731_v51  ;;  %v979_v58 = vpop.f32.mrb[25].mxu0  ;;  %v1171_v59 = vpop.f32.mrb[25].mxu1  ;;  %v691_v50 = vld [vmem:[#allocation2 + $0xa0] sm:$0xff] }
 0x1b4   : > { %v980_v60 = vpop.f32.mrb[26].mxu0  ;;  %v1172_v61 = vpop.f32.mrb[26].mxu1  ;;  %v739_v51 = vld [vmem:[#allocation2 + $0x220] sm:$0xff] }
 0x1b5   : > { %1421 = vst.msk [vmem:[#allocation2 + $0x60] sm:$0xff] %vm1408_vm1, %v1324_v56  ;;  %1469 = vst.msk [vmem:[#allocation2 + $0x1e0] sm:$0xff] %vm1408_vm1, %v1372_v57  ;;  %v1325_v62 = vadd.f32 %v980_v60, %v684_v54  ;;  %v1373_v63 = vadd.f32 %v1172_v61, %v732_v55  ;;  %v982_v0 = vpop.f32.mrb[27].mxu0  ;;  %v1174_v1 = vpop.f32.mrb[27].mxu1  ;;  %v692_v54 = vld [vmem:[#allocation2 + $0xa8] sm:$0xff] }
 0x1b6   : > { %v740_v55 = vld [vmem:[#allocation2 + $0x228] sm:$0xff] }
 0x1b7   : > { %1422 = vst.msk [vmem:[#allocation2 + $0x68] sm:$0xff] %vm1408_vm1, %v1325_v62  ;;  %1470 = vst.msk [vmem:[#allocation2 + $0x1e8] sm:$0xff] %vm1408_vm1, %v1373_v63 }
 0x1ba   : > { %v985_v4 = vpop.f32.mrb[28].mxu0  ;;  %v1177_v5 = vpop.f32.mrb[28].mxu1 }
 0x1bb   : > { %v1326_v8 = vadd.f32 %v985_v4, %v685_v2  ;;  %v1374_v9 = vadd.f32 %v1177_v5, %v733_v3  ;;  %v987_v10 = vpop.f32.mrb[29].mxu0  ;;  %v1179_v11 = vpop.f32.mrb[29].mxu1  ;;  %v693_v2 = vld [vmem:[#allocation2 + $0xb0] sm:$0xff] }
 0x1bc   : > { %v988_v12 = vpop.f32.mrb[30].mxu0  ;;  %v1180_v13 = vpop.f32.mrb[30].mxu1  ;;  %v741_v3 = vld [vmem:[#allocation2 + $0x230] sm:$0xff] }
 0x1bd   : > { %1423 = vst.msk [vmem:[#allocation2 + $0x70] sm:$0xff] %vm1408_vm1, %v1326_v8  ;;  %1471 = vst.msk [vmem:[#allocation2 + $0x1f0] sm:$0xff] %vm1408_vm1, %v1374_v9  ;;  %v1327_v14 = vadd.f32 %v988_v12, %v686_v6  ;;  %v1375_v15 = vadd.f32 %v1180_v13, %v734_v7  ;;  %v990_v16 = vpop.f32.mrb[31].mxu0  ;;  %v1182_v17 = vpop.f32.mrb[31].mxu1  ;;  %v694_v6 = vld [vmem:[#allocation2 + $0xb8] sm:$0xff] }
 0x1be   : > { %v742_v7 = vld [vmem:[#allocation2 + $0x238] sm:$0xff] }
 0x1bf   : > { %1424 = vst.msk [vmem:[#allocation2 + $0x78] sm:$0xff] %vm1408_vm1, %v1327_v14  ;;  %1472 = vst.msk [vmem:[#allocation2 + $0x1f8] sm:$0xff] %vm1408_vm1, %v1375_v15 }
 0x1c2   : > { %v993_v20 = vpop.f32.mrb[32].mxu0  ;;  %v1185_v21 = vpop.f32.mrb[32].mxu1 }
 0x1c3   : > { %v1328_v24 = vadd.f32 %v993_v20, %v687_v18  ;;  %v1376_v25 = vadd.f32 %v1185_v21, %v735_v19  ;;  %v995_v26 = vpop.f32.mrb[33].mxu0  ;;  %v1187_v27 = vpop.f32.mrb[33].mxu1  ;;  %v695_v18 = vld [vmem:[#allocation2 + $0xc0] sm:$0xff] }
 0x1c4   : > { %v996_v28 = vpop.f32.mrb[34].mxu0  ;;  %v1188_v29 = vpop.f32.mrb[34].mxu1  ;;  %v743_v19 = vld [vmem:[#allocation2 + $0x240] sm:$0xff] }
 0x1c5   : > { %1425 = vst.msk [vmem:[#allocation2 + $0x80] sm:$0xff] %vm1408_vm1, %v1328_v24  ;;  %1473 = vst.msk [vmem:[#allocation2 + $0x200] sm:$0xff] %vm1408_vm1, %v1376_v25  ;;  %v1329_v30 = vadd.f32 %v996_v28, %v688_v22  ;;  %v1377_v31 = vadd.f32 %v1188_v29, %v736_v23  ;;  %v998_v32 = vpop.f32.mrb[35].mxu0  ;;  %v1190_v33 = vpop.f32.mrb[35].mxu1  ;;  %v696_v22 = vld [vmem:[#allocation2 + $0xc8] sm:$0xff] }
 0x1c6   : > { %v744_v23 = vld [vmem:[#allocation2 + $0x248] sm:$0xff] }
 0x1c7   : > { %1426 = vst.msk [vmem:[#allocation2 + $0x88] sm:$0xff] %vm1408_vm1, %v1329_v30  ;;  %1474 = vst.msk [vmem:[#allocation2 + $0x208] sm:$0xff] %vm1408_vm1, %v1377_v31 }
 0x1ca   : > { %v1001_v36 = vpop.f32.mrb[36].mxu0  ;;  %v1193_v37 = vpop.f32.mrb[36].mxu1 }
 0x1cb   : > { %v1330_v40 = vadd.f32 %v1001_v36, %v689_v34  ;;  %v1378_v41 = vadd.f32 %v1193_v37, %v737_v35  ;;  %v1003_v42 = vpop.f32.mrb[37].mxu0  ;;  %v1195_v43 = vpop.f32.mrb[37].mxu1  ;;  %v697_v34 = vld [vmem:[#allocation2 + $0xd0] sm:$0xff] }
 0x1cc   : > { %v1004_v44 = vpop.f32.mrb[38].mxu0  ;;  %v1196_v45 = vpop.f32.mrb[38].mxu1  ;;  %v745_v35 = vld [vmem:[#allocation2 + $0x250] sm:$0xff] }
 0x1cd   : > { %1427 = vst.msk [vmem:[#allocation2 + $0x90] sm:$0xff] %vm1408_vm1, %v1330_v40  ;;  %1475 = vst.msk [vmem:[#allocation2 + $0x210] sm:$0xff] %vm1408_vm1, %v1378_v41  ;;  %v1331_v46 = vadd.f32 %v1004_v44, %v690_v38  ;;  %v1379_v47 = vadd.f32 %v1196_v45, %v738_v39  ;;  %v1006_v48 = vpop.f32.mrb[39].mxu0  ;;  %v1198_v49 = vpop.f32.mrb[39].mxu1  ;;  %v698_v38 = vld [vmem:[#allocation2 + $0xd8] sm:$0xff] }
 0x1ce   : > { %v746_v39 = vld [vmem:[#allocation2 + $0x258] sm:$0xff] }
 0x1cf   : > { %1428 = vst.msk [vmem:[#allocation2 + $0x98] sm:$0xff] %vm1408_vm1, %v1331_v46  ;;  %1476 = vst.msk [vmem:[#allocation2 + $0x218] sm:$0xff] %vm1408_vm1, %v1379_v47 }
 0x1d2   : > { %v1009_v52 = vpop.f32.mrb[40].mxu0  ;;  %v1201_v53 = vpop.f32.mrb[40].mxu1 }
 0x1d3   : > { %v1332_v56 = vadd.f32 %v1009_v52, %v691_v50  ;;  %v1380_v57 = vadd.f32 %v1201_v53, %v739_v51  ;;  %v1011_v58 = vpop.f32.mrb[41].mxu0  ;;  %v1203_v59 = vpop.f32.mrb[41].mxu1  ;;  %v699_v50 = vld [vmem:[#allocation2 + $0xe0] sm:$0xff] }
 0x1d4   : > { %v1012_v60 = vpop.f32.mrb[42].mxu0  ;;  %v1204_v61 = vpop.f32.mrb[42].mxu1  ;;  %v747_v51 = vld [vmem:[#allocation2 + $0x260] sm:$0xff] }
 0x1d5   : > { %1429 = vst.msk [vmem:[#allocation2 + $0xa0] sm:$0xff] %vm1408_vm1, %v1332_v56  ;;  %1477 = vst.msk [vmem:[#allocation2 + $0x220] sm:$0xff] %vm1408_vm1, %v1380_v57  ;;  %v1333_v62 = vadd.f32 %v1012_v60, %v692_v54  ;;  %v1381_v63 = vadd.f32 %v1204_v61, %v740_v55  ;;  %v1014_v0 = vpop.f32.mrb[43].mxu0  ;;  %v1206_v1 = vpop.f32.mrb[43].mxu1  ;;  %v700_v54 = vld [vmem:[#allocation2 + $0xe8] sm:$0xff] }
 0x1d6   : > { %v748_v55 = vld [vmem:[#allocation2 + $0x268] sm:$0xff] }
 0x1d7   : > { %1430 = vst.msk [vmem:[#allocation2 + $0xa8] sm:$0xff] %vm1408_vm1, %v1333_v62  ;;  %1478 = vst.msk [vmem:[#allocation2 + $0x228] sm:$0xff] %vm1408_vm1, %v1381_v63 }
 0x1da   : > { %v1017_v4 = vpop.f32.mrb[44].mxu0  ;;  %v1209_v5 = vpop.f32.mrb[44].mxu1 }
 0x1db   : > { %v1334_v8 = vadd.f32 %v1017_v4, %v693_v2  ;;  %v1382_v9 = vadd.f32 %v1209_v5, %v741_v3  ;;  %v1019_v10 = vpop.f32.mrb[45].mxu0  ;;  %v1211_v11 = vpop.f32.mrb[45].mxu1  ;;  %v701_v2 = vld [vmem:[#allocation2 + $0xf0] sm:$0xff] }
 0x1dc   : > { %v1020_v12 = vpop.f32.mrb[46].mxu0  ;;  %v1212_v13 = vpop.f32.mrb[46].mxu1  ;;  %v749_v3 = vld [vmem:[#allocation2 + $0x270] sm:$0xff] }
 0x1dd   : > { %1431 = vst.msk [vmem:[#allocation2 + $0xb0] sm:$0xff] %vm1408_vm1, %v1334_v8  ;;  %1479 = vst.msk [vmem:[#allocation2 + $0x230] sm:$0xff] %vm1408_vm1, %v1382_v9  ;;  %v1335_v14 = vadd.f32 %v1020_v12, %v694_v6  ;;  %v1383_v15 = vadd.f32 %v1212_v13, %v742_v7  ;;  %v1022_v16 = vpop.f32.mrb[47].mxu0  ;;  %v1214_v17 = vpop.f32.mrb[47].mxu1  ;;  %v702_v6 = vld [vmem:[#allocation2 + $0xf8] sm:$0xff] }
 0x1de   : > { %v750_v7 = vld [vmem:[#allocation2 + $0x278] sm:$0xff] }
 0x1df   : > { %1432 = vst.msk [vmem:[#allocation2 + $0xb8] sm:$0xff] %vm1408_vm1, %v1335_v14  ;;  %1480 = vst.msk [vmem:[#allocation2 + $0x238] sm:$0xff] %vm1408_vm1, %v1383_v15 }
 0x1e2   : > { %v1025_v20 = vpop.f32.mrb[48].mxu0  ;;  %v1217_v21 = vpop.f32.mrb[48].mxu1 }
 0x1e3   : > { %v1336_v24 = vadd.f32 %v1025_v20, %v695_v18  ;;  %v1384_v25 = vadd.f32 %v1217_v21, %v743_v19  ;;  %v1027_v26 = vpop.f32.mrb[49].mxu0  ;;  %v1219_v27 = vpop.f32.mrb[49].mxu1  ;;  %v703_v18 = vld [vmem:[#allocation2 + $0x100] sm:$0xff] }
 0x1e4   : > { %v1028_v28 = vpop.f32.mrb[50].mxu0  ;;  %v1220_v29 = vpop.f32.mrb[50].mxu1  ;;  %v751_v19 = vld [vmem:[#allocation2 + $0x280] sm:$0xff] }
 0x1e5   : > { %1433 = vst.msk [vmem:[#allocation2 + $0xc0] sm:$0xff] %vm1408_vm1, %v1336_v24  ;;  %1481 = vst.msk [vmem:[#allocation2 + $0x240] sm:$0xff] %vm1408_vm1, %v1384_v25  ;;  %v1337_v30 = vadd.f32 %v1028_v28, %v696_v22  ;;  %v1385_v31 = vadd.f32 %v1220_v29, %v744_v23  ;;  %v1030_v32 = vpop.f32.mrb[51].mxu0  ;;  %v1222_v33 = vpop.f32.mrb[51].mxu1  ;;  %v704_v22 = vld [vmem:[#allocation2 + $0x108] sm:$0xff] }
 0x1e6   : > { %v752_v23 = vld [vmem:[#allocation2 + $0x288] sm:$0xff] }
 0x1e7   : > { %1434 = vst.msk [vmem:[#allocation2 + $0xc8] sm:$0xff] %vm1408_vm1, %v1337_v30  ;;  %1482 = vst.msk [vmem:[#allocation2 + $0x248] sm:$0xff] %vm1408_vm1, %v1385_v31 }
 0x1ea   : > { %v1033_v36 = vpop.f32.mrb[52].mxu0  ;;  %v1225_v37 = vpop.f32.mrb[52].mxu1 }
 0x1eb   : > { %v1338_v40 = vadd.f32 %v1033_v36, %v697_v34  ;;  %v1386_v41 = vadd.f32 %v1225_v37, %v745_v35  ;;  %v1035_v42 = vpop.f32.mrb[53].mxu0  ;;  %v1227_v43 = vpop.f32.mrb[53].mxu1  ;;  %v705_v34 = vld [vmem:[#allocation2 + $0x110] sm:$0xff] }
 0x1ec   : > { %v1036_v44 = vpop.f32.mrb[54].mxu0  ;;  %v1228_v45 = vpop.f32.mrb[54].mxu1  ;;  %v753_v35 = vld [vmem:[#allocation2 + $0x290] sm:$0xff] }
 0x1ed   : > { %1435 = vst.msk [vmem:[#allocation2 + $0xd0] sm:$0xff] %vm1408_vm1, %v1338_v40  ;;  %1483 = vst.msk [vmem:[#allocation2 + $0x250] sm:$0xff] %vm1408_vm1, %v1386_v41  ;;  %v1339_v46 = vadd.f32 %v1036_v44, %v698_v38  ;;  %v1387_v47 = vadd.f32 %v1228_v45, %v746_v39  ;;  %v1038_v48 = vpop.f32.mrb[55].mxu0  ;;  %v1230_v49 = vpop.f32.mrb[55].mxu1  ;;  %v706_v38 = vld [vmem:[#allocation2 + $0x118] sm:$0xff] }
 0x1ee   : > { %v754_v39 = vld [vmem:[#allocation2 + $0x298] sm:$0xff] }
 0x1ef   : > { %1436 = vst.msk [vmem:[#allocation2 + $0xd8] sm:$0xff] %vm1408_vm1, %v1339_v46  ;;  %1484 = vst.msk [vmem:[#allocation2 + $0x258] sm:$0xff] %vm1408_vm1, %v1387_v47 }
 0x1f2   : > { %v1041_v52 = vpop.f32.mrb[56].mxu0  ;;  %v1233_v53 = vpop.f32.mrb[56].mxu1 }
 0x1f3   : > { %v1340_v56 = vadd.f32 %v1041_v52, %v699_v50  ;;  %v1388_v57 = vadd.f32 %v1233_v53, %v747_v51  ;;  %v1043_v58 = vpop.f32.mrb[57].mxu0  ;;  %v1235_v59 = vpop.f32.mrb[57].mxu1  ;;  %v707_v50 = vld [vmem:[#allocation2 + $0x120] sm:$0xff] }
 0x1f4   : > { %v1044_v60 = vpop.f32.mrb[58].mxu0  ;;  %v1236_v61 = vpop.f32.mrb[58].mxu1  ;;  %v755_v51 = vld [vmem:[#allocation2 + $0x2a0] sm:$0xff] }
 0x1f5   : > { %1437 = vst.msk [vmem:[#allocation2 + $0xe0] sm:$0xff] %vm1408_vm1, %v1340_v56  ;;  %1485 = vst.msk [vmem:[#allocation2 + $0x260] sm:$0xff] %vm1408_vm1, %v1388_v57  ;;  %v1341_v62 = vadd.f32 %v1044_v60, %v700_v54  ;;  %v1389_v63 = vadd.f32 %v1236_v61, %v748_v55  ;;  %v1046_v0 = vpop.f32.mrb[59].mxu0  ;;  %v1238_v1 = vpop.f32.mrb[59].mxu1  ;;  %v708_v54 = vld [vmem:[#allocation2 + $0x128] sm:$0xff] }
 0x1f6   : > { %v756_v55 = vld [vmem:[#allocation2 + $0x2a8] sm:$0xff] }
 0x1f7   : > { %1438 = vst.msk [vmem:[#allocation2 + $0xe8] sm:$0xff] %vm1408_vm1, %v1341_v62  ;;  %1486 = vst.msk [vmem:[#allocation2 + $0x268] sm:$0xff] %vm1408_vm1, %v1389_v63 }
 0x1fa   : > { %v1049_v4 = vpop.f32.mrb[60].mxu0  ;;  %v1241_v5 = vpop.f32.mrb[60].mxu1 }
 0x1fb   : > { %v1342_v8 = vadd.f32 %v1049_v4, %v701_v2  ;;  %v1390_v9 = vadd.f32 %v1241_v5, %v749_v3  ;;  %v1051_v10 = vpop.f32.mrb[61].mxu0  ;;  %v1243_v11 = vpop.f32.mrb[61].mxu1  ;;  %v709_v2 = vld [vmem:[#allocation2 + $0x130] sm:$0xff] }
 0x1fc   : > { %v1052_v12 = vpop.f32.mrb[62].mxu0  ;;  %v1244_v13 = vpop.f32.mrb[62].mxu1  ;;  %v757_v3 = vld [vmem:[#allocation2 + $0x2b0] sm:$0xff] }
 0x1fd   : > { %1439 = vst.msk [vmem:[#allocation2 + $0xf0] sm:$0xff] %vm1408_vm1, %v1342_v8  ;;  %1487 = vst.msk [vmem:[#allocation2 + $0x270] sm:$0xff] %vm1408_vm1, %v1390_v9  ;;  %v1343_v14 = vadd.f32 %v1052_v12, %v702_v6  ;;  %v1391_v15 = vadd.f32 %v1244_v13, %v750_v7  ;;  %v1054_v16 = vpop.f32.mrb[63].mxu0  ;;  %v1246_v17 = vpop.f32.mrb[63].mxu1  ;;  %v710_v6 = vld [vmem:[#allocation2 + $0x138] sm:$0xff] }
 0x1fe   : > { %v758_v7 = vld [vmem:[#allocation2 + $0x2b8] sm:$0xff] }
 0x1ff   : > { %1440 = vst.msk [vmem:[#allocation2 + $0xf8] sm:$0xff] %vm1408_vm1, %v1343_v14  ;;  %1488 = vst.msk [vmem:[#allocation2 + $0x278] sm:$0xff] %vm1408_vm1, %v1391_v15 }
 0x202   : > { %v1057_v20 = vpop.f32.mrb[64].mxu0  ;;  %v1249_v21 = vpop.f32.mrb[64].mxu1 }
 0x203   : > { %v1344_v24 = vadd.f32 %v1057_v20, %v703_v18  ;;  %v1392_v25 = vadd.f32 %v1249_v21, %v751_v19  ;;  %v1059_v26 = vpop.f32.mrb[65].mxu0  ;;  %v1251_v27 = vpop.f32.mrb[65].mxu1  ;;  %v711_v18 = vld [vmem:[#allocation2 + $0x140] sm:$0xff] }
 0x204   : > { %v1060_v28 = vpop.f32.mrb[66].mxu0  ;;  %v1252_v29 = vpop.f32.mrb[66].mxu1  ;;  %v759_v19 = vld [vmem:[#allocation2 + $0x2c0] sm:$0xff] }
 0x205   : > { %1441 = vst.msk [vmem:[#allocation2 + $0x100] sm:$0xff] %vm1408_vm1, %v1344_v24  ;;  %1489 = vst.msk [vmem:[#allocation2 + $0x280] sm:$0xff] %vm1408_vm1, %v1392_v25  ;;  %v1345_v30 = vadd.f32 %v1060_v28, %v704_v22  ;;  %v1393_v31 = vadd.f32 %v1252_v29, %v752_v23  ;;  %v1062_v32 = vpop.f32.mrb[67].mxu0  ;;  %v1254_v33 = vpop.f32.mrb[67].mxu1  ;;  %v712_v22 = vld [vmem:[#allocation2 + $0x148] sm:$0xff] }
 0x206   : > { %v760_v23 = vld [vmem:[#allocation2 + $0x2c8] sm:$0xff] }
 0x207   : > { %1442 = vst.msk [vmem:[#allocation2 + $0x108] sm:$0xff] %vm1408_vm1, %v1345_v30  ;;  %1490 = vst.msk [vmem:[#allocation2 + $0x288] sm:$0xff] %vm1408_vm1, %v1393_v31 }
 0x20a   : > { %v1065_v36 = vpop.f32.mrb[68].mxu0  ;;  %v1257_v37 = vpop.f32.mrb[68].mxu1 }
 0x20b   : > { %v1346_v40 = vadd.f32 %v1065_v36, %v705_v34  ;;  %v1394_v41 = vadd.f32 %v1257_v37, %v753_v35  ;;  %v1067_v42 = vpop.f32.mrb[69].mxu0  ;;  %v1259_v43 = vpop.f32.mrb[69].mxu1  ;;  %v713_v34 = vld [vmem:[#allocation2 + $0x150] sm:$0xff] }
 0x20c   : > { %v1068_v44 = vpop.f32.mrb[70].mxu0  ;;  %v1260_v45 = vpop.f32.mrb[70].mxu1  ;;  %v761_v35 = vld [vmem:[#allocation2 + $0x2d0] sm:$0xff] }
 0x20d   : > { %1443 = vst.msk [vmem:[#allocation2 + $0x110] sm:$0xff] %vm1408_vm1, %v1346_v40  ;;  %1491 = vst.msk [vmem:[#allocation2 + $0x290] sm:$0xff] %vm1408_vm1, %v1394_v41  ;;  %v1347_v46 = vadd.f32 %v1068_v44, %v706_v38  ;;  %v1395_v47 = vadd.f32 %v1260_v45, %v754_v39  ;;  %v1070_v48 = vpop.f32.mrb[71].mxu0  ;;  %v1262_v49 = vpop.f32.mrb[71].mxu1  ;;  %v714_v38 = vld [vmem:[#allocation2 + $0x158] sm:$0xff] }
 0x20e   : > { %v762_v39 = vld [vmem:[#allocation2 + $0x2d8] sm:$0xff] }
 0x20f   : > { %1444 = vst.msk [vmem:[#allocation2 + $0x118] sm:$0xff] %vm1408_vm1, %v1347_v46  ;;  %1492 = vst.msk [vmem:[#allocation2 + $0x298] sm:$0xff] %vm1408_vm1, %v1395_v47 }
 0x212   : > { %v1073_v52 = vpop.f32.mrb[72].mxu0  ;;  %v1265_v53 = vpop.f32.mrb[72].mxu1 }
 0x213   : > { %v1348_v56 = vadd.f32 %v1073_v52, %v707_v50  ;;  %v1396_v57 = vadd.f32 %v1265_v53, %v755_v51  ;;  %v1075_v58 = vpop.f32.mrb[73].mxu0  ;;  %v1267_v59 = vpop.f32.mrb[73].mxu1  ;;  %v715_v50 = vld [vmem:[#allocation2 + $0x160] sm:$0xff] }
 0x214   : > { %v1076_v60 = vpop.f32.mrb[74].mxu0  ;;  %v1268_v61 = vpop.f32.mrb[74].mxu1  ;;  %v763_v51 = vld [vmem:[#allocation2 + $0x2e0] sm:$0xff] }
 0x215   : > { %1445 = vst.msk [vmem:[#allocation2 + $0x120] sm:$0xff] %vm1408_vm1, %v1348_v56  ;;  %1493 = vst.msk [vmem:[#allocation2 + $0x2a0] sm:$0xff] %vm1408_vm1, %v1396_v57  ;;  %v1349_v62 = vadd.f32 %v1076_v60, %v708_v54  ;;  %v1397_v63 = vadd.f32 %v1268_v61, %v756_v55  ;;  %v1078_v0 = vpop.f32.mrb[75].mxu0  ;;  %v1270_v1 = vpop.f32.mrb[75].mxu1  ;;  %v716_v54 = vld [vmem:[#allocation2 + $0x168] sm:$0xff] }
 0x216   : > { %v764_v55 = vld [vmem:[#allocation2 + $0x2e8] sm:$0xff] }
 0x217   : > { %1446 = vst.msk [vmem:[#allocation2 + $0x128] sm:$0xff] %vm1408_vm1, %v1349_v62  ;;  %1494 = vst.msk [vmem:[#allocation2 + $0x2a8] sm:$0xff] %vm1408_vm1, %v1397_v63 }
 0x21a   : > { %v1081_v4 = vpop.f32.mrb[76].mxu0  ;;  %v1273_v5 = vpop.f32.mrb[76].mxu1 }
 0x21b   : > { %v1350_v8 = vadd.f32 %v1081_v4, %v709_v2  ;;  %v1398_v9 = vadd.f32 %v1273_v5, %v757_v3  ;;  %v1083_v10 = vpop.f32.mrb[77].mxu0  ;;  %v1275_v11 = vpop.f32.mrb[77].mxu1  ;;  %v717_v2 = vld [vmem:[#allocation2 + $0x170] sm:$0xff] }
 0x21c   : > { %v1084_v12 = vpop.f32.mrb[78].mxu0  ;;  %v1276_v13 = vpop.f32.mrb[78].mxu1  ;;  %v765_v3 = vld [vmem:[#allocation2 + $0x2f0] sm:$0xff] }
 0x21d   : > { %1447 = vst.msk [vmem:[#allocation2 + $0x130] sm:$0xff] %vm1408_vm1, %v1350_v8  ;;  %1495 = vst.msk [vmem:[#allocation2 + $0x2b0] sm:$0xff] %vm1408_vm1, %v1398_v9  ;;  %v1351_v14 = vadd.f32 %v1084_v12, %v710_v6  ;;  %v1399_v15 = vadd.f32 %v1276_v13, %v758_v7  ;;  %v1086_v16 = vpop.f32.mrb[79].mxu0  ;;  %v1278_v17 = vpop.f32.mrb[79].mxu1  ;;  %v718_v6 = vld [vmem:[#allocation2 + $0x178] sm:$0xff] }
 0x21e   : > { %v766_v7 = vld [vmem:[#allocation2 + $0x2f8] sm:$0xff] }
 0x21f   : > { %1448 = vst.msk [vmem:[#allocation2 + $0x138] sm:$0xff] %vm1408_vm1, %v1351_v14  ;;  %1496 = vst.msk [vmem:[#allocation2 + $0x2b8] sm:$0xff] %vm1408_vm1, %v1399_v15 }
 0x222   : > { %v1089_v20 = vpop.f32.mrb[80].mxu0  ;;  %v1281_v21 = vpop.f32.mrb[80].mxu1 }
 0x223   : > { %v1352_v24 = vadd.f32 %v1089_v20, %v711_v18  ;;  %v1400_v25 = vadd.f32 %v1281_v21, %v759_v19  ;;  %v1091_v26 = vpop.f32.mrb[81].mxu0  ;;  %v1283_v27 = vpop.f32.mrb[81].mxu1 }
 0x224   : > { %v1092_v28 = vpop.f32.mrb[82].mxu0  ;;  %v1284_v29 = vpop.f32.mrb[82].mxu1 }
 0x225   : > { %1449 = vst.msk [vmem:[#allocation2 + $0x140] sm:$0xff] %vm1408_vm1, %v1352_v24  ;;  %1497 = vst.msk [vmem:[#allocation2 + $0x2c0] sm:$0xff] %vm1408_vm1, %v1400_v25  ;;  %v1353_v30 = vadd.f32 %v1092_v28, %v712_v22  ;;  %v1401_v31 = vadd.f32 %v1284_v29, %v760_v23  ;;  %v1094_v32 = vpop.f32.mrb[83].mxu0  ;;  %v1286_v33 = vpop.f32.mrb[83].mxu1 }
 0x227   : > { %1450 = vst.msk [vmem:[#allocation2 + $0x148] sm:$0xff] %vm1408_vm1, %v1353_v30  ;;  %1498 = vst.msk [vmem:[#allocation2 + $0x2c8] sm:$0xff] %vm1408_vm1, %v1401_v31 }
 0x22a   : > { %v1097_v36 = vpop.f32.mrb[84].mxu0  ;;  %v1289_v37 = vpop.f32.mrb[84].mxu1 }
 0x22b   : > { %v1354_v40 = vadd.f32 %v1097_v36, %v713_v34  ;;  %v1402_v41 = vadd.f32 %v1289_v37, %v761_v35  ;;  %v1099_v42 = vpop.f32.mrb[85].mxu0  ;;  %v1291_v43 = vpop.f32.mrb[85].mxu1 }
 0x22c   : > { %v1100_v44 = vpop.f32.mrb[86].mxu0  ;;  %v1292_v45 = vpop.f32.mrb[86].mxu1 }
 0x22d   : > { %1451 = vst.msk [vmem:[#allocation2 + $0x150] sm:$0xff] %vm1408_vm1, %v1354_v40  ;;  %1499 = vst.msk [vmem:[#allocation2 + $0x2d0] sm:$0xff] %vm1408_vm1, %v1402_v41  ;;  %v1355_v46 = vadd.f32 %v1100_v44, %v714_v38  ;;  %v1403_v47 = vadd.f32 %v1292_v45, %v762_v39  ;;  %v1102_v48 = vpop.f32.mrb[87].mxu0  ;;  %v1294_v49 = vpop.f32.mrb[87].mxu1 }
 0x22f   : > { %1452 = vst.msk [vmem:[#allocation2 + $0x158] sm:$0xff] %vm1408_vm1, %v1355_v46  ;;  %1500 = vst.msk [vmem:[#allocation2 + $0x2d8] sm:$0xff] %vm1408_vm1, %v1403_v47 }
 0x232   : > { %v1105_v52 = vpop.f32.mrb[88].mxu0  ;;  %v1297_v53 = vpop.f32.mrb[88].mxu1 }
 0x233   : > { %v1356_v56 = vadd.f32 %v1105_v52, %v715_v50  ;;  %v1404_v57 = vadd.f32 %v1297_v53, %v763_v51  ;;  %v1107_v58 = vpop.f32.mrb[89].mxu0  ;;  %v1299_v59 = vpop.f32.mrb[89].mxu1 }
 0x234   : > { %v1108_v60 = vpop.f32.mrb[90].mxu0  ;;  %v1300_v61 = vpop.f32.mrb[90].mxu1 }
 0x235   : > { %1453 = vst.msk [vmem:[#allocation2 + $0x160] sm:$0xff] %vm1408_vm1, %v1356_v56  ;;  %1501 = vst.msk [vmem:[#allocation2 + $0x2e0] sm:$0xff] %vm1408_vm1, %v1404_v57  ;;  %v1357_v62 = vadd.f32 %v1108_v60, %v716_v54  ;;  %v1405_v63 = vadd.f32 %v1300_v61, %v764_v55  ;;  %v1110_v0 = vpop.f32.mrb[91].mxu0  ;;  %v1302_v1 = vpop.f32.mrb[91].mxu1 }
 0x237   : > { %1454 = vst.msk [vmem:[#allocation2 + $0x168] sm:$0xff] %vm1408_vm1, %v1357_v62  ;;  %1502 = vst.msk [vmem:[#allocation2 + $0x2e8] sm:$0xff] %vm1408_vm1, %v1405_v63 }
 0x239   : > { %1508 = sbr.rel (%p3568_p13) target bundleno = 1244 (0x4dc), region = 71 }
 0x23a   : > { %v1113_v4 = vpop.f32.mrb[92].mxu0  ;;  %v1305_v5 = vpop.f32.mrb[92].mxu1 }
 0x23b   : > { %v1358_v8 = vadd.f32 %v1113_v4, %v717_v2  ;;  %v1406_v9 = vadd.f32 %v1305_v5, %v765_v3  ;;  %v1115_v10 = vpop.f32.mrb[93].mxu0  ;;  %v1307_v11 = vpop.f32.mrb[93].mxu1 }
 0x23c   : > { %v1116_v12 = vpop.f32.mrb[94].mxu0  ;;  %v1308_v13 = vpop.f32.mrb[94].mxu1 }
 0x23d   : > { %1455 = vst.msk [vmem:[#allocation2 + $0x170] sm:$0xff] %vm1408_vm1, %v1358_v8  ;;  %1503 = vst.msk [vmem:[#allocation2 + $0x2f0] sm:$0xff] %vm1408_vm1, %v1406_v9  ;;  %v1359_v14 = vadd.f32 %v1116_v12, %v718_v6  ;;  %v1407_v15 = vadd.f32 %v1308_v13, %v766_v7  ;;  %v1118_v16 = vpop.f32.mrb[95].mxu0  ;;  %v1310_v17 = vpop.f32.mrb[95].mxu1 }
 0x23f   : > { %1456 = vst.msk [vmem:[#allocation2 + $0x178] sm:$0xff] %vm1408_vm1, %v1359_v14  ;;  %1504 = vst.msk [vmem:[#allocation2 + $0x2f8] sm:$0xff] %vm1408_vm1, %v1407_v15 }
 0x240   : > { %v1511_v18 = vld [vmem:[#allocation2 + $0x10] sm:$0xff]  ;;  %v1509_v19 = vld [vmem:[#allocation2] sm:$0xff]  ;;  %v1512_v20 = vld [vmem:[#allocation2 + $0x18] sm:$0xff]  ;;  %v4297_v21 = vmov 32   ;;  %s4299_s8 = smov 32   ;;  %vm2917_vm2 = vcmask 261120  }
 0x241   : > { %3768 = vset.pattern.permute.xlu1 %v4297_v21  ;;  %3767 = vset.pattern.permute.xlu0 %v4297_v21  ;;  %v1607_v22 = vmax.f32 %v1511_v18, 1.0  ;;  %v1605_v23 = vmax.f32 %v1509_v19, 1.0  ;;  %v1608_v24 = vmax.f32 %v1512_v20, 1.0  ;;  %v1510_v25 = vld [vmem:[#allocation2 + $0x8] sm:$0xff]  ;;  %v1513_v28 = vld [vmem:[#allocation2 + $0x20] sm:$0xff]  ;;  %v1516_v31 = vld [vmem:[#allocation2 + $0x38] sm:$0xff] }
 0x242   : > { %v1606_v26 = vmax.f32 %v1510_v25, 1.0  ;;  %v1514_v27 = vld [vmem:[#allocation2 + $0x28] sm:$0xff]  ;;  %v1609_v30 = vmax.f32 %v1513_v28, 1.0  ;;  %v1515_v32 = vld [vmem:[#allocation2 + $0x30] sm:$0xff]  ;;  %v1612_v33 = vmax.f32 %v1516_v31, 1.0  ;;  %v1517_v36 = vld [vmem:[#allocation2 + $0x40] sm:$0xff] }
 0x243   : > { %4009 = vrcp.f32 %v1607_v22  ;;  %v1610_v29 = vmax.f32 %v1514_v27, 1.0  ;;  %v1611_v34 = vmax.f32 %v1515_v32, 1.0  ;;  %v1518_v35 = vld [vmem:[#allocation2 + $0x48] sm:$0xff]  ;;  %v1613_v40 = vmax.f32 %v1517_v36, 1.0  ;;  %v1520_v41 = vld [vmem:[#allocation2 + $0x58] sm:$0xff]  ;;  %v1519_v43 = vld [vmem:[#allocation2 + $0x50] sm:$0xff] }
 0x244   : > { %4011 = vrcp.f32 %v1605_v23  ;;  %v1614_v38 = vmax.f32 %v1518_v35, 1.0  ;;  %v1616_v45 = vmax.f32 %v1520_v41, 1.0  ;;  %v1615_v46 = vmax.f32 %v1519_v43, 1.0  ;;  %v1522_v47 = vld [vmem:[#allocation2 + $0x68] sm:$0xff]  ;;  %v1521_v49 = vld [vmem:[#allocation2 + $0x60] sm:$0xff]  ;;  %v1524_v53 = vld [vmem:[#allocation2 + $0x78] sm:$0xff] }
 0x245   : > { %4013 = vrcp.f32 %v1608_v24  ;;  %v1618_v51 = vmax.f32 %v1522_v47, 1.0  ;;  %v1617_v52 = vmax.f32 %v1521_v49, 1.0  ;;  %v1523_v55 = vld [vmem:[#allocation2 + $0x70] sm:$0xff]  ;;  %v1620_v57 = vmax.f32 %v1524_v53, 1.0  ;;  %v1526_v59 = vld [vmem:[#allocation2 + $0x88] sm:$0xff]  ;;  %v4913_v61 = vld [vmem:[#allocation2 + $0x80] sm:$0xff] }
 0x246   : > { %4015 = vrcp.f32 %v1606_v26  ;;  %v1619_v58 = vmax.f32 %v1523_v55, 1.0  ;;  %v1622_v63 = vmax.f32 %v1526_v59, 1.0  ;;  %v1621_v0 = vmax.f32 %v4913_v61, 1.0  ;;  %v1528_v1 = vld [vmem:[#allocation2 + $0x98] sm:$0xff]  ;;  %v1527_v3 = vld [vmem:[#allocation2 + $0x90] sm:$0xff]  ;;  %v1530_v7 = vld [vmem:[#allocation2 + $0xa8] sm:$0xff] }
 0x247   : > { %4017 = vrcp.f32 %v1610_v29  ;;  %v1624_v5 = vmax.f32 %v1528_v1, 1.0  ;;  %v1623_v6 = vmax.f32 %v1527_v3, 1.0  ;;  %v1529_v9 = vld [vmem:[#allocation2 + $0xa0] sm:$0xff]  ;;  %v1626_v11 = vmax.f32 %v1530_v7, 1.0  ;;  %v1532_v13 = vld [vmem:[#allocation2 + $0xb8] sm:$0xff]  ;;  %v1531_v15 = vld [vmem:[#allocation2 + $0xb0] sm:$0xff] }
 0x248   : > { %4019 = vrcp.f32 %v1609_v30  ;;  %v1625_v12 = vmax.f32 %v1529_v9, 1.0  ;;  %v1628_v17 = vmax.f32 %v1532_v13, 1.0  ;;  %v1627_v18 = vmax.f32 %v1531_v15, 1.0  ;;  %v1534_v19 = vld [vmem:[#allocation2 + $0xc8] sm:$0xff]  ;;  %v1533_v21 = vld [vmem:[#allocation2 + $0xc0] sm:$0xff]  ;;  %v1536_v25 = vld [vmem:[#allocation2 + $0xd8] sm:$0xff] }
 0x249   : > { %4021 = vrcp.f32 %v1612_v33  ;;  %v1630_v23 = vmax.f32 %v1534_v19, 1.0  ;;  %v1629_v24 = vmax.f32 %v1533_v21, 1.0  ;;  %v1535_v27 = vld [vmem:[#allocation2 + $0xd0] sm:$0xff]  ;;  %v1632_v29 = vmax.f32 %v1536_v25, 1.0  ;;  %v1538_v31 = vld [vmem:[#allocation2 + $0xe8] sm:$0xff]  ;;  %v1537_v33 = vld [vmem:[#allocation2 + $0xe0] sm:$0xff] }
 0x24a   : > { %4023 = vrcp.f32 %v1611_v34  ;;  %v1631_v30 = vmax.f32 %v1535_v27, 1.0  ;;  %v1634_v35 = vmax.f32 %v1538_v31, 1.0  ;;  %v1633_v36 = vmax.f32 %v1537_v33, 1.0  ;;  %v4916_v43 = vld [vmem:[#allocation2 + $0x108] sm:$0xff]  ;;  %v4922_v49 = vld [vmem:[#allocation2 + $0x118] sm:$0xff]  ;;  %s4300_s21 = smov 64  }
 0x24b   : > { %4025 = vrcp.f32 %v1614_v38  ;;  %v1638_v47 = vmax.f32 %v4916_v43, 1.0  ;;  %v1640_v53 = vmax.f32 %v4922_v49, 1.0  ;;  %v1546_v55 = vld [vmem:[#allocation2 + $0x128] sm:$0xff]  ;;  %s4301_s16 = smov 96   ;;  %vm2950_vm3 = vcmask 523264  }
 0x24c   : > { %4027 = vrcp.f32 %v1613_v40  ;;  %v1642_v59 = vmax.f32 %v1546_v55, 1.0  ;;  %vm2983_vm4 = vcmask 785408  }
 0x24d   : > { %v4010_v37 = vpop.eup %4009  ;;  %4029 = vrcp.f32 %v1616_v45  ;;  %v4918_v45 = vld [vmem:[#allocation2 + $0x100] sm:$0xff] }
 0x24e   : > { %v4012_v39 = vpop.eup %4011  ;;  %1905 = vperm.xlu1 %3768, %v4010_v37   ;;  %4031 = vrcp.f32 %v1615_v46  ;;  %v1540_v37 = vld [vmem:[#allocation2 + $0xf8] sm:$0xff] }
 0x24f   : > { %v4014_v42 = vpop.eup %4013  ;;  %1895 = vperm.xlu0 %3767, %v4012_v39   ;;  %4033 = vrcp.f32 %v1618_v51  ;;  %v1539_v39 = vld [vmem:[#allocation2 + $0xf0] sm:$0xff]  ;;  %v1636_v41 = vmax.f32 %v1540_v37, 1.0 }
 0x250   : > { %v4016_v44 = vpop.eup %4015  ;;  %4035 = vrcp.f32 %v1617_v52  ;;  %v4924_v51 = vld [vmem:[#allocation2 + $0x110] sm:$0xff] }
 0x251   : > { %v4018_v48 = vpop.eup %4017  ;;  %4037 = vrcp.f32 %v1620_v57  ;;  %v4928_v57 = vld [vmem:[#allocation2 + $0x120] sm:$0xff] }
 0x252   : > { %1910 = vperm.xlu1 %3768, %v4014_v42   ;;  %v4020_v50 = vpop.eup %4019  ;;  %4039 = vrcp.f32 %v1619_v58  ;;  %v1635_v42 = vmax.f32 %v1539_v39, 1.0 }
 0x253   : > { %1900 = vperm.xlu0 %3767, %v4016_v44   ;;  %v4022_v54 = vpop.eup %4021  ;;  %4041 = vrcp.f32 %v1622_v63 }
 0x254   : > { %v4024_v56 = vpop.eup %4023  ;;  %4043 = vrcp.f32 %v1621_v0  ;;  %v1547_v0 = vld [vmem:[#allocation2 + $0x130] sm:$0xff] }
 0x255   : > { %v4026_v60 = vpop.eup %4025  ;;  %4045 = vrcp.f32 %v1624_v5  ;;  %v1643_v3 = vmax.f32 %v1547_v0, 1.0  ;;  %v4973_v0 = vld [vmem:[#allocation2 + $0x1a8] sm:$0xff] }
 0x256   : > { %1920 = vperm.xlu1 %3768, %v4018_v48   ;;  %v4028_v62 = vpop.eup %4027  ;;  %4047 = vrcp.f32 %v1623_v6  ;;  %v1637_v48 = vmax.f32 %v4918_v45, 1.0  ;;  %v1549_v6 = vld [vmem:[#allocation2 + $0x140] sm:$0xff] }
 0x257   : > { %1915 = vperm.xlu0 %3767, %v4020_v50   ;;  %v4030_v2 = vpop.eup %4029  ;;  %4049 = vrcp.f32 %v1626_v11  ;;  %v1645_v9 = vmax.f32 %v1549_v6, 1.0  ;;  %v4979_v6 = vld [vmem:[#allocation2 + $0x2a8] sm:$0xff] }
 0x258   : > { %v4032_v4 = vpop.eup %4031  ;;  %4051 = vrcp.f32 %v1625_v12  ;;  %v1551_v12 = vld [vmem:[#allocation2 + $0x150] sm:$0xff] }
 0x259   : > { %v4034_v8 = vpop.eup %4033  ;;  %4053 = vrcp.f32 %v1628_v17  ;;  %v1647_v15 = vmax.f32 %v1551_v12, 1.0  ;;  %v4985_v12 = vld [vmem:[#allocation2 + $0x230] sm:$0xff] }
 0x25a   : > { %1930 = vperm.xlu1 %3768, %v4022_v54   ;;  %v4036_v10 = vpop.eup %4035  ;;  %4055 = vrcp.f32 %v1627_v18  ;;  %v1639_v54 = vmax.f32 %v4924_v51, 1.0  ;;  %v4933_v18 = vld [vmem:[#allocation2 + $0x180] sm:$0xff] }
 0x25b   : > { %1925 = vperm.xlu0 %3767, %v4024_v56   ;;  %v4038_v14 = vpop.eup %4037  ;;  %4057 = vrcp.f32 %v1630_v23  ;;  %v1653_v21 = vmax.f32 %v4933_v18, 1.0 }
 0x25c   : > { %v4040_v16 = vpop.eup %4039  ;;  %4059 = vrcp.f32 %v1629_v24  ;;  %v4939_v24 = vld [vmem:[#allocation2 + $0x280] sm:$0xff] }
 0x25d   : > { %v4042_v20 = vpop.eup %4041  ;;  %4061 = vrcp.f32 %v1632_v29  ;;  %v1685_v27 = vmax.f32 %v4939_v24, 1.0 }
 0x25e   : > { %1940 = vperm.xlu1 %3768, %v4026_v60   ;;  %v4044_v22 = vpop.eup %4043  ;;  %4063 = vrcp.f32 %v1631_v30  ;;  %v1641_v60 = vmax.f32 %v4928_v57, 1.0  ;;  %v4945_v30 = vld [vmem:[#allocation2 + $0x208] sm:$0xff] }
 0x25f   : > { %1935 = vperm.xlu0 %3767, %v4028_v62   ;;  %v4046_v26 = vpop.eup %4045  ;;  %4065 = vrcp.f32 %v1634_v35  ;;  %v1548_v62 = vld [vmem:[#allocation2 + $0x138] sm:$0xff]  ;;  %v1670_v33 = vmax.f32 %v4945_v30, 1.0 }
 0x260   : > { %v4048_v28 = vpop.eup %4047  ;;  %4067 = vrcp.f32 %v1633_v36  ;;  %v4951_v36 = vld [vmem:[#allocation2 + $0x190] sm:$0xff] }
 0x261   : > { %v4050_v32 = vpop.eup %4049  ;;  %4069 = vrcp.f32 %v1636_v41  ;;  %v1655_v39 = vmax.f32 %v4951_v36, 1.0 }
 0x262   : > { %1950 = vperm.xlu1 %3768, %v4030_v2   ;;  %v4052_v34 = vpop.eup %4051  ;;  %4071 = vrcp.f32 %v1635_v42  ;;  %v1644_v2 = vmax.f32 %v1548_v62, 1.0  ;;  %v4957_v42 = vld [vmem:[#allocation2 + $0x290] sm:$0xff] }
 0x263   : > { %1945 = vperm.xlu0 %3767, %v4032_v4   ;;  %v4054_v38 = vpop.eup %4053  ;;  %4073 = vrcp.f32 %v1638_v47  ;;  %v1550_v4 = vld [vmem:[#allocation2 + $0x148] sm:$0xff]  ;;  %v1687_v47 = vmax.f32 %v4957_v42, 1.0 }
 0x264   : > { %v4056_v40 = vpop.eup %4055  ;;  %4075 = vrcp.f32 %v1637_v48  ;;  %v4961_v48 = vld [vmem:[#allocation2 + $0x298] sm:$0xff] }
 0x265   : > { %v4058_v44 = vpop.eup %4057  ;;  %4077 = vrcp.f32 %v1640_v53 }
 0x266   : > { %1960 = vperm.xlu1 %3768, %v4034_v8   ;;  %v4060_v46 = vpop.eup %4059  ;;  %4079 = vrcp.f32 %v1639_v54  ;;  %v1646_v8 = vmax.f32 %v1550_v4, 1.0  ;;  %v1688_v54 = vmax.f32 %v4961_v48, 1.0  ;;  %v1658_v4 = vmax.f32 %v4973_v0, 1.0 }
 0x267   : > { %1955 = vperm.xlu0 %3767, %v4036_v10   ;;  %v4062_v50 = vpop.eup %4061  ;;  %4081 = vrcp.f32 %v1642_v59  ;;  %v1552_v10 = vld [vmem:[#allocation2 + $0x158] sm:$0xff]  ;;  %v4969_v59 = vld [vmem:[#allocation2 + $0x1a0] sm:$0xff] }
 0x268   : > { %v4064_v52 = vpop.eup %4063  ;;  %4083 = vrcp.f32 %v1641_v60 }
 0x269   : > { %v4066_v56 = vpop.eup %4065  ;;  %4085 = vrcp.f32 %v1644_v2  ;;  %v4975_v2 = vld [vmem:[#allocation2 + $0x2a0] sm:$0xff] }
 0x26a   : > { %1970 = vperm.xlu1 %3768, %v4038_v14   ;;  %v4068_v58 = vpop.eup %4067  ;;  %4087 = vrcp.f32 %v1643_v3  ;;  %v1648_v14 = vmax.f32 %v1552_v10, 1.0  ;;  %v1690_v10 = vmax.f32 %v4979_v6, 1.0 }
 0x26b   : > { %1965 = vperm.xlu0 %3767, %v4040_v16   ;;  %v4070_v63 = vpop.eup %4069  ;;  %4089 = vrcp.f32 %v1646_v8  ;;  %v4931_v16 = vld [vmem:[#allocation2 + $0x200] sm:$0xff]  ;;  %v4981_v8 = vld [vmem:[#allocation2 + $0x228] sm:$0xff] }
 0x26c   : > { %v4072_v1 = vpop.eup %4071  ;;  %4091 = vrcp.f32 %v1645_v9 }
 0x26d   : > { %v4074_v5 = vpop.eup %4073  ;;  %4093 = vrcp.f32 %v1648_v14  ;;  %v4987_v14 = vld [vmem:[#allocation2 + $0x1b0] sm:$0xff] }
 0x26e   : > { %1980 = vperm.xlu1 %3768, %v4042_v20   ;;  %v4076_v7 = vpop.eup %4075  ;;  %v1669_v20 = vmax.f32 %v4931_v16, 1.0  ;;  %4095 = vrcp.f32 %v1647_v15 }
 0x26f   : > { %1975 = vperm.xlu0 %3767, %v4044_v22   ;;  %v4078_v11 = vpop.eup %4077  ;;  %v4937_v22 = vld [vmem:[#allocation2 + $0x188] sm:$0xff] }
 0x270   : > { %v4080_v13 = vpop.eup %4079  ;;  %4097 = vrcp.f32 %v1669_v20  ;;  %v4991_v20 = vld [vmem:[#allocation2 + $0x1b8] sm:$0xff] }
 0x271   : > { %v4082_v17 = vpop.eup %4081  ;;  %4099 = vrcp.f32 %v1653_v21 }
 0x272   : > { %1990 = vperm.xlu1 %3768, %v4046_v26   ;;  %v4084_v19 = vpop.eup %4083  ;;  %v1654_v26 = vmax.f32 %v4937_v22, 1.0 }
 0x273   : > { %1985 = vperm.xlu0 %3767, %v4048_v28   ;;  %v4086_v23 = vpop.eup %4085  ;;  %v4943_v28 = vld [vmem:[#allocation2 + $0x288] sm:$0xff] }
 0x274   : > { %v4088_v25 = vpop.eup %4087  ;;  %4101 = vrcp.f32 %v1654_v26  ;;  %v1660_v26 = vmax.f32 %v4991_v20, 1.0 }
 0x275   : > { %v4090_v29 = vpop.eup %4089  ;;  %4103 = vrcp.f32 %v1685_v27 }
 0x276   : > { %2000 = vperm.xlu1 %3768, %v4050_v32   ;;  %v4092_v31 = vpop.eup %4091  ;;  %v1686_v32 = vmax.f32 %v4943_v28, 1.0 }
 0x277   : > { %1995 = vperm.xlu0 %3767, %v4052_v34   ;;  %v4949_v34 = vld [vmem:[#allocation2 + $0x210] sm:$0xff]  ;;  %v4094_v35 = vpop.eup %4093 }
 0x278   : > { %v4096_v37 = vpop.eup %4095  ;;  %4105 = vrcp.f32 %v1686_v32  ;;  %v4999_v32 = vld [vmem:[#allocation2 + $0x238] sm:$0xff] }
 0x279   : > { %4107 = vrcp.f32 %v1670_v33  ;;  %5714 = vst [vmem:[#allocation4_spill] sm:$0xff] %v4999_v32 }
 0x27a   : > { %2010 = vperm.xlu1 %3768, %v4054_v38   ;;  %v1671_v38 = vmax.f32 %v4949_v34, 1.0  ;;  %v4098_v41 = vpop.eup %4097 }
 0x27b   : > { %2005 = vperm.xlu0 %3767, %v4056_v40   ;;  %v4955_v40 = vld [vmem:[#allocation2 + $0x198] sm:$0xff] }
 0x27c   : > { %4109 = vrcp.f32 %v1671_v38  ;;  %v5003_v38 = vld [vmem:[#allocation2 + $0x240] sm:$0xff] }
 0x27d   : > { %4111 = vrcp.f32 %v1655_v39  ;;  %5715 = vst [vmem:[#allocation5_spill] sm:$0xff] %v5003_v38 }
 0x27e   : > { %2020 = vperm.xlu1 %3768, %v4058_v44   ;;  %v4100_v44 = vpop.eup %4099 }
 0x27f   : > { %2015 = vperm.xlu0 %3767, %v4060_v46   ;;  %v1656_v46 = vmax.f32 %v4955_v40, 1.0 }
 0x281   : > { %4113 = vrcp.f32 %v1656_v46  ;;  %v1677_v46 = vmax.f32 %v5003_v38, 1.0  ;;  %v3035_v38 = vld [vmem:[%s5683_s4 + $0x98] sm:$0xff] }
 0x282   : > { %2030 = vperm.xlu1 %3768, %v4062_v50   ;;  %v4102_v50 = vpop.eup %4101  ;;  %4115 = vrcp.f32 %v1687_v47 }
 0x283   : > { %2025 = vperm.xlu0 %3767, %v4064_v52   ;;  %v4963_v52 = vld [vmem:[#allocation2 + $0x218] sm:$0xff]  ;;  %v4104_v53 = vpop.eup %4103  ;;  %4117 = vrcp.f32 %v1688_v54  ;;  %v5011_v54 = vld [vmem:[#allocation2 + $0x2c0] sm:$0xff] }
 0x284   : > { %v1672_v55 = vmax.f32 %v4963_v52, 1.0  ;;  %5718 = vst [vmem:[#allocation8_spill] sm:$0xff] %v5011_v54 }
 0x286   : > { %2040 = vperm.xlu1 %3768, %v4066_v56   ;;  %v4967_v56 = vld [vmem:[#allocation2 + $0x220] sm:$0xff]  ;;  %4119 = vrcp.f32 %v1672_v55 }
 0x287   : > { %2035 = vperm.xlu0 %3767, %v4068_v58   ;;  %v4106_v58 = vpop.eup %4105  ;;  %v1673_v62 = vmax.f32 %v4967_v56, 1.0 }
 0x288   : > { %v4108_v60 = vpop.eup %4107 }
 0x289   : > { %4121 = vrcp.f32 %v1673_v62  ;;  %v5015_v62 = vld [vmem:[#allocation2 + $0x2c8] sm:$0xff] }
 0x28a   : > { %2050 = vperm.xlu1 %3768, %v4070_v63   ;;  %v1657_v63 = vmax.f32 %v4969_v59, 1.0  ;;  %5719 = vst [vmem:[#allocation9_spill] sm:$0xff] %v5015_v62 }
 0x28b   : > { %2045 = vperm.xlu0 %3767, %v4072_v1   ;;  %v4110_v1 = vpop.eup %4109 }
 0x28c   : > { %v4112_v3 = vpop.eup %4111  ;;  %4123 = vrcp.f32 %v1657_v63 }
 0x28d   : > { %4125 = vrcp.f32 %v1658_v4 }
 0x28e   : > { %2060 = vperm.xlu1 %3768, %v4074_v5   ;;  %v1689_v5 = vmax.f32 %v4975_v2, 1.0 }
 0x28f   : > { %2055 = vperm.xlu0 %3767, %v4076_v7   ;;  %v4114_v7 = vpop.eup %4113 }
 0x290   : > { %v4116_v9 = vpop.eup %4115  ;;  %4127 = vrcp.f32 %v1689_v5  ;;  %v1694_v5 = vmax.f32 %v5015_v62, 1.0 }
 0x291   : > { %4129 = vrcp.f32 %v1690_v10  ;;  %v5025_v10 = vld [vmem:[#allocation2 + $0x250] sm:$0xff] }
 0x292   : > { %2070 = vperm.xlu1 %3768, %v4078_v11   ;;  %v1674_v11 = vmax.f32 %v4981_v8, 1.0  ;;  %5721 = vst [vmem:[#allocation11_spill] sm:$0xff] %v5025_v10 }
 0x293   : > { %2065 = vperm.xlu0 %3767, %v4080_v13   ;;  %v4118_v13 = vpop.eup %4117 }
 0x294   : > { %v4120_v15 = vpop.eup %4119  ;;  %4131 = vrcp.f32 %v1674_v11 }
 0x295   : > { %v4122_v21 = vpop.eup %4121 }
 0x296   : > { %2080 = vperm.xlu1 %3768, %v4082_v17   ;;  %v1675_v17 = vmax.f32 %v4985_v12, 1.0 }
 0x297   : > { %2075 = vperm.xlu0 %3767, %v4084_v19   ;;  %v1659_v19 = vmax.f32 %v4987_v14, 1.0 }
 0x298   : > { %4133 = vrcp.f32 %v1675_v17 }
 0x299   : > { %4135 = vrcp.f32 %v1659_v19  ;;  %v1679_v19 = vmax.f32 %v5025_v10, 1.0 }
 0x29a   : > { %2090 = vperm.xlu1 %3768, %v4086_v23   ;;  %v4993_v23 = vld [vmem:[#allocation2 + $0x2b0] sm:$0xff]  ;;  %4137 = vrcp.f32 %v1660_v26  ;;  %v5035_v26 = vld [vmem:[#allocation2 + $0x1d8] sm:$0xff] }
 0x29b   : > { %2085 = vperm.xlu0 %3767, %v4088_v25   ;;  %v4124_v25 = vpop.eup %4123  ;;  %v1691_v27 = vmax.f32 %v4993_v23, 1.0  ;;  %5723 = vst [vmem:[#allocation13_spill] sm:$0xff] %v5035_v26 }
 0x29d   : > { %4139 = vrcp.f32 %v1691_v27 }
 0x29e   : > { %2100 = vperm.xlu1 %3768, %v4090_v29   ;;  %v4997_v29 = vld [vmem:[#allocation2 + $0x2b8] sm:$0xff] }
 0x29f   : > { %2095 = vperm.xlu0 %3767, %v4092_v31   ;;  %v4126_v31 = vpop.eup %4125 }
 0x2a0   : > { %v4128_v33 = vpop.eup %4127 }
 0x2a1   : > { %v4130_v39 = vpop.eup %4129 }
 0x2a2   : > { %2110 = vperm.xlu1 %3768, %v4094_v35   ;;  %v1692_v35 = vmax.f32 %v4997_v29, 1.0 }
 0x2a3   : > { %2105 = vperm.xlu0 %3767, %v4096_v37   ;;  %v1676_v37 = vmax.f32 %v4999_v32, 1.0 }
 0x2a4   : > { %4141 = vrcp.f32 %v1692_v35 }
 0x2a5   : > { %4143 = vrcp.f32 %v1676_v37  ;;  %v1664_v37 = vmax.f32 %v5035_v26, 1.0 }
 0x2a6   : > { %2215 = vperm.xlu1 %3768, %v4098_v41   ;;  %v5005_v41 = vld [vmem:[#allocation2 + $0x1c0] sm:$0xff]  ;;  %4145 = vrcp.f32 %v1677_v46  ;;  %v5045_v46 = vld [vmem:[#allocation2 + $0x2d8] sm:$0xff] }
 0x2a7   : > { %2135 = vperm.xlu0 %3767, %v4100_v44   ;;  %5716 = vst [vmem:[#allocation6_spill] sm:$0xff] %v5005_v41  ;;  %v4132_v44 = vpop.eup %4131  ;;  %v1661_v47 = vmax.f32 %v5005_v41, 1.0  ;;  %5725 = vst [vmem:[#allocation15_spill] sm:$0xff] %v5045_v46 }
 0x2a9   : > { %4147 = vrcp.f32 %v1661_v47 }
 0x2aa   : > { %2140 = vperm.xlu1 %3768, %v4102_v50   ;;  %v5009_v50 = vld [vmem:[#allocation2 + $0x1c8] sm:$0xff] }
 0x2ab   : > { %2295 = vperm.xlu0 %3767, %v4104_v53   ;;  %5717 = vst [vmem:[#allocation7_spill] sm:$0xff] %v5009_v50  ;;  %v4134_v53 = vpop.eup %4133 }
 0x2ac   : > { %v4136_v55 = vpop.eup %4135 }
 0x2ad   : > { %v4138_v63 = vpop.eup %4137 }
 0x2ae   : > { %2300 = vperm.xlu1 %3768, %v4106_v58   ;;  %v1662_v58 = vmax.f32 %v5009_v50, 1.0 }
 0x2af   : > { %2220 = vperm.xlu0 %3767, %v4108_v60   ;;  %v1693_v60 = vmax.f32 %v5011_v54, 1.0 }
 0x2b0   : > { %4149 = vrcp.f32 %v1662_v58 }
 0x2b1   : > { %4151 = vrcp.f32 %v1693_v60  ;;  %v1696_v60 = vmax.f32 %v5045_v46, 1.0 }
 0x2b2   : > { %2225 = vperm.xlu1 %3768, %v4110_v1   ;;  %v5017_v1 = vld [vmem:[#allocation2 + $0x248] sm:$0xff]  ;;  %4153 = vrcp.f32 %v1694_v5  ;;  %v5055_v5 = vld [vmem:[#allocation2 + $0x1e0] sm:$0xff] }
 0x2b3   : > { %2145 = vperm.xlu0 %3767, %v4112_v3   ;;  %5720 = vst [vmem:[#allocation10_spill] sm:$0xff] %v5017_v1  ;;  %v4140_v3 = vpop.eup %4139  ;;  %5727 = vst [vmem:[#allocation17_spill] sm:$0xff] %v5055_v5 }
 0x2b4   : > { %v4142_v11 = vpop.eup %4141 }
 0x2b6   : > { %2150 = vperm.xlu1 %3768, %v4114_v7  }
 0x2b7   : > { %2305 = vperm.xlu0 %3767, %v4116_v9   ;;  %v1678_v9 = vmax.f32 %v5017_v1, 1.0 }
 0x2b9   : > { %4155 = vrcp.f32 %v1678_v9 }
 0x2ba   : > { %2310 = vperm.xlu1 %3768, %v4118_v13   ;;  %v5027_v13 = vld [vmem:[#allocation2 + $0x1d0] sm:$0xff]  ;;  %4157 = vrcp.f32 %v1679_v19 }
 0x2bb   : > { %2230 = vperm.xlu0 %3767, %v4120_v15   ;;  %5722 = vst [vmem:[#allocation12_spill] sm:$0xff] %v5027_v13  ;;  %v4144_v15 = vpop.eup %4143 }
 0x2bc   : > { %v4146_v27 = vpop.eup %4145 }
 0x2be   : > { %2235 = vperm.xlu1 %3768, %v4122_v21  }
 0x2bf   : > { %2155 = vperm.xlu0 %3767, %v4124_v25   ;;  %v1663_v25 = vmax.f32 %v5027_v13, 1.0 }
 0x2c1   : > { %4159 = vrcp.f32 %v1663_v25  ;;  %v1665_v25 = vmax.f32 %v5055_v5, 1.0  ;;  %v5077_v5 = vld [vmem:[#allocation2 + $0x168] sm:$0xff] }
 0x2c2   : > { %2160 = vperm.xlu1 %3768, %v4126_v31   ;;  %v5037_v31 = vld [vmem:[#allocation2 + $0x2d0] sm:$0xff]  ;;  %4161 = vrcp.f32 %v1664_v37  ;;  %v5065_v37 = vld [vmem:[#allocation2 + $0x2e0] sm:$0xff]  ;;  %5736 = vst [vmem:[#allocation26_spill] sm:$0xff] %v5077_v5 }
 0x2c3   : > { %2315 = vperm.xlu0 %3767, %v4128_v33   ;;  %5724 = vst [vmem:[#allocation14_spill] sm:$0xff] %v5037_v31  ;;  %v4148_v33 = vpop.eup %4147  ;;  %5731 = vst [vmem:[#allocation21_spill] sm:$0xff] %v5065_v37 }
 0x2c4   : > { %v4150_v47 = vpop.eup %4149 }
 0x2c6   : > { %2320 = vperm.xlu1 %3768, %v4130_v39  }
 0x2c7   : > { %2240 = vperm.xlu0 %3767, %v4132_v44   ;;  %v1695_v44 = vmax.f32 %v5037_v31, 1.0 }
 0x2c9   : > { %4163 = vrcp.f32 %v1695_v44 }
 0x2ca   : > { %2245 = vperm.xlu1 %3768, %v4134_v53   ;;  %v5047_v53 = vld [vmem:[#allocation2 + $0x258] sm:$0xff]  ;;  %4165 = vrcp.f32 %v1696_v60  ;;  %v1697_v60 = vmax.f32 %v5065_v37, 1.0  ;;  %v5087_v37 = vld [vmem:[#allocation2 + $0x268] sm:$0xff] }
 0x2cb   : > { %2165 = vperm.xlu0 %3767, %v4136_v55   ;;  %5726 = vst [vmem:[#allocation16_spill] sm:$0xff] %v5047_v53  ;;  %v4152_v55 = vpop.eup %4151  ;;  %5740 = vst [vmem:[#allocation30_spill] sm:$0xff] %v5087_v37 }
 0x2cc   : > { %v4154_v9 = vpop.eup %4153 }
 0x2cd   : > { %v5019_v4 = vpop.permute.xlu1 %1905 }
 0x2ce   : > { %v5022_v7 = vpop.permute.xlu0 %1895  ;;  %2170 = vperm.xlu1 %3768, %v4138_v63  }
 0x2cf   : > { %2325 = vperm.xlu0 %3767, %v4140_v3   ;;  %v1680_v3 = vmax.f32 %v5047_v53, 1.0 }
 0x2d1   : > { %v5029_v17 = vpop.permute.xlu1 %1910  ;;  %4167 = vrcp.f32 %v1680_v3 }
 0x2d2   : > { %v5032_v21 = vpop.permute.xlu0 %1900  ;;  %2330 = vperm.xlu1 %3768, %v4142_v11   ;;  %v5057_v11 = vld [vmem:[#allocation2 + $0x160] sm:$0xff]  ;;  %4169 = vrcp.f32 %v1665_v25 }
 0x2d3   : > { %2250 = vperm.xlu0 %3767, %v4144_v15   ;;  %5728 = vst [vmem:[#allocation18_spill] sm:$0xff] %v5057_v11  ;;  %v4156_v15 = vpop.eup %4155 }
 0x2d4   : > { %v4158_v44 = vpop.eup %4157 }
 0x2d5   : > { %v5039_v35 = vpop.permute.xlu1 %1920 }
 0x2d6   : > { %v5042_v39 = vpop.permute.xlu0 %1915  ;;  %2255 = vperm.xlu1 %3768, %v4146_v27  }
 0x2d7   : > { %2175 = vperm.xlu0 %3767, %v4148_v33   ;;  %v1649_v33 = vmax.f32 %v5057_v11, 1.0 }
 0x2d9   : > { %v5049_v58 = vpop.permute.xlu1 %1930  ;;  %4171 = vrcp.f32 %v1649_v33  ;;  %v1650_v33 = vmax.f32 %v5077_v5, 1.0 }
 0x2da   : > { %v5052_v63 = vpop.permute.xlu0 %1925  ;;  %2180 = vperm.xlu1 %3768, %v4150_v47   ;;  %v5067_v47 = vld [vmem:[#allocation2 + $0x260] sm:$0xff]  ;;  %4173 = vrcp.f32 %v1697_v60 }
 0x2db   : > { %2335 = vperm.xlu0 %3767, %v4152_v55   ;;  %5732 = vst [vmem:[#allocation22_spill] sm:$0xff] %v5067_v47  ;;  %v4160_v55 = vpop.eup %4159  ;;  %v1681_v3 = vmax.f32 %v5067_v47, 1.0 }
 0x2dc   : > { %v4162_v11 = vpop.eup %4161 }
 0x2dd   : > { %v5059_v19 = vpop.permute.xlu1 %1940  ;;  %4175 = vrcp.f32 %v1681_v3  ;;  %v5095_v3 = vld [vmem:[#allocation2 + $0x1f0] sm:$0xff] }
 0x2de   : > { %5729 = vst [vmem:[#allocation19_spill] sm:$0xff] %v5059_v19  ;;  %v5062_v27 = vpop.permute.xlu0 %1935  ;;  %2340 = vperm.xlu1 %3768, %v4154_v9   ;;  %v5075_v9 = vld [vmem:[#allocation2 + $0x1e8] sm:$0xff]  ;;  %5743 = vst [vmem:[#allocation33_spill] sm:$0xff] %v5095_v3 }
 0x2df   : > { %5730 = vst [vmem:[#allocation20_spill] sm:$0xff] %v5062_v27  ;;  %2260 = vperm.xlu0 %3767, %v4156_v15   ;;  %5735 = vst [vmem:[#allocation25_spill] sm:$0xff] %v5075_v9  ;;  %v4164_v15 = vpop.eup %4163  ;;  %v1666_v25 = vmax.f32 %v5075_v9, 1.0  ;;  %v5097_v9 = vld [vmem:[#allocation2 + $0x170] sm:$0xff] }
 0x2e0   : > { %v4166_v47 = vpop.eup %4165  ;;  %5744 = vst [vmem:[#allocation34_spill] sm:$0xff] %v5097_v9 }
 0x2e1   : > { %v5069_v53 = vpop.permute.xlu1 %1950  ;;  %4177 = vrcp.f32 %v1666_v25  ;;  %v1667_v25 = vmax.f32 %v5095_v3, 1.0  ;;  %v5117_v3 = vld [vmem:[#allocation2 + $0x178] sm:$0xff] }
 0x2e2   : > { %5733 = vst [vmem:[#allocation23_spill] sm:$0xff] %v5069_v53  ;;  %v5072_v46 = vpop.permute.xlu0 %1945  ;;  %2265 = vperm.xlu1 %3768, %v4158_v44   ;;  %v5085_v44 = vld [vmem:[#allocation2 + $0x2e8] sm:$0xff]  ;;  %4179 = vrcp.f32 %v1650_v33  ;;  %v5105_v33 = vld [vmem:[#allocation2 + $0x2f0] sm:$0xff]  ;;  %5748 = vst [vmem:[#allocation38_spill] sm:$0xff] %v5117_v3 }
 0x2e3   : > { %5734 = vst [vmem:[#allocation24_spill] sm:$0xff] %v5072_v46  ;;  %2185 = vperm.xlu0 %3767, %v4160_v55   ;;  %5739 = vst [vmem:[#allocation29_spill] sm:$0xff] %v5085_v44  ;;  %v4168_v55 = vpop.eup %4167  ;;  %v1698_v60 = vmax.f32 %v5085_v44, 1.0 }
 0x2e4   : > { %v4170_v5 = vpop.eup %4169  ;;  %5745 = vst [vmem:[#allocation35_spill] sm:$0xff] %v5105_v33 }
 0x2e5   : > { %v5079_v26 = vpop.permute.xlu1 %1960  ;;  %4181 = vrcp.f32 %v1698_v60  ;;  %v1699_v60 = vmax.f32 %v5105_v33, 1.0  ;;  %v5127_v33 = vld [vmem:[#allocation2 + $0x278] sm:$0xff] }
 0x2e6   : > { %5737 = vst [vmem:[#allocation27_spill] sm:$0xff] %v5079_v26  ;;  %v5082_v31 = vpop.permute.xlu0 %1955  ;;  %2190 = vperm.xlu1 %3768, %v4162_v11   ;;  %v1682_v11 = vmax.f32 %v5087_v37, 1.0  ;;  %5750 = vst [vmem:[#allocation40_spill] sm:$0xff] %v5127_v33 }
 0x2e7   : > { %5738 = vst [vmem:[#allocation28_spill] sm:$0xff] %v5082_v31  ;;  %2345 = vperm.xlu0 %3767, %v4164_v15   ;;  %v4172_v15 = vpop.eup %4171 }
 0x2e8   : > { %4183 = vrcp.f32 %v1682_v11  ;;  %v4174_v37 = vpop.eup %4173  ;;  %v5115_v11 = vld [vmem:[#allocation2 + $0x1f8] sm:$0xff] }
 0x2e9   : > { %v5089_v10 = vpop.permute.xlu1 %1970  ;;  %4185 = vrcp.f32 %v1667_v25  ;;  %5747 = vst [vmem:[#allocation37_spill] sm:$0xff] %v5115_v11  ;;  %v1668_v25 = vmax.f32 %v5115_v11, 1.0 }
 0x2ea   : > { %5741 = vst [vmem:[#allocation31_spill] sm:$0xff] %v5089_v10  ;;  %v5092_v26 = vpop.permute.xlu0 %1965  ;;  %2350 = vperm.xlu1 %3768, %v4166_v47   ;;  %v1651_v47 = vmax.f32 %v5097_v9, 1.0 }
 0x2eb   : > { %5742 = vst [vmem:[#allocation32_spill] sm:$0xff] %v5092_v26  ;;  %2270 = vperm.xlu0 %3767, %v4168_v55   ;;  %v5107_v26 = vld [vmem:[#allocation2 + $0x270] sm:$0xff]  ;;  %v4176_v55 = vpop.eup %4175 }
 0x2ec   : > { %5746 = vst [vmem:[#allocation36_spill] sm:$0xff] %v5107_v26  ;;  %4187 = vrcp.f32 %v1651_v47  ;;  %v4178_v9 = vpop.eup %4177  ;;  %v5125_v47 = vld [vmem:[#allocation2 + $0x2f8] sm:$0xff] }
 0x2ed   : > { %v5099_v31 = vpop.permute.xlu1 %1980  ;;  %4189 = vrcp.f32 %v1699_v60  ;;  %5749 = vst [vmem:[#allocation39_spill] sm:$0xff] %v5125_v47  ;;  %v1700_v60 = vmax.f32 %v5125_v47, 1.0  ;;  %v4298_v47 = vmov 0.0|0.0  }
 0x2ee   : > { %v5102_v10 = vpop.permute.xlu0 %1975  ;;  %2195 = vperm.xlu1 %3768, %v4170_v5   ;;  %v1683_v5 = vmax.f32 %v5107_v26, 1.0  ;;  %3604 = vmatprep.subr.bf16.mxu0 %v4298_v47 }
 0x2ef   : > { %2115 = vperm.xlu0 %3767, %v4172_v15   ;;  %v4180_v15 = vpop.eup %4179  ;;  %3666 = vmatprep.subr.bf16.mxu1 %v4298_v47 }
 0x2f0   : > { %4191 = vrcp.f32 %v1683_v5  ;;  %v4182_v26 = vpop.eup %4181 }
 0x2f1   : > { %v5109_v44 = vpop.permute.xlu1 %1990  ;;  %4193 = vrcp.f32 %v1668_v25 }
 0x2f2   : > { %v5112_v53 = vpop.permute.xlu0 %1985  ;;  %2355 = vperm.xlu1 %3768, %v4174_v37   ;;  %v1652_v37 = vmax.f32 %v5117_v3, 1.0  ;;  %v3017_v3 = vld [vmem:[%s5683_s4 + $0x8] sm:$0xff] }
 0x2f3   : > { %2275 = vperm.xlu0 %3767, %v4176_v55   ;;  %v4184_v55 = vpop.eup %4183 }
 0x2f4   : > { %4195 = vrcp.f32 %v1652_v37  ;;  %v4186_v5 = vpop.eup %4185 }
 0x2f5   : > { %v5119_v13 = vpop.permute.xlu1 %2000  ;;  %4197 = vrcp.f32 %v1700_v60 }
 0x2f6   : > { %v5122_v46 = vpop.permute.xlu0 %1995  ;;  %2200 = vperm.xlu1 %3768, %v4178_v9   ;;  %v1684_v9 = vmax.f32 %v5127_v33, 1.0  ;;  %v4188_v11 = vpop.eup %4187  ;;  %v3021_v33 = vld [vmem:[%s5683_s4 + $0x28] sm:$0xff] }
 0x2f7   : > { %2120 = vperm.xlu0 %3767, %v4180_v15   ;;  %v3016_v15 = vld [vmem:[%s5683_s4] sm:$0xff]  ;;  %v4190_v37 = vpop.eup %4189 }
 0x2f8   : > { %v3605_v25 = vpack.c.bf16 %v3017_v3, %v3016_v15  ;;  %4199 = vrcp.f32 %v1684_v9  ;;  %v3018_v3 = vld [vmem:[%s5683_s4 + $0x10] sm:$0xff] }
 0x2f9   : > { %v5129_v1 = vpop.permute.xlu1 %2010 }
 0x2fa   : > { %v5132_v62 = vpop.permute.xlu0 %2005  ;;  %2360 = vperm.xlu1 %3768, %v4182_v26   ;;  %3606 = vmatpush1.bf16.msra.mxu0 %v3605_v25  ;;  %v4192_v60 = vpop.eup %4191 }
 0x2fb   : > { %2280 = vperm.xlu0 %3767, %v4184_v55   ;;  %3676 = vmatpush1.bf16.msra.mxu1 %v3605_v25  ;;  %v3019_v55 = vld [vmem:[%s5683_s4 + $0x18] sm:$0xff]  ;;  %v3020_v25 = vld [vmem:[%s5683_s4 + $0x20] sm:$0xff] }
 0x2fc   : > { %3607 = vmatprep.subr.bf16.mxu0 %v4298_v47  ;;  %3667 = vmatprep.subr.bf16.mxu1 %v4298_v47  ;;  %v3608_v15 = vpack.c.bf16 %v3019_v55, %v3018_v3  ;;  %v3611_v3 = vpack.c.bf16 %v3021_v33, %v3020_v25 }
 0x2fd   : > { %v5141_v50 = vpop.permute.xlu1 %2020 }
 0x2fe   : > { %5751 = vst [vmem:[#allocation41_spill] sm:$0xff] %v5141_v50  ;;  %v5145_v26 = vpop.permute.xlu0 %2015  ;;  %2205 = vperm.xlu1 %3768, %v4186_v5   ;;  %3609 = vmatpush1.bf16.msra.mxu0 %v3608_v15 }
 0x2ff   : > { %5752 = vst [vmem:[#allocation42_spill] sm:$0xff] %v5145_v26  ;;  %2125 = vperm.xlu0 %3767, %v4188_v11   ;;  %v4194_v11 = vpop.eup %4193  ;;  %3677 = vmatpush1.bf16.msra.mxu1 %v3608_v15  ;;  %v3022_v15 = vld [vmem:[%s5683_s4 + $0x30] sm:$0xff]  ;;  %v4203_v26 = vld [vmem:[#allocation2 + $0x8] sm:$0xff] }
 0x300   : > { %v4196_v54 = vpop.eup %4195  ;;  %3610 = vmatprep.subr.bf16.mxu0 %v4298_v47  ;;  %3668 = vmatprep.subr.bf16.mxu1 %v4298_v47  ;;  %v2374_v32 = vmul.f32 %v4203_v26, %v5032_v21  ;;  %v4205_v26 = vld [vmem:[#allocation2 + $0x10] sm:$0xff] }
 0x301   : > { %v5155_v5 = vpop.permute.xlu1 %2030 }
 0x302   : > { %5753 = vst [vmem:[#allocation43_spill] sm:$0xff] %v5155_v5  ;;  %v5157_v9 = vpop.permute.xlu0 %2025  ;;  %2365 = vperm.xlu1 %3768, %v4190_v37   ;;  %3612 = vmatpush1.bf16.msra.mxu0 %v3611_v3  ;;  %v3023_v5 = vld [vmem:[%s5683_s4 + $0x38] sm:$0xff] }
 0x303   : > { %5754 = vst [vmem:[#allocation44_spill] sm:$0xff] %v5157_v9  ;;  %2285 = vperm.xlu0 %3767, %v4192_v60   ;;  %v4198_v60 = vpop.eup %4197  ;;  %3678 = vmatpush1.bf16.msra.mxu1 %v3611_v3  ;;  %v3614_v33 = vpack.c.bf16 %v3023_v5, %v3022_v15  ;;  %v4201_v3 = vld [vmem:[#allocation2] sm:$0xff]  ;;  %v3025_v5 = vld [vmem:[%s5683_s4 + $0x48] sm:$0xff] }
 0x304   : > { %v4200_v9 = vpop.eup %4199  ;;  %3613 = vmatprep.subr.bf16.mxu0 %v4298_v47  ;;  %3669 = vmatprep.subr.bf16.mxu1 %v4298_v47 }
 0x305   : > { %v5167_v55 = vpop.permute.xlu1 %2040 }
 0x306   : > { %5755 = vst [vmem:[#allocation45_spill] sm:$0xff] %v5167_v55  ;;  %v5169_v37 = vpop.permute.xlu0 %2035  ;;  %2210 = vperm.xlu1 %3768, %v4194_v11   ;;  %v2389_v11 = vmul.f32 %v5102_v10, %v4913_v61  ;;  %3615 = vmatpush1.bf16.msra.mxu0 %v3614_v33  ;;  %v2373_v55 = vmul.f32 %v4201_v3, %v5022_v7  ;;  %v3026_v7 = vld [vmem:[%s5683_s4 + $0x50] sm:$0xff] }
 0x307   : > { %5756 = vst [vmem:[#allocation46_spill] sm:$0xff] %v5169_v37  ;;  %2130 = vperm.xlu0 %3767, %v4196_v54   ;;  %3679 = vmatpush1.bf16.msra.mxu1 %v3614_v33  ;;  %v3024_v37 = vld [vmem:[%s5683_s4 + $0x40] sm:$0xff]  ;;  %v3029_v33 = vld [vmem:[%s5683_s4 + $0x68] sm:$0xff] }
 0x308   : > { %3616 = vmatprep.subr.bf16.mxu0 %v4298_v47  ;;  %3670 = vmatprep.subr.bf16.mxu1 %v4298_v47  ;;  %v3617_v61 = vpack.c.bf16 %v3025_v5, %v3024_v37  ;;  %v3769_v10 = vpack.i.bf16 %v2389_v11, %v2373_v55  ;;  %v3028_v55 = vld [vmem:[%s5683_s4 + $0x60] sm:$0xff] }
 0x309   : > { %v5181_v25 = vpop.permute.xlu1 %2050  ;;  %v3623_v5 = vpack.c.bf16 %v3029_v33, %v3028_v55  ;;  %v3032_v33 = vld [vmem:[%s5683_s4 + $0x80] sm:$0xff] }
 0x30a   : > { %5757 = vst [vmem:[#allocation47_spill] sm:$0xff] %v5181_v25  ;;  %v5183_v54 = vpop.permute.xlu0 %2045  ;;  %2370 = vperm.xlu1 %3768, %v4198_v60   ;;  %3618 = vmatpush1.bf16.msra.mxu0 %v3617_v61 }
 0x30b   : > { %5758 = vst [vmem:[#allocation48_spill] sm:$0xff] %v5183_v54  ;;  %2290 = vperm.xlu0 %3767, %v4200_v9   ;;  %3680 = vmatpush1.bf16.msra.mxu1 %v3617_v61  ;;  %v3027_v9 = vld [vmem:[%s5683_s4 + $0x58] sm:$0xff]  ;;  %v3030_v61 = vld [vmem:[%s5683_s4 + $0x70] sm:$0xff] }
 0x30c   : > { %3619 = vmatprep.subr.bf16.mxu0 %v4298_v47  ;;  %3671 = vmatprep.subr.bf16.mxu1 %v4298_v47  ;;  %v3620_v37 = vpack.c.bf16 %v3027_v9, %v3026_v7 }
 0x30d   : > { %v5194_v60 = vpop.permute.xlu1 %2060 }
 0x30e   : > { %v2056_v15 = vpop.permute.xlu0 %2055  ;;  %3621 = vmatpush1.bf16.msra.mxu0 %v3620_v37 }
 0x30f   : > { %3770 = vrot.lane.b32.xlu0 %v3769_v10, %s4299_s8  ;;  %3681 = vmatpush1.bf16.msra.mxu1 %v3620_v37  ;;  %v3031_v10 = vld [vmem:[%s5683_s4 + $0x78] sm:$0xff] }
 0x310   : > { %3622 = vmatprep.subr.bf16.mxu0 %v4298_v47  ;;  %3672 = vmatprep.subr.bf16.mxu1 %v4298_v47  ;;  %v3626_v25 = vpack.c.bf16 %v3031_v10, %v3030_v61 }
 0x311   : > { %v5211_v11 = vpop.permute.xlu1 %2070 }
 0x312   : > { %v5213_v3 = vpop.permute.xlu0 %2065  ;;  %3624 = vmatpush1.bf16.msra.mxu0 %v3623_v5 }
 0x313   : > { %3682 = vmatpush1.bf16.msra.mxu1 %v3623_v5  ;;  %3625 = vmatprep.subr.bf16.mxu0 %v4298_v47  ;;  %v3033_v5 = vld [vmem:[%s5683_s4 + $0x88] sm:$0xff] }
 0x314   : > { %3673 = vmatprep.subr.bf16.mxu1 %v4298_v47  ;;  %v3629_v61 = vpack.c.bf16 %v3033_v5, %v3032_v33 }
 0x315   : > { %v5223_v7 = vpop.permute.xlu1 %2080 }
 0x316   : > { %v5225_v9 = vpop.permute.xlu0 %2075  ;;  %3627 = vmatpush1.bf16.msra.mxu0 %v3626_v25 }
 0x317   : > { %3683 = vmatpush1.bf16.msra.mxu1 %v3626_v25  ;;  %3628 = vmatprep.subr.bf16.mxu0 %v4298_v47  ;;  %v3034_v25 = vld [vmem:[%s5683_s4 + $0x90] sm:$0xff] }
 0x318   : > { %3674 = vmatprep.subr.bf16.mxu1 %v4298_v47  ;;  %v3632_v19 = vpack.c.bf16 %v3035_v38, %v3034_v25  ;;  %v4202_v38 = vld [vmem:[#allocation2 + $0x88] sm:$0xff] }
 0x319   : > { %v5229_v55 = vpop.permute.xlu1 %2090  ;;  %v2390_v25 = vmul.f32 %v4202_v38, %v5099_v31 }
 0x31a   : > { %v5231_v37 = vpop.permute.xlu0 %2085  ;;  %3630 = vmatpush1.bf16.msra.mxu0 %v3629_v61 }
 0x31b   : > { %3684 = vmatpush1.bf16.msra.mxu1 %v3629_v61  ;;  %3631 = vmatprep.subr.bf16.mxu0 %v4298_v47  ;;  %v2517_v61 = vld [vmem:[%s4510_s15 + $0x80] sm:$0xff] }
 0x31c   : > { %3675 = vmatprep.subr.bf16.mxu1 %v4298_v47  ;;  %3585 = vmatprep.mubr.msk.f32.mxu1 %vm2917_vm2, %v2517_v61  ;;  %v3784_v61 = vpack.i.bf16 %v2390_v25, %v2374_v32  ;;  %v4207_v25 = vld [vmem:[#allocation2 + $0x18] sm:$0xff] }
 0x31d   : > { %v5241_v10 = vpop.permute.xlu1 %2100 }
 0x31e   : > { %5759 = vst [vmem:[#allocation49_spill] sm:$0xff] %v5241_v10  ;;  %v5243_v54 = vpop.permute.xlu0 %2095  ;;  %3633 = vmatpush1.bf16.msra.mxu0 %v3632_v19  ;;  %v2501_v10 = vld [vmem:[%s4510_s15] sm:$0xff] }
 0x31f   : > { %5760 = vst [vmem:[#allocation50_spill] sm:$0xff] %v5243_v54  ;;  %3685 = vmatpush1.bf16.msra.mxu1 %v3632_v19  ;;  %3569 = vmatprep.mubr.msk.f32.mxu0 %vm2917_vm2, %v2501_v10  ;;  %v2405_v54 = vmul.f32 %v2056_v15, %v4918_v45  ;;  %v2406_v15 = vmul.f32 %v5194_v60, %v4916_v43  ;;  %v4206_v60 = vld [vmem:[#allocation2 + $0x98] sm:$0xff] }
 0x320   : > { %v2407_v43 = vmul.f32 %v5213_v3, %v4924_v51 }
 0x321   : > { %v5253_v33 = vpop.permute.xlu1 %2110 }
 0x322   : > { %5761 = vst [vmem:[#allocation51_spill] sm:$0xff] %v5253_v33  ;;  %v5255_v5 = vpop.permute.xlu0 %2105 }
 0x323   : > { %5762 = vst [vmem:[#allocation52_spill] sm:$0xff] %v5255_v5 }
 0x325   : > { %v2216_v50 = vpop.permute.xlu1 %2215 }
 0x326   : > { %v2136_v41 = vpop.permute.xlu0 %2135  ;;  %v2437_v19 = vmul.f32 %v2216_v50, %v4931_v16  ;;  %v4204_v16 = vld [vmem:[#allocation2 + $0x90] sm:$0xff] }
 0x327   : > { %v2421_v47 = vmul.f32 %v2136_v41, %v4933_v18 }
 0x329   : > { %v3774_v33 = vpack.i.bf16 %v2421_v47, %v2405_v54  ;;  %v2141_v5 = vpop.permute.xlu1 %2140 }
 0x32a   : > { %v2296_v27 = vpop.permute.xlu0 %2295  ;;  %v2422_v45 = vmul.f32 %v2141_v5, %v4937_v22 }
 0x32b   : > { %v2453_v10 = vmul.f32 %v2296_v27, %v4939_v24  ;;  %3775 = vrot.lane.b32.xlu1 %v3774_v33, %s4300_s21  ;;  %v2391_v24 = vmul.f32 %v4204_v16, %v5112_v53  ;;  %v2392_v33 = vmul.f32 %v4206_v60, %v5109_v44 }
 0x32c   : > { %v3789_v32 = vpack.i.bf16 %v2422_v45, %v2406_v15  ;;  %v4209_v15 = vld [vmem:[#allocation2 + $0x20] sm:$0xff] }
 0x32d   : > { %v3779_v18 = vpack.i.bf16 %v2453_v10, %v2437_v19  ;;  %v2301_v41 = vpop.permute.xlu1 %2300  ;;  %v2376_v19 = vmul.f32 %v4207_v25, %v5029_v17 }
 0x32e   : > { %v2454_v31 = vmul.f32 %v2301_v41, %v4943_v28  ;;  %v2221_v54 = vpop.permute.xlu0 %2220  ;;  %v2375_v28 = vmul.f32 %v4205_v26, %v5019_v4 }
 0x32f   : > { %v2438_v21 = vmul.f32 %v2221_v54, %v4945_v30  ;;  %3785 = vrot.lane.b32.xlu1 %v3784_v61, %s4299_s8  ;;  %3780 = vrot.lane.b32.xlu0 %v3779_v18, %s4301_s16  ;;  %v2408_v18 = vmul.f32 %v5211_v11, %v4922_v49 }
 0x330   : > { %v3799_v53 = vpack.i.bf16 %v2391_v24, %v2375_v28 }
 0x331   : > { %v3794_v22 = vpack.i.bf16 %v2454_v31, %v2438_v21  ;;  %v2226_v50 = vpop.permute.xlu1 %2225  ;;  %v2409_v21 = vmul.f32 %v5225_v9, %v4928_v57 }
 0x332   : > { %v2146_v27 = vpop.permute.xlu0 %2145  ;;  %v2439_v4 = vmul.f32 %v2226_v50, %v4949_v34  ;;  %v4208_v34 = vld [vmem:[#allocation2 + $0xa0] sm:$0xff] }
 0x333   : > { %v2423_v30 = vmul.f32 %v2146_v27, %v4951_v36  ;;  %3790 = vrot.lane.b32.xlu0 %v3789_v32, %s4300_s21  ;;  %3795 = vrot.lane.b32.xlu1 %v3794_v22, %s4301_s16  ;;  %v3814_v36 = vpack.i.bf16 %v2392_v33, %v2376_v19  ;;  %v4211_v22 = vld [vmem:[#allocation2 + $0x28] sm:$0xff] }
 0x334   : > { %v2378_v50 = vmul.f32 %v4211_v22, %v5039_v35 }
 0x335   : > { %v3804_v5 = vpack.i.bf16 %v2423_v30, %v2407_v43  ;;  %v2151_v47 = vpop.permute.xlu1 %2150  ;;  %v4212_v43 = vld [vmem:[#allocation2 + $0x128] sm:$0xff] }
 0x336   : > { %v2306_v38 = vpop.permute.xlu0 %2305  ;;  %v2424_v3 = vmul.f32 %v2151_v47, %v4955_v40  ;;  %v2410_v30 = vmul.f32 %v4212_v43, %v5223_v7  ;;  %v4215_v47 = vld [vmem:[#allocation2 + $0x130] sm:$0xff]  ;;  %v5772_v43 = vld [vmem:[#allocation7_spill] sm:$0xff] }
 0x337   : > { %v2455_v51 = vmul.f32 %v2306_v38, %v4957_v42  ;;  %3800 = vrot.lane.b32.xlu0 %v3799_v53, %s4299_s8  ;;  %3805 = vrot.lane.b32.xlu1 %v3804_v5, %s4300_s21  ;;  %v2393_v42 = vmul.f32 %v4208_v34, %v5122_v46  ;;  %v4214_v5 = vld [vmem:[#allocation2 + $0x30] sm:$0xff]  ;;  %v2411_v38 = vmul.f32 %v4215_v47, %v5231_v37 }
 0x338   : > { %v3819_v41 = vpack.i.bf16 %v2424_v3, %v2408_v18  ;;  %v4218_v18 = vld [vmem:[#allocation2 + $0x138] sm:$0xff] }
 0x339   : > { %v3809_v10 = vpack.i.bf16 %v2455_v51, %v2439_v4  ;;  %v2311_v44 = vpop.permute.xlu1 %2310 }
 0x33a   : > { %v2456_v61 = vmul.f32 %v2311_v44, %v4961_v48  ;;  %v2231_v45 = vpop.permute.xlu0 %2230  ;;  %v2377_v48 = vmul.f32 %v4209_v15, %v5042_v39  ;;  %v5765_v15 = vld [vmem:[#allocation20_spill] sm:$0xff] }
 0x33b   : > { %v2440_v17 = vmul.f32 %v2231_v45, %v4963_v52  ;;  %3815 = vrot.lane.b32.xlu1 %v3814_v36, %s4299_s8  ;;  %3810 = vrot.lane.b32.xlu0 %v3809_v10, %s4301_s16  ;;  %v4210_v52 = vld [vmem:[#allocation2 + $0xa8] sm:$0xff]  ;;  %v4217_v36 = vld [vmem:[#allocation2 + $0x38] sm:$0xff] }
 0x33c   : > { %v2394_v11 = vmul.f32 %v4210_v52, %v5119_v13  ;;  %v3829_v46 = vpack.i.bf16 %v2393_v42, %v2377_v48  ;;  %v2380_v3 = vmul.f32 %v4217_v36, %v5049_v58  ;;  %v5763_v58 = vld [vmem:[#allocation4_spill] sm:$0xff] }
 0x33d   : > { %v3824_v31 = vpack.i.bf16 %v2456_v61, %v2440_v17  ;;  %v2236_v40 = vpop.permute.xlu1 %2235  ;;  %v2412_v17 = vmul.f32 %v4218_v18, %v5229_v55  ;;  %v4221_v48 = vld [vmem:[#allocation2 + $0x140] sm:$0xff]  ;;  %v5767_v55 = vld [vmem:[#allocation6_spill] sm:$0xff] }
 0x33e   : > { %v2156_v54 = vpop.permute.xlu0 %2155  ;;  %v2441_v39 = vmul.f32 %v2236_v40, %v4967_v56  ;;  %v4213_v56 = vld [vmem:[#allocation2 + $0xb0] sm:$0xff]  ;;  %v5777_v36 = vld [vmem:[#allocation24_spill] sm:$0xff] }
 0x33f   : > { %v2425_v49 = vmul.f32 %v2156_v54, %v4969_v59  ;;  %3820 = vrot.lane.b32.xlu0 %v3819_v41, %s4300_s21  ;;  %3825 = vrot.lane.b32.xlu1 %v3824_v31, %s4301_s16  ;;  %v3844_v59 = vpack.i.bf16 %v2394_v11, %v2378_v50  ;;  %v4220_v54 = vld [vmem:[#allocation2 + $0x40] sm:$0xff]  ;;  %v4222_v11 = vld [vmem:[#allocation2 + $0xc8] sm:$0xff] }
 0x341   : > { %v3834_v16 = vpack.i.bf16 %v2425_v49, %v2409_v21  ;;  %v2161_v24 = vpop.permute.xlu1 %2160  ;;  %v5766_v21 = vld [vmem:[#allocation50_spill] sm:$0xff] }
 0x342   : > { %v2316_v32 = vpop.permute.xlu0 %2315  ;;  %v2426_v9 = vmul.f32 %v2161_v24, %v4973_v0  ;;  %v2413_v49 = vmul.f32 %v4221_v48, %v5766_v21 }
 0x343   : > { %v2457_v57 = vmul.f32 %v2316_v32, %v4975_v2  ;;  %3830 = vrot.lane.b32.xlu0 %v3829_v46, %s4299_s8  ;;  %3835 = vrot.lane.b32.xlu1 %v3834_v16, %s4300_s21  ;;  %v2395_v2 = vmul.f32 %v4213_v56, %v5132_v62  ;;  %v5768_v46 = vld [vmem:[#allocation41_spill] sm:$0xff] }
 0x344   : > { %v3849_v60 = vpack.i.bf16 %v2426_v9, %v2410_v30  ;;  %v2398_v16 = vmul.f32 %v4222_v11, %v5768_v46  ;;  %v5770_v9 = vld [vmem:[#allocation5_spill] sm:$0xff]  ;;  %v4230_v11 = vld [vmem:[#allocation2 + $0x158] sm:$0xff] }
 0x345   : > { %v3839_v27 = vpack.i.bf16 %v2457_v57, %v2441_v39  ;;  %v2321_v13 = vpop.permute.xlu1 %2320  ;;  %v4223_v39 = vld [vmem:[#allocation2 + $0x48] sm:$0xff]  ;;  %v5769_v57 = vld [vmem:[#allocation19_spill] sm:$0xff] }
 0x346   : > { %v2458_v26 = vmul.f32 %v2321_v13, %v4979_v6  ;;  %v2241_v28 = vpop.permute.xlu0 %2240  ;;  %v2379_v6 = vmul.f32 %v4214_v5, %v5052_v63  ;;  %v5771_v13 = vld [vmem:[#allocation8_spill] sm:$0xff]  ;;  %v5786_v46 = vld [vmem:[#allocation51_spill] sm:$0xff] }
 0x347   : > { %v2442_v35 = vmul.f32 %v2241_v28, %v4981_v8  ;;  %3845 = vrot.lane.b32.xlu1 %v3844_v59, %s4299_s8  ;;  %3840 = vrot.lane.b32.xlu0 %v3839_v27, %s4301_s16  ;;  %v4216_v8 = vld [vmem:[#allocation2 + $0xb8] sm:$0xff]  ;;  %v2382_v59 = vmul.f32 %v4223_v39, %v5769_v57 }
 0x348   : > { %v2396_v25 = vmul.f32 %v4216_v8, %v5129_v1  ;;  %v3859_v62 = vpack.i.bf16 %v2395_v2, %v2379_v6  ;;  %v5773_v2 = vld [vmem:[#allocation9_spill] sm:$0xff]  ;;  %v5775_v6 = vld [vmem:[#allocation10_spill] sm:$0xff] }
 0x349   : > { %v3854_v33 = vpack.i.bf16 %v2458_v26, %v2442_v35  ;;  %v2246_v0 = vpop.permute.xlu1 %2245  ;;  %v3904_v28 = vpack.i.bf16 %v2398_v16, %v2382_v59  ;;  %v2416_v16 = vmul.f32 %v4230_v11, %v5786_v46 }
 0x34a   : > { %v2166_v53 = vpop.permute.xlu0 %2165  ;;  %v2443_v63 = vmul.f32 %v2246_v0, %v4985_v12  ;;  %v4219_v12 = vld [vmem:[#allocation2 + $0xc0] sm:$0xff]  ;;  %v4224_v0 = vld [vmem:[#allocation2 + $0x148] sm:$0xff] }
 0x34b   : > { %v2427_v7 = vmul.f32 %v2166_v53, %v4987_v14  ;;  %3850 = vrot.lane.b32.xlu0 %v3849_v60, %s4300_s21  ;;  %3855 = vrot.lane.b32.xlu1 %v3854_v33, %s4301_s16  ;;  %v3874_v14 = vpack.i.bf16 %v2396_v25, %v2380_v3  ;;  %v5774_v53 = vld [vmem:[#allocation49_spill] sm:$0xff] }
 0x34c   : > { %v2414_v5 = vmul.f32 %v4224_v0, %v5774_v53 }
 0x34d   : > { %v3864_v19 = vpack.i.bf16 %v2427_v7, %v2411_v38  ;;  %v2171_v4 = vpop.permute.xlu1 %2170  ;;  %v4225_v38 = vld [vmem:[#allocation2 + $0xd0] sm:$0xff]  ;;  %v5776_v7 = vld [vmem:[#allocation44_spill] sm:$0xff] }
 0x34e   : > { %v2326_v51 = vpop.permute.xlu0 %2325  ;;  %v2428_v10 = vmul.f32 %v2171_v4, %v4991_v20  ;;  %v2399_v8 = vmul.f32 %v4225_v38, %v5776_v7  ;;  %v4234_v7 = vld [vmem:[#allocation2 + $0x68] sm:$0xff] }
 0x34f   : > { %v2459_v37 = vmul.f32 %v2326_v51, %v4993_v23  ;;  %3860 = vrot.lane.b32.xlu0 %v3859_v62, %s4299_s8  ;;  %3865 = vrot.lane.b32.xlu1 %v3864_v19, %s4300_s21  ;;  %v5764_v23 = vld [vmem:[#allocation42_spill] sm:$0xff] }
 0x350   : > { %v2397_v42 = vmul.f32 %v4219_v12, %v5764_v23  ;;  %v3879_v41 = vpack.i.bf16 %v2428_v10, %v2412_v17  ;;  %v4226_v51 = vld [vmem:[#allocation2 + $0x50] sm:$0xff]  ;;  %v5779_v10 = vld [vmem:[#allocation12_spill] sm:$0xff]  ;;  %v4229_v12 = vld [vmem:[#allocation2 + $0x58] sm:$0xff] }
 0x351   : > { %v3869_v44 = vpack.i.bf16 %v2459_v37, %v2443_v63  ;;  %v2331_v1 = vpop.permute.xlu1 %2330  ;;  %v2383_v3 = vmul.f32 %v4226_v51, %v5777_v36  ;;  %v4227_v63 = vld [vmem:[#allocation2 + $0x150] sm:$0xff]  ;;  %v5778_v37 = vld [vmem:[#allocation52_spill] sm:$0xff]  ;;  %v5781_v23 = vld [vmem:[#allocation23_spill] sm:$0xff] }
 0x352   : > { %v2460_v61 = vmul.f32 %v2331_v1, %v4997_v29  ;;  %v2251_v45 = vpop.permute.xlu0 %2250  ;;  %v2381_v29 = vmul.f32 %v4220_v54, %v5765_v15  ;;  %v4228_v1 = vld [vmem:[#allocation2 + $0xd8] sm:$0xff]  ;;  %v5784_v15 = vld [vmem:[#allocation13_spill] sm:$0xff] }
 0x353   : > { %v2444_v34 = vmul.f32 %v2251_v45, %v5763_v58  ;;  %3875 = vrot.lane.b32.xlu1 %v3874_v14, %s4299_s8  ;;  %3870 = vrot.lane.b32.xlu0 %v3869_v44, %s4301_s16  ;;  %v2415_v14 = vmul.f32 %v4227_v63, %v5778_v37  ;;  %v3919_v18 = vpack.i.bf16 %v2399_v8, %v2383_v3  ;;  %v5794_v8 = vld [vmem:[#allocation27_spill] sm:$0xff]  ;;  %v5796_v3 = vld [vmem:[#allocation25_spill] sm:$0xff] }
 0x354   : > { %v3889_v24 = vpack.i.bf16 %v2397_v42, %v2381_v29  ;;  %v2384_v42 = vmul.f32 %v4229_v12, %v5781_v23  ;;  %v4236_v12 = vld [vmem:[#allocation2 + $0x70] sm:$0xff]  ;;  %v5800_v23 = vld [vmem:[#allocation32_spill] sm:$0xff] }
 0x355   : > { %v3884_v31 = vpack.i.bf16 %v2460_v61, %v2444_v34  ;;  %v2256_v20 = vpop.permute.xlu1 %2255  ;;  %v5780_v61 = vld [vmem:[#allocation43_spill] sm:$0xff] }
 0x356   : > { %v2176_v40 = vpop.permute.xlu0 %2175  ;;  %v2445_v27 = vmul.f32 %v2256_v20, %v5770_v9  ;;  %v2400_v45 = vmul.f32 %v4228_v1, %v5780_v61  ;;  %v5783_v20 = vld [vmem:[#allocation14_spill] sm:$0xff]  ;;  %v5798_v1 = vld [vmem:[#allocation48_spill] sm:$0xff] }
 0x357   : > { %v2429_v52 = vmul.f32 %v2176_v40, %v5767_v55  ;;  %3880 = vrot.lane.b32.xlu0 %v3879_v41, %s4300_s21  ;;  %3885 = vrot.lane.b32.xlu1 %v3884_v31, %s4301_s16  ;;  %v5782_v41 = vld [vmem:[#allocation11_spill] sm:$0xff] }
 0x358   : > { %v3934_v54 = vpack.i.bf16 %v2400_v45, %v2384_v42  ;;  %v2387_v42 = vmul.f32 %v4236_v12, %v5800_v23  ;;  %v2470_v12 = vld [vmem:[%s4505_s13 + $0x8] sm:$0xff] }
 0x359   : > { %v3894_v32 = vpack.i.bf16 %v2429_v52, %v2413_v49  ;;  %v2181_v22 = vpop.permute.xlu1 %2180  ;;  %v5785_v49 = vld [vmem:[#allocation15_spill] sm:$0xff]  ;;  %v2486_v23 = vld [vmem:[%s4505_s13 + $0x88] sm:$0xff] }
 0x35a   : > { %v2336_v50 = vpop.permute.xlu0 %2335  ;;  %v2430_v30 = vmul.f32 %v2181_v22, %v5772_v43  ;;  %v4231_v22 = vld [vmem:[#allocation2 + $0xe0] sm:$0xff] }
 0x35b   : > { %v2461_v26 = vmul.f32 %v2336_v50, %v5771_v13  ;;  %3890 = vrot.lane.b32.xlu0 %v3889_v24, %s4299_s8  ;;  %3895 = vrot.lane.b32.xlu1 %v3894_v32, %s4300_s21  ;;  %v5787_v24 = vld [vmem:[#allocation16_spill] sm:$0xff]  ;;  %v5788_v50 = vld [vmem:[#allocation46_spill] sm:$0xff] }
 0x35c   : > { %v3909_v25 = vpack.i.bf16 %v2430_v30, %v2414_v5  ;;  %v2401_v39 = vmul.f32 %v4231_v22, %v5788_v50  ;;  %v5790_v43 = vld [vmem:[#allocation28_spill] sm:$0xff]  ;;  %v4238_v50 = vld [vmem:[#allocation2 + $0x78] sm:$0xff] }
 0x35d   : > { %v3899_v35 = vpack.i.bf16 %v2461_v26, %v2445_v27  ;;  %v2341_v56 = vpop.permute.xlu1 %2340  ;;  %v5789_v27 = vld [vmem:[#allocation17_spill] sm:$0xff] }
 0x35e   : > { %v2462_v60 = vmul.f32 %v2341_v56, %v5773_v2  ;;  %v2261_v33 = vpop.permute.xlu0 %2260  ;;  %v4233_v2 = vld [vmem:[#allocation2 + $0xe8] sm:$0xff] }
 0x35f   : > { %v2446_v47 = vmul.f32 %v2261_v33, %v5775_v6  ;;  %3905 = vrot.lane.b32.xlu1 %v3904_v28, %s4299_s8  ;;  %3900 = vrot.lane.b32.xlu0 %v3899_v35, %s4301_s16  ;;  %v4232_v28 = vld [vmem:[#allocation2 + $0x60] sm:$0xff]  ;;  %v5791_v35 = vld [vmem:[#allocation18_spill] sm:$0xff]  ;;  %v5793_v6 = vld [vmem:[#allocation21_spill] sm:$0xff] }
 0x360   : > { %v2385_v30 = vmul.f32 %v4232_v28, %v5790_v43  ;;  %v5808_v28 = vld [vmem:[#allocation37_spill] sm:$0xff] }
 0x361   : > { %v3914_v62 = vpack.i.bf16 %v2462_v60, %v2446_v47  ;;  %v2266_v19 = vpop.permute.xlu1 %2265  ;;  %v5792_v60 = vld [vmem:[#allocation45_spill] sm:$0xff] }
 0x362   : > { %v2186_v4 = vpop.permute.xlu0 %2185  ;;  %v2447_v31 = vmul.f32 %v2266_v19, %v5782_v41  ;;  %v2402_v33 = vmul.f32 %v4233_v2, %v5792_v60  ;;  %v3949_v0 = vpack.i.bf16 %v2401_v39, %v2385_v30  ;;  %v5801_v41 = vld [vmem:[#allocation30_spill] sm:$0xff]  ;;  %v5806_v39 = vld [vmem:[#allocation31_spill] sm:$0xff] }
 0x363   : > { %v2431_v44 = vmul.f32 %v2186_v4, %v5779_v10  ;;  %3910 = vrot.lane.b32.xlu0 %v3909_v25, %s4300_s21  ;;  %3915 = vrot.lane.b32.xlu1 %v3914_v62, %s4301_s16  ;;  %v2386_v25 = vmul.f32 %v4234_v7, %v5794_v8  ;;  %v5795_v62 = vld [vmem:[#allocation22_spill] sm:$0xff] }
 0x365   : > { %v3924_v17 = vpack.i.bf16 %v2431_v44, %v2415_v14  ;;  %v2191_v58 = vpop.permute.xlu1 %2190  ;;  %v3964_v4 = vpack.i.bf16 %v2402_v33, %v2386_v25  ;;  %v5797_v14 = vld [vmem:[#allocation26_spill] sm:$0xff]  ;;  %v5810_v33 = vld [vmem:[#allocation39_spill] sm:$0xff] }
 0x366   : > { %v2346_v34 = vpop.permute.xlu0 %2345  ;;  %v2432_v29 = vmul.f32 %v2191_v58, %v5784_v15  ;;  %v4235_v44 = vld [vmem:[#allocation2 + $0xf0] sm:$0xff]  ;;  %v5802_v15 = vld [vmem:[#allocation33_spill] sm:$0xff] }
 0x367   : > { %v2463_v40 = vmul.f32 %v2346_v34, %v5783_v20  ;;  %3920 = vrot.lane.b32.xlu0 %v3919_v18, %s4299_s8  ;;  %3925 = vrot.lane.b32.xlu1 %v3924_v17, %s4300_s21  ;;  %v2403_v61 = vmul.f32 %v4235_v44, %v5798_v1  ;;  %v5799_v17 = vld [vmem:[#allocation29_spill] sm:$0xff] }
 0x368   : > { %v3939_v57 = vpack.i.bf16 %v2432_v29, %v2416_v16 }
 0x369   : > { %v3929_v48 = vpack.i.bf16 %v2463_v40, %v2447_v31  ;;  %v2351_v21 = vpop.permute.xlu1 %2350  ;;  %v3979_v20 = vpack.i.bf16 %v2403_v61, %v2387_v42 }
 0x36a   : > { %v2464_v55 = vmul.f32 %v2351_v21, %v5785_v49  ;;  %v2271_v52 = vpop.permute.xlu0 %2270  ;;  %v5803_v21 = vld [vmem:[#allocation34_spill] sm:$0xff] }
 0x36b   : > { %v2448_v32 = vmul.f32 %v2271_v52, %v5787_v24  ;;  %3935 = vrot.lane.b32.xlu1 %v3934_v54, %s4299_s8  ;;  %3930 = vrot.lane.b32.xlu0 %v3929_v48, %s4301_s16  ;;  %v5804_v52 = vld [vmem:[#allocation47_spill] sm:$0xff] }
 0x36c   : > { %v5805_v24 = vld [vmem:[#allocation35_spill] sm:$0xff] }
 0x36d   : > { %v3944_v59 = vpack.i.bf16 %v2464_v55, %v2448_v32  ;;  %v2196_v9 = vpop.permute.xlu1 %2195  ;;  %v4237_v55 = vld [vmem:[#allocation2 + $0xf8] sm:$0xff] }
 0x36e   : > { %v2433_v13 = vmul.f32 %v2196_v9, %v5789_v27  ;;  %v2116_v26 = vpop.permute.xlu0 %2115  ;;  %v2404_v11 = vmul.f32 %v4237_v55, %v5804_v52  ;;  %v2519_v55 = vld [vmem:[%s4510_s15 + $0x90] sm:$0xff] }
 0x36f   : > { %v2417_v56 = vmul.f32 %v2116_v26, %v5791_v35  ;;  %3940 = vrot.lane.b32.xlu0 %v3939_v57, %s4300_s21  ;;  %3945 = vrot.lane.b32.xlu1 %v3944_v59, %s4301_s16  ;;  %v2388_v57 = vmul.f32 %v4238_v50, %v5806_v39  ;;  %v5807_v59 = vld [vmem:[#allocation36_spill] sm:$0xff]  ;;  %v5809_v35 = vld [vmem:[#allocation38_spill] sm:$0xff] }
 0x371   : > { %v3954_v53 = vpack.i.bf16 %v2433_v13, %v2417_v56  ;;  %v2356_v5 = vpop.permute.xlu1 %2355  ;;  %v3994_v27 = vpack.i.bf16 %v2404_v11, %v2388_v57 }
 0x372   : > { %v2465_v47 = vmul.f32 %v2356_v5, %v5793_v6  ;;  %v2276_v38 = vpop.permute.xlu0 %2275  ;;  %v5811_v5 = vld [vmem:[#allocation40_spill] sm:$0xff] }
 0x373   : > { %v2449_v19 = vmul.f32 %v2276_v38, %v5795_v62  ;;  %3950 = vrot.lane.b32.xlu0 %v3949_v0, %s4299_s8  ;;  %3955 = vrot.lane.b32.xlu1 %v3954_v53, %s4300_s21 }
 0x375   : > { %v3959_v51 = vpack.i.bf16 %v2465_v47, %v2449_v19  ;;  %v2201_v36 = vpop.permute.xlu1 %2200 }
 0x376   : > { %v2434_v63 = vmul.f32 %v2201_v36, %v5796_v3  ;;  %v2121_v37 = vpop.permute.xlu0 %2120 }
 0x377   : > { %v2418_v10 = vmul.f32 %v2121_v37, %v5797_v14  ;;  %3965 = vrot.lane.b32.xlu1 %v3964_v4, %s4299_s8  ;;  %3960 = vrot.lane.b32.xlu0 %v3959_v51, %s4301_s16  ;;  %v2469_v4 = vld [vmem:[%s4505_s13] sm:$0xff] }
 0x378   : > { %v2485_v51 = vld [vmem:[%s4505_s13 + $0x80] sm:$0xff] }
 0x379   : > { %v3969_v45 = vpack.i.bf16 %v2434_v63, %v2418_v10  ;;  %v2361_v18 = vpop.permute.xlu1 %2360 }
 0x37a   : > { %v2466_v58 = vmul.f32 %v2361_v18, %v5799_v17  ;;  %v2281_v34 = vpop.permute.xlu0 %2280  ;;  %v2502_v18 = vld [vmem:[%s4510_s15 + $0x8] sm:$0xff] }
 0x37b   : > { %v2450_v31 = vmul.f32 %v2281_v34, %v5801_v41  ;;  %3970 = vrot.lane.b32.xlu0 %v3969_v45, %s4300_s21  ;;  %v2518_v17 = vld [vmem:[%s4510_s15 + $0x88] sm:$0xff] }
 0x37d   : > { %v3974_v40 = vpack.i.bf16 %v2466_v58, %v2450_v31  ;;  %v2206_v54 = vpop.permute.xlu1 %2205 }
 0x37e   : > { %v2435_v29 = vmul.f32 %v2206_v54, %v5802_v15  ;;  %v2126_v48 = vpop.permute.xlu0 %2125 }
 0x37f   : > { %v2419_v49 = vmul.f32 %v2126_v48, %v5803_v21  ;;  %3980 = vrot.lane.b32.xlu0 %v3979_v20, %s4299_s8  ;;  %3975 = vrot.lane.b32.xlu1 %v3974_v40, %s4301_s16 }
 0x381   : > { %v3984_v46 = vpack.i.bf16 %v2435_v29, %v2419_v49  ;;  %v2366_v16 = vpop.permute.xlu1 %2365  ;;  %v2503_v49 = vld [vmem:[%s4510_s15 + $0x10] sm:$0xff] }
 0x382   : > { %v2467_v32 = vmul.f32 %v2366_v16, %v5805_v24  ;;  %v2286_v22 = vpop.permute.xlu0 %2285  ;;  %v2471_v24 = vld [vmem:[%s4505_s13 + $0x10] sm:$0xff] }
 0x383   : > { %v2451_v9 = vmul.f32 %v2286_v22, %v5807_v59  ;;  %3985 = vrot.lane.b32.xlu1 %v3984_v46, %s4300_s21 }
 0x385   : > { %v3989_v13 = vpack.i.bf16 %v2467_v32, %v2451_v9  ;;  %v2211_v26 = vpop.permute.xlu1 %2210  ;;  %v2487_v32 = vld [vmem:[%s4505_s13 + $0x90] sm:$0xff] }
 0x386   : > { %v2436_v43 = vmul.f32 %v2211_v26, %v5808_v28  ;;  %v2131_v30 = vpop.permute.xlu0 %2130 }
 0x387   : > { %v2420_v56 = vmul.f32 %v2131_v30, %v5809_v35  ;;  %3995 = vrot.lane.b32.xlu1 %v3994_v27, %s4299_s8  ;;  %3990 = vrot.lane.b32.xlu0 %v3989_v13, %s4301_s16 }
 0x389   : > { %v3999_v2 = vpack.i.bf16 %v2436_v43, %v2420_v56  ;;  %v2371_v60 = vpop.permute.xlu1 %2370 }
 0x38a   : > { %v2468_v0 = vmul.f32 %v2371_v60, %v5810_v33  ;;  %v2291_v53 = vpop.permute.xlu0 %2290  ;;  %v2520_v60 = vld [vmem:[%s4510_s15 + $0x98] sm:$0xff] }
 0x38b   : > { %v2452_v6 = vmul.f32 %v2291_v53, %v5811_v5  ;;  %4000 = vrot.lane.b32.xlu0 %v3999_v2, %s4300_s21  ;;  %v2504_v2 = vld [vmem:[%s4510_s15 + $0x18] sm:$0xff] }
 0x38c   : > { %v2472_v53 = vld [vmem:[%s4505_s13 + $0x18] sm:$0xff] }
 0x38d   : > { %v4004_v47 = vpack.i.bf16 %v2468_v0, %v2452_v6  ;;  %v2488_v5 = vld [vmem:[%s4505_s13 + $0x98] sm:$0xff] }
 0x38e   : > { %v3771_v38 = vpop.permute.xlu0 %3770 }
 0x38f   : > { %4005 = vrot.lane.b32.xlu1 %v4004_v47, %s4301_s16  ;;  %v3773_v8 = vunpack.i.h.bf16 %v3771_v38  ;;  %v3772_v25 = vunpack.i.l.bf16 %v3771_v38 }
 0x391   : > { %v2918_v14 = vsel %vm2917_vm2, %v2469_v4, %v3772_v25  ;;  %v2934_v10 = vsel %vm2917_vm2, %v2485_v51, %v3773_v8 }
 0x39d   : > { %v3776_v7 = vpop.permute.xlu1 %3775 }
 0x39e   : > { %v3778_v62 = vunpack.i.h.bf16 %v3776_v7  ;;  %v3777_v19 = vunpack.i.l.bf16 %v3776_v7 }
 0x3a0   : > { %v2951_v61 = vsel %vm2950_vm3, %v2918_v14, %v3777_v19  ;;  %v2967_v45 = vsel %vm2950_vm3, %v2934_v10, %v3778_v62 }
 0x3a1   : > { %v3786_v36 = vpop.permute.xlu1 %3785  ;;  %v3781_v3 = vpop.permute.xlu0 %3780 }
 0x3a2   : > { %v3783_v63 = vunpack.i.h.bf16 %v3781_v3  ;;  %v3782_v37 = vunpack.i.l.bf16 %v3781_v3  ;;  %v3788_v44 = vunpack.i.h.bf16 %v3786_v36  ;;  %v3787_v1 = vunpack.i.l.bf16 %v3786_v36  ;;  %v2505_v36 = vld [vmem:[%s4510_s15 + $0x20] sm:$0xff] }
 0x3a3   : > { %v2521_v3 = vld [vmem:[%s4510_s15 + $0xa0] sm:$0xff] }
 0x3a4   : > { %v2984_v58 = vsel %vm2983_vm4, %v2951_v61, %v3782_v37  ;;  %v3000_v34 = vsel %vm2983_vm4, %v2967_v45, %v3783_v63  ;;  %v2919_v15 = vsel %vm2917_vm2, %v2470_v12, %v3787_v1  ;;  %v2935_v29 = vsel %vm2917_vm2, %v2486_v23, %v3788_v44  ;;  %v2473_v44 = vld [vmem:[%s4505_s13 + $0x20] sm:$0xff] }
 0x3a5   : > { %v3796_v42 = vpop.permute.xlu1 %3795  ;;  %v3791_v41 = vpop.permute.xlu0 %3790  ;;  %3197 = vmatmul.mubr.f32.vlgmr.msra.gmra.mrb[0].mxu0 %v2984_v58  ;;  %3277 = vmatmul.mubr.f32.vlgmr.msra.gmra.mrb[0].mxu1 %v3000_v34  ;;  %v2489_v1 = vld [vmem:[%s4505_s13 + $0xa0] sm:$0xff] }
 0x3a6   : > { %v3798_v31 = vunpack.i.h.bf16 %v3796_v42  ;;  %v3797_v20 = vunpack.i.l.bf16 %v3796_v42  ;;  %v3793_v40 = vunpack.i.h.bf16 %v3791_v41  ;;  %v3792_v54 = vunpack.i.l.bf16 %v3791_v41  ;;  %3570 = vmatprep.mubr.msk.f32.mxu0 %vm2917_vm2, %v2502_v18  ;;  %3586 = vmatprep.mubr.msk.f32.mxu1 %vm2917_vm2, %v2518_v17 }
 0x3a8   : > { %v2952_v48 = vsel %vm2950_vm3, %v2919_v15, %v3792_v54  ;;  %v2968_v21 = vsel %vm2950_vm3, %v2935_v29, %v3793_v40  ;;  %v2506_v15 = vld [vmem:[%s4510_s15 + $0x28] sm:$0xff] }
 0x3a9   : > { %v3806_v52 = vpop.permute.xlu1 %3805  ;;  %v3801_v11 = vpop.permute.xlu0 %3800  ;;  %v2985_v46 = vsel %vm2983_vm4, %v2952_v48, %v3797_v20  ;;  %v3001_v16 = vsel %vm2983_vm4, %v2968_v21, %v3798_v31  ;;  %v2522_v29 = vld [vmem:[%s4510_s15 + $0xa8] sm:$0xff] }
 0x3aa   : > { %v3803_v22 = vunpack.i.h.bf16 %v3801_v11  ;;  %v3802_v50 = vunpack.i.l.bf16 %v3801_v11  ;;  %3202 = vmatmul.mubr.f32.gmra.mrb[2].mxu0 %v2985_v46  ;;  %3282 = vmatmul.mubr.f32.gmra.mrb[2].mxu1 %v3001_v16  ;;  %v3808_v39 = vunpack.i.h.bf16 %v3806_v52  ;;  %v3807_v57 = vunpack.i.l.bf16 %v3806_v52 }
 0x3ab   : > { %3571 = vmatprep.mubr.msk.f32.mxu0 %vm2917_vm2, %v2503_v49  ;;  %3587 = vmatprep.mubr.msk.f32.mxu1 %vm2917_vm2, %v2519_v55  ;;  %v2474_v49 = vld [vmem:[%s4505_s13 + $0x28] sm:$0xff] }
 0x3ac   : > { %v2920_v59 = vsel %vm2917_vm2, %v2471_v24, %v3802_v50  ;;  %v2936_v9 = vsel %vm2917_vm2, %v2487_v32, %v3803_v22  ;;  %v2490_v55 = vld [vmem:[%s4505_s13 + $0xa8] sm:$0xff] }
 0x3ad   : > { %v3816_v27 = vpop.permute.xlu1 %3815  ;;  %v3811_v13 = vpop.permute.xlu0 %3810  ;;  %v2953_v35 = vsel %vm2950_vm3, %v2920_v59, %v3807_v57  ;;  %v2969_v56 = vsel %vm2950_vm3, %v2936_v9, %v3808_v39  ;;  %v2507_v59 = vld [vmem:[%s4510_s15 + $0x30] sm:$0xff] }
 0x3ae   : > { %v3813_v26 = vunpack.i.h.bf16 %v3811_v13  ;;  %v3812_v28 = vunpack.i.l.bf16 %v3811_v13  ;;  %v3818_v43 = vunpack.i.h.bf16 %v3816_v27  ;;  %v3817_v30 = vunpack.i.l.bf16 %v3816_v27  ;;  %v2523_v9 = vld [vmem:[%s4510_s15 + $0xb0] sm:$0xff] }
 0x3b0   : > { %v2986_v33 = vsel %vm2983_vm4, %v2953_v35, %v3812_v28  ;;  %v3002_v0 = vsel %vm2983_vm4, %v2969_v56, %v3813_v26  ;;  %v2921_v62 = vsel %vm2917_vm2, %v2472_v53, %v3817_v30  ;;  %v2937_v19 = vsel %vm2917_vm2, %v2488_v5, %v3818_v43  ;;  %v2475_v43 = vld [vmem:[%s4505_s13 + $0x30] sm:$0xff] }
 0x3b1   : > { %v3826_v6 = vpop.permute.xlu1 %3825  ;;  %v3821_v47 = vpop.permute.xlu0 %3820  ;;  %3207 = vmatmul.mubr.f32.gmra.mrb[4].mxu0 %v2986_v33  ;;  %3287 = vmatmul.mubr.f32.gmra.mrb[4].mxu1 %v3002_v0  ;;  %v2491_v30 = vld [vmem:[%s4505_s13 + $0xb0] sm:$0xff] }
 0x3b2   : > { %v3828_v38 = vunpack.i.h.bf16 %v3826_v6  ;;  %v3827_v7 = vunpack.i.l.bf16 %v3826_v6  ;;  %v3823_v8 = vunpack.i.h.bf16 %v3821_v47  ;;  %v3822_v25 = vunpack.i.l.bf16 %v3821_v47  ;;  %3572 = vmatprep.mubr.msk.f32.mxu0 %vm2917_vm2, %v2504_v2  ;;  %3588 = vmatprep.mubr.msk.f32.mxu1 %vm2917_vm2, %v2520_v60 }
 0x3b4   : > { %v2954_v4 = vsel %vm2950_vm3, %v2921_v62, %v3822_v25  ;;  %v2970_v51 = vsel %vm2950_vm3, %v2937_v19, %v3823_v8  ;;  %v2508_v62 = vld [vmem:[%s4510_s15 + $0x38] sm:$0xff] }
 0x3b5   : > { %v3836_v63 = vpop.permute.xlu1 %3835  ;;  %v3831_v37 = vpop.permute.xlu0 %3830  ;;  %v2987_v14 = vsel %vm2983_vm4, %v2954_v4, %v3827_v7  ;;  %v3003_v10 = vsel %vm2983_vm4, %v2970_v51, %v3828_v38  ;;  %v2524_v19 = vld [vmem:[%s4510_s15 + $0xb8] sm:$0xff] }
 0x3b6   : > { %v3833_v61 = vunpack.i.h.bf16 %v3831_v37  ;;  %v3832_v45 = vunpack.i.l.bf16 %v3831_v37  ;;  %3212 = vmatmul.mubr.f32.gmra.mrb[6].mxu0 %v2987_v14  ;;  %3292 = vmatmul.mubr.f32.gmra.mrb[6].mxu1 %v3003_v10  ;;  %v3838_v18 = vunpack.i.h.bf16 %v3836_v63  ;;  %v3837_v17 = vunpack.i.l.bf16 %v3836_v63 }
 0x3b7   : > { %3573 = vmatprep.mubr.msk.f32.mxu0 %vm2917_vm2, %v2505_v36  ;;  %3589 = vmatprep.mubr.msk.f32.mxu1 %vm2917_vm2, %v2521_v3  ;;  %v2476_v36 = vld [vmem:[%s4505_s13 + $0x38] sm:$0xff] }
 0x3b8   : > { %v2922_v58 = vsel %vm2917_vm2, %v2473_v44, %v3832_v45  ;;  %v2938_v34 = vsel %vm2917_vm2, %v2489_v1, %v3833_v61  ;;  %v2492_v3 = vld [vmem:[%s4505_s13 + $0xb8] sm:$0xff] }
 0x3b9   : > { %v3846_v12 = vpop.permute.xlu1 %3845  ;;  %v3841_v23 = vpop.permute.xlu0 %3840  ;;  %v2955_v40 = vsel %vm2950_vm3, %v2922_v58, %v3837_v17  ;;  %v2971_v54 = vsel %vm2950_vm3, %v2938_v34, %v3838_v18  ;;  %v2509_v58 = vld [vmem:[%s4510_s15 + $0x40] sm:$0xff] }
 0x3ba   : > { %v3843_v42 = vunpack.i.h.bf16 %v3841_v23  ;;  %v3842_v41 = vunpack.i.l.bf16 %v3841_v23  ;;  %v3848_v31 = vunpack.i.h.bf16 %v3846_v12  ;;  %v3847_v20 = vunpack.i.l.bf16 %v3846_v12  ;;  %v2525_v34 = vld [vmem:[%s4510_s15 + $0xc0] sm:$0xff] }
 0x3bc   : > { %v2988_v48 = vsel %vm2983_vm4, %v2955_v40, %v3842_v41  ;;  %v3004_v21 = vsel %vm2983_vm4, %v2971_v54, %v3843_v42  ;;  %v2923_v22 = vsel %vm2917_vm2, %v2474_v49, %v3847_v20  ;;  %v2939_v50 = vsel %vm2917_vm2, %v2490_v55, %v3848_v31  ;;  %v2477_v31 = vld [vmem:[%s4505_s13 + $0x40] sm:$0xff] }
 0x3bd   : > { %v3856_v52 = vpop.permute.xlu1 %3855  ;;  %v3851_v11 = vpop.permute.xlu0 %3850  ;;  %3217 = vmatmul.mubr.f32.gmra.mrb[8].mxu0 %v2988_v48  ;;  %3297 = vmatmul.mubr.f32.gmra.mrb[8].mxu1 %v3004_v21  ;;  %v2493_v20 = vld [vmem:[%s4505_s13 + $0xc0] sm:$0xff] }
 0x3be   : > { %v3858_v46 = vunpack.i.h.bf16 %v3856_v52  ;;  %v3857_v16 = vunpack.i.l.bf16 %v3856_v52  ;;  %v3853_v24 = vunpack.i.h.bf16 %v3851_v11  ;;  %v3852_v32 = vunpack.i.l.bf16 %v3851_v11  ;;  %3574 = vmatprep.mubr.msk.f32.mxu0 %vm2917_vm2, %v2506_v15  ;;  %3590 = vmatprep.mubr.msk.f32.mxu1 %vm2917_vm2, %v2522_v29 }
 0x3c0   : > { %v2956_v39 = vsel %vm2950_vm3, %v2923_v22, %v3852_v32  ;;  %v2972_v57 = vsel %vm2950_vm3, %v2939_v50, %v3853_v24  ;;  %v2510_v22 = vld [vmem:[%s4510_s15 + $0x48] sm:$0xff] }
 0x3c1   : > { %v3866_v27 = vpop.permute.xlu1 %3865  ;;  %v3861_v13 = vpop.permute.xlu0 %3860  ;;  %v2989_v26 = vsel %vm2983_vm4, %v2956_v39, %v3857_v16  ;;  %v3005_v28 = vsel %vm2983_vm4, %v2972_v57, %v3858_v46  ;;  %v2526_v50 = vld [vmem:[%s4510_s15 + $0xc8] sm:$0xff] }
 0x3c2   : > { %v3863_v35 = vunpack.i.h.bf16 %v3861_v13  ;;  %v3862_v56 = vunpack.i.l.bf16 %v3861_v13  ;;  %3222 = vmatmul.mubr.f32.gmra.mrb[10].mxu0 %v2989_v26  ;;  %3302 = vmatmul.mubr.f32.gmra.mrb[10].mxu1 %v3005_v28  ;;  %v3868_v2 = vunpack.i.h.bf16 %v3866_v27  ;;  %v3867_v60 = vunpack.i.l.bf16 %v3866_v27 }
 0x3c3   : > { %3575 = vmatprep.mubr.msk.f32.mxu0 %vm2917_vm2, %v2507_v59  ;;  %3591 = vmatprep.mubr.msk.f32.mxu1 %vm2917_vm2, %v2523_v9  ;;  %v2478_v59 = vld [vmem:[%s4505_s13 + $0x48] sm:$0xff] }
 0x3c4   : > { %v2924_v33 = vsel %vm2917_vm2, %v2475_v43, %v3862_v56  ;;  %v2940_v0 = vsel %vm2917_vm2, %v2491_v30, %v3863_v35  ;;  %v2494_v9 = vld [vmem:[%s4505_s13 + $0xc8] sm:$0xff] }
 0x3c5   : > { %v3876_v53 = vpop.permute.xlu1 %3875  ;;  %v3871_v5 = vpop.permute.xlu0 %3870  ;;  %v2957_v8 = vsel %vm2950_vm3, %v2924_v33, %v3867_v60  ;;  %v2973_v25 = vsel %vm2950_vm3, %v2940_v0, %v3868_v2  ;;  %v2511_v33 = vld [vmem:[%s4510_s15 + $0x50] sm:$0xff] }
 0x3c6   : > { %v3873_v6 = vunpack.i.h.bf16 %v3871_v5  ;;  %v3872_v47 = vunpack.i.l.bf16 %v3871_v5  ;;  %v3878_v38 = vunpack.i.h.bf16 %v3876_v53  ;;  %v3877_v7 = vunpack.i.l.bf16 %v3876_v53  ;;  %v2527_v0 = vld [vmem:[%s4510_s15 + $0xd0] sm:$0xff] }
 0x3c8   : > { %v2990_v4 = vsel %vm2983_vm4, %v2957_v8, %v3872_v47  ;;  %v3006_v51 = vsel %vm2983_vm4, %v2973_v25, %v3873_v6  ;;  %v2925_v61 = vsel %vm2917_vm2, %v2476_v36, %v3877_v7  ;;  %v2941_v45 = vsel %vm2917_vm2, %v2492_v3, %v3878_v38  ;;  %v2479_v38 = vld [vmem:[%s4505_s13 + $0x50] sm:$0xff] }
 0x3c9   : > { %v3886_v63 = vpop.permute.xlu1 %3885  ;;  %v3881_v37 = vpop.permute.xlu0 %3880  ;;  %3227 = vmatmul.mubr.f32.gmra.mrb[12].mxu0 %v2990_v4  ;;  %3307 = vmatmul.mubr.f32.gmra.mrb[12].mxu1 %v3006_v51  ;;  %v2495_v7 = vld [vmem:[%s4505_s13 + $0xd0] sm:$0xff] }
 0x3ca   : > { %v3888_v14 = vunpack.i.h.bf16 %v3886_v63  ;;  %v3887_v10 = vunpack.i.l.bf16 %v3886_v63  ;;  %v3883_v44 = vunpack.i.h.bf16 %v3881_v37  ;;  %v3882_v1 = vunpack.i.l.bf16 %v3881_v37  ;;  %3576 = vmatprep.mubr.msk.f32.mxu0 %vm2917_vm2, %v2508_v62  ;;  %3592 = vmatprep.mubr.msk.f32.mxu1 %vm2917_vm2, %v2524_v19 }
 0x3cc   : > { %v2958_v18 = vsel %vm2950_vm3, %v2925_v61, %v3882_v1  ;;  %v2974_v17 = vsel %vm2950_vm3, %v2941_v45, %v3883_v44  ;;  %v2512_v61 = vld [vmem:[%s4510_s15 + $0x58] sm:$0xff] }
 0x3cd   : > { %v3896_v12 = vpop.permute.xlu1 %3895  ;;  %v3891_v23 = vpop.permute.xlu0 %3890  ;;  %v2991_v42 = vsel %vm2983_vm4, %v2958_v18, %v3887_v10  ;;  %v3007_v41 = vsel %vm2983_vm4, %v2974_v17, %v3888_v14  ;;  %v2528_v45 = vld [vmem:[%s4510_s15 + $0xd8] sm:$0xff] }
 0x3ce   : > { %v3893_v40 = vunpack.i.h.bf16 %v3891_v23  ;;  %v3892_v54 = vunpack.i.l.bf16 %v3891_v23  ;;  %3232 = vmatmul.mubr.f32.gmra.mrb[14].mxu0 %v2991_v42  ;;  %3312 = vmatmul.mubr.f32.gmra.mrb[14].mxu1 %v3007_v41  ;;  %v3898_v15 = vunpack.i.h.bf16 %v3896_v12  ;;  %v3897_v29 = vunpack.i.l.bf16 %v3896_v12 }
 0x3cf   : > { %3577 = vmatprep.mubr.msk.f32.mxu0 %vm2917_vm2, %v2509_v58  ;;  %3593 = vmatprep.mubr.msk.f32.mxu1 %vm2917_vm2, %v2525_v34  ;;  %v2480_v58 = vld [vmem:[%s4505_s13 + $0x58] sm:$0xff] }
 0x3d0   : > { %v2926_v48 = vsel %vm2917_vm2, %v2477_v31, %v3892_v54  ;;  %v2942_v21 = vsel %vm2917_vm2, %v2493_v20, %v3893_v40  ;;  %v2496_v34 = vld [vmem:[%s4505_s13 + $0xd8] sm:$0xff] }
 0x3d1   : > { %v3906_v49 = vpop.permute.xlu1 %3905  ;;  %v3901_v55 = vpop.permute.xlu0 %3900  ;;  %v2959_v24 = vsel %vm2950_vm3, %v2926_v48, %v3897_v29  ;;  %v2975_v32 = vsel %vm2950_vm3, %v2942_v21, %v3898_v15  ;;  %v2513_v48 = vld [vmem:[%s4510_s15 + $0x60] sm:$0xff] }
 0x3d2   : > { %v3903_v52 = vunpack.i.h.bf16 %v3901_v55  ;;  %v3902_v11 = vunpack.i.l.bf16 %v3901_v55  ;;  %v3908_v46 = vunpack.i.h.bf16 %v3906_v49  ;;  %v3907_v16 = vunpack.i.l.bf16 %v3906_v49  ;;  %v2529_v21 = vld [vmem:[%s4510_s15 + $0xe0] sm:$0xff] }
 0x3d4   : > { %v2992_v39 = vsel %vm2983_vm4, %v2959_v24, %v3902_v11  ;;  %v3008_v57 = vsel %vm2983_vm4, %v2975_v32, %v3903_v52  ;;  %v2927_v35 = vsel %vm2917_vm2, %v2478_v59, %v3907_v16  ;;  %v2943_v56 = vsel %vm2917_vm2, %v2494_v9, %v3908_v46  ;;  %v2481_v46 = vld [vmem:[%s4505_s13 + $0x60] sm:$0xff] }
 0x3d5   : > { %v3916_v27 = vpop.permute.xlu1 %3915  ;;  %v3911_v13 = vpop.permute.xlu0 %3910  ;;  %3237 = vmatmul.mubr.f32.gmra.mrb[16].mxu0 %v2992_v39  ;;  %3317 = vmatmul.mubr.f32.gmra.mrb[16].mxu1 %v3008_v57  ;;  %v2497_v16 = vld [vmem:[%s4505_s13 + $0xe0] sm:$0xff] }
 0x3d6   : > { %v3918_v26 = vunpack.i.h.bf16 %v3916_v27  ;;  %v3917_v28 = vunpack.i.l.bf16 %v3916_v27  ;;  %v3913_v43 = vunpack.i.h.bf16 %v3911_v13  ;;  %v3912_v30 = vunpack.i.l.bf16 %v3911_v13  ;;  %3578 = vmatprep.mubr.msk.f32.mxu0 %vm2917_vm2, %v2510_v22  ;;  %3594 = vmatprep.mubr.msk.f32.mxu1 %vm2917_vm2, %v2526_v50 }
 0x3d8   : > { %v2960_v2 = vsel %vm2950_vm3, %v2927_v35, %v3912_v30  ;;  %v2976_v60 = vsel %vm2950_vm3, %v2943_v56, %v3913_v43  ;;  %v2514_v43 = vld [vmem:[%s4510_s15 + $0x68] sm:$0xff] }
 0x3d9   : > { %v3926_v53 = vpop.permute.xlu1 %3925  ;;  %v3921_v5 = vpop.permute.xlu0 %3920  ;;  %v2993_v6 = vsel %vm2983_vm4, %v2960_v2, %v3917_v28  ;;  %v3009_v47 = vsel %vm2983_vm4, %v2976_v60, %v3918_v26  ;;  %v2530_v30 = vld [vmem:[%s4510_s15 + $0xe8] sm:$0xff] }
 0x3da   : > { %v3923_v8 = vunpack.i.h.bf16 %v3921_v5  ;;  %v3922_v25 = vunpack.i.l.bf16 %v3921_v5  ;;  %3242 = vmatmul.mubr.f32.gmra.mrb[18].mxu0 %v2993_v6  ;;  %3322 = vmatmul.mubr.f32.gmra.mrb[18].mxu1 %v3009_v47  ;;  %v3928_v62 = vunpack.i.h.bf16 %v3926_v53  ;;  %v3927_v19 = vunpack.i.l.bf16 %v3926_v53  ;;  %v2482_v5 = vld [vmem:[%s4505_s13 + $0x68] sm:$0xff] }
 0x3db   : > { %3579 = vmatprep.mubr.msk.f32.mxu0 %vm2917_vm2, %v2511_v33  ;;  %3595 = vmatprep.mubr.msk.f32.mxu1 %vm2917_vm2, %v2527_v0  ;;  %v2498_v6 = vld [vmem:[%s4505_s13 + $0xe8] sm:$0xff] }
 0x3dc   : > { %v2928_v4 = vsel %vm2917_vm2, %v2479_v38, %v3922_v25  ;;  %v2944_v51 = vsel %vm2917_vm2, %v2495_v7, %v3923_v8 }
 0x3dd   : > { %v3936_v36 = vpop.permute.xlu1 %3935  ;;  %v3931_v3 = vpop.permute.xlu0 %3930  ;;  %v2961_v44 = vsel %vm2950_vm3, %v2928_v4, %v3927_v19  ;;  %v2977_v1 = vsel %vm2950_vm3, %v2944_v51, %v3928_v62  ;;  %v2515_v51 = vld [vmem:[%s4510_s15 + $0x70] sm:$0xff] }
 0x3de   : > { %v3933_v63 = vunpack.i.h.bf16 %v3931_v3  ;;  %v3932_v37 = vunpack.i.l.bf16 %v3931_v3  ;;  %v3938_v14 = vunpack.i.h.bf16 %v3936_v36  ;;  %v3937_v10 = vunpack.i.l.bf16 %v3936_v36  ;;  %v2531_v36 = vld [vmem:[%s4510_s15 + $0xf0] sm:$0xff] }
 0x3e0   : > { %v2994_v18 = vsel %vm2983_vm4, %v2961_v44, %v3932_v37  ;;  %v3010_v17 = vsel %vm2983_vm4, %v2977_v1, %v3933_v63  ;;  %v2929_v40 = vsel %vm2917_vm2, %v2480_v58, %v3937_v10  ;;  %v2945_v54 = vsel %vm2917_vm2, %v2496_v34, %v3938_v14 }
 0x3e1   : > { %v3946_v12 = vpop.permute.xlu1 %3945  ;;  %v3941_v23 = vpop.permute.xlu0 %3940  ;;  %3247 = vmatmul.mubr.f32.gmra.mrb[20].mxu0 %v2994_v18  ;;  %3327 = vmatmul.mubr.f32.gmra.mrb[20].mxu1 %v3010_v17 }
 0x3e2   : > { %v3948_v42 = vunpack.i.h.bf16 %v3946_v12  ;;  %v3947_v41 = vunpack.i.l.bf16 %v3946_v12  ;;  %v3943_v31 = vunpack.i.h.bf16 %v3941_v23  ;;  %v3942_v20 = vunpack.i.l.bf16 %v3941_v23  ;;  %3580 = vmatprep.mubr.msk.f32.mxu0 %vm2917_vm2, %v2512_v61  ;;  %3596 = vmatprep.mubr.msk.f32.mxu1 %vm2917_vm2, %v2528_v45  ;;  %v2483_v61 = vld [vmem:[%s4505_s13 + $0x70] sm:$0xff] }
 0x3e3   : > { %v2499_v45 = vld [vmem:[%s4505_s13 + $0xf0] sm:$0xff] }
 0x3e4   : > { %v2962_v15 = vsel %vm2950_vm3, %v2929_v40, %v3942_v20  ;;  %v2978_v29 = vsel %vm2950_vm3, %v2945_v54, %v3943_v31  ;;  %v2516_v31 = vld [vmem:[%s4510_s15 + $0x78] sm:$0xff] }
 0x3e5   : > { %v3956_v49 = vpop.permute.xlu1 %3955  ;;  %v3951_v55 = vpop.permute.xlu0 %3950  ;;  %v2995_v52 = vsel %vm2983_vm4, %v2962_v15, %v3947_v41  ;;  %v3011_v11 = vsel %vm2983_vm4, %v2978_v29, %v3948_v42  ;;  %v2532_v20 = vld [vmem:[%s4510_s15 + $0xf8] sm:$0xff] }
 0x3e6   : > { %v3953_v24 = vunpack.i.h.bf16 %v3951_v55  ;;  %v3952_v32 = vunpack.i.l.bf16 %v3951_v55  ;;  %3252 = vmatmul.mubr.f32.gmra.mrb[22].mxu0 %v2995_v52  ;;  %3332 = vmatmul.mubr.f32.gmra.mrb[22].mxu1 %v3011_v11  ;;  %v3958_v22 = vunpack.i.h.bf16 %v3956_v49  ;;  %v3957_v50 = vunpack.i.l.bf16 %v3956_v49  ;;  %v2484_v55 = vld [vmem:[%s4505_s13 + $0x78] sm:$0xff] }
 0x3e7   : > { %3581 = vmatprep.mubr.msk.f32.mxu0 %vm2917_vm2, %v2513_v48  ;;  %3597 = vmatprep.mubr.msk.f32.mxu1 %vm2917_vm2, %v2529_v21  ;;  %v2500_v52 = vld [vmem:[%s4505_s13 + $0xf8] sm:$0xff] }
 0x3e8   : > { %v2930_v39 = vsel %vm2917_vm2, %v2481_v46, %v3952_v32  ;;  %v2946_v57 = vsel %vm2917_vm2, %v2497_v16, %v3953_v24 }
 0x3e9   : > { %v3961_v59 = vpop.permute.xlu0 %3960  ;;  %v3966_v13 = vpop.permute.xlu1 %3965  ;;  %v2963_v26 = vsel %vm2950_vm3, %v2930_v39, %v3957_v50  ;;  %v2979_v28 = vsel %vm2950_vm3, %v2946_v57, %v3958_v22 }
 0x3ea   : > { %v3963_v9 = vunpack.i.h.bf16 %v3961_v59  ;;  %v3962_v27 = vunpack.i.l.bf16 %v3961_v59  ;;  %v3968_v60 = vunpack.i.h.bf16 %v3966_v13  ;;  %v3967_v33 = vunpack.i.l.bf16 %v3966_v13 }
 0x3ec   : > { %v2996_v35 = vsel %vm2983_vm4, %v2963_v26, %v3962_v27  ;;  %v3012_v56 = vsel %vm2983_vm4, %v2979_v28, %v3963_v9  ;;  %v2931_v8 = vsel %vm2917_vm2, %v2482_v5, %v3967_v33  ;;  %v2947_v25 = vsel %vm2917_vm2, %v2498_v6, %v3968_v60 }
 0x3ed   : > { %v3971_v2 = vpop.permute.xlu0 %3970  ;;  %3257 = vmatmul.mubr.f32.gmra.mrb[24].mxu0 %v2996_v35  ;;  %3337 = vmatmul.mubr.f32.gmra.mrb[24].mxu1 %v3012_v56 }
 0x3ee   : > { %3582 = vmatprep.mubr.msk.f32.mxu0 %vm2917_vm2, %v2514_v43  ;;  %3598 = vmatprep.mubr.msk.f32.mxu1 %vm2917_vm2, %v2530_v30  ;;  %v3973_v0 = vunpack.i.h.bf16 %v3971_v2  ;;  %v3972_v53 = vunpack.i.l.bf16 %v3971_v2 }
 0x3f0   : > { %v2964_v19 = vsel %vm2950_vm3, %v2931_v8, %v3972_v53  ;;  %v2980_v4 = vsel %vm2950_vm3, %v2947_v25, %v3973_v0 }
 0x3f1   : > { %v3976_v47 = vpop.permute.xlu1 %3975  ;;  %v3981_v62 = vpop.permute.xlu0 %3980 }
 0x3f2   : > { %v3978_v38 = vunpack.i.h.bf16 %v3976_v47  ;;  %v3977_v7 = vunpack.i.l.bf16 %v3976_v47  ;;  %v3983_v14 = vunpack.i.h.bf16 %v3981_v62  ;;  %v3982_v10 = vunpack.i.l.bf16 %v3981_v62 }
 0x3f4   : > { %v2997_v3 = vsel %vm2983_vm4, %v2964_v19, %v3977_v7  ;;  %v3013_v63 = vsel %vm2983_vm4, %v2980_v4, %v3978_v38  ;;  %v2932_v34 = vsel %vm2917_vm2, %v2483_v61, %v3982_v10  ;;  %v2948_v12 = vsel %vm2917_vm2, %v2499_v45, %v3983_v14 }
 0x3f5   : > { %v3986_v37 = vpop.permute.xlu1 %3985  ;;  %3262 = vmatmul.mubr.f32.gmra.mrb[26].mxu0 %v2997_v3  ;;  %3342 = vmatmul.mubr.f32.gmra.mrb[26].mxu1 %v3013_v63 }
 0x3f6   : > { %3583 = vmatprep.mubr.msk.f32.mxu0 %vm2917_vm2, %v2515_v51  ;;  %3599 = vmatprep.mubr.msk.f32.mxu1 %vm2917_vm2, %v2531_v36  ;;  %v3988_v44 = vunpack.i.h.bf16 %v3986_v37  ;;  %v3987_v1 = vunpack.i.l.bf16 %v3986_v37 }
 0x3f8   : > { %v2965_v42 = vsel %vm2950_vm3, %v2932_v34, %v3987_v1  ;;  %v2981_v41 = vsel %vm2950_vm3, %v2948_v12, %v3988_v44 }
 0x3f9   : > { %v3991_v18 = vpop.permute.xlu0 %3990  ;;  %v3996_v23 = vpop.permute.xlu1 %3995 }
 0x3fa   : > { %v3993_v17 = vunpack.i.h.bf16 %v3991_v18  ;;  %v3992_v58 = vunpack.i.l.bf16 %v3991_v18  ;;  %v3998_v29 = vunpack.i.h.bf16 %v3996_v23  ;;  %v3997_v48 = vunpack.i.l.bf16 %v3996_v23 }
 0x3fc   : > { %v2998_v40 = vsel %vm2983_vm4, %v2965_v42, %v3992_v58  ;;  %v3014_v54 = vsel %vm2983_vm4, %v2981_v41, %v3993_v17  ;;  %v2933_v24 = vsel %vm2917_vm2, %v2484_v55, %v3997_v48  ;;  %v2949_v32 = vsel %vm2917_vm2, %v2500_v52, %v3998_v29 }
 0x3fd   : > { %v4001_v15 = vpop.permute.xlu0 %4000  ;;  %3267 = vmatmul.mubr.f32.gmra.mrb[28].mxu0 %v2998_v40  ;;  %3347 = vmatmul.mubr.f32.gmra.mrb[28].mxu1 %v3014_v54 }
 0x3fe   : > { %3584 = vmatprep.mubr.msk.f32.mxu0 %vm2917_vm2, %v2516_v31  ;;  %3600 = vmatprep.mubr.msk.f32.mxu1 %vm2917_vm2, %v2532_v20  ;;  %v4003_v21 = vunpack.i.h.bf16 %v4001_v15  ;;  %v4002_v49 = vunpack.i.l.bf16 %v4001_v15 }
 0x400   : > { %v2966_v22 = vsel %vm2950_vm3, %v2933_v24, %v4002_v49  ;;  %v2982_v50 = vsel %vm2950_vm3, %v2949_v32, %v4003_v21 }
 0x401   : > { %v4006_v11 = vpop.permute.xlu1 %4005 }
 0x402   : > { %v4008_v46 = vunpack.i.h.bf16 %v4006_v11  ;;  %v4007_v16 = vunpack.i.l.bf16 %v4006_v11 }
 0x404   : > { %v2999_v39 = vsel %vm2983_vm4, %v2966_v22, %v4007_v16  ;;  %v3015_v57 = vsel %vm2983_vm4, %v2982_v50, %v4008_v46 }
 0x405   : > { %3272 = vmatmul.mubr.f32.gmra.mrb[30].mxu0 %v2999_v39  ;;  %3352 = vmatmul.mubr.f32.gmra.mrb[30].mxu1 %v3015_v57 }
 0x478   : > { %v3198_v59 = vpop.f32.mrb[0].mxu0  ;;  %v3278_v9 = vpop.f32.mrb[0].mxu1 }
 0x479   : > { %v3357_v27 = vmax.f32 %v3198_v59, 0.0  ;;  %v3373_v13 = vmax.f32 %v3278_v9, 0.0  ;;  %v3200_v26 = vpop.f32.mrb[1].mxu0  ;;  %v3280_v28 = vpop.f32.mrb[1].mxu1 }
 0x47b   : > { %3389 = vst.msk [vmem:[%s4515_s17] sm:$0xff] %vm2917_vm2, %v3357_v27  ;;  %3405 = vst.msk [vmem:[%s4515_s17 + $0x80] sm:$0xff] %vm2917_vm2, %v3373_v13 }
 0x47d   : > { %v3203_v43 = vpop.f32.mrb[2].mxu0  ;;  %v3283_v30 = vpop.f32.mrb[2].mxu1 }
 0x47e   : > { %v3358_v35 = vmax.f32 %v3203_v43, 0.0  ;;  %v3374_v56 = vmax.f32 %v3283_v30, 0.0  ;;  %v3205_v2 = vpop.f32.mrb[3].mxu0  ;;  %v3285_v60 = vpop.f32.mrb[3].mxu1 }
 0x480   : > { %3390 = vst.msk [vmem:[%s4515_s17 + $0x8] sm:$0xff] %vm2917_vm2, %v3358_v35  ;;  %3406 = vst.msk [vmem:[%s4515_s17 + $0x88] sm:$0xff] %vm2917_vm2, %v3374_v56 }
 0x484   : > { %v3208_v33 = vpop.f32.mrb[4].mxu0  ;;  %v3288_v0 = vpop.f32.mrb[4].mxu1 }
 0x485   : > { %v3359_v53 = vmax.f32 %v3208_v33, 0.0  ;;  %v3375_v5 = vmax.f32 %v3288_v0, 0.0  ;;  %v3210_v6 = vpop.f32.mrb[5].mxu0  ;;  %v3290_v47 = vpop.f32.mrb[5].mxu1 }
 0x487   : > { %3391 = vst.msk [vmem:[%s4515_s17 + $0x10] sm:$0xff] %vm2917_vm2, %v3359_v53  ;;  %3407 = vst.msk [vmem:[%s4515_s17 + $0x90] sm:$0xff] %vm2917_vm2, %v3375_v5 }
 0x489   : > { %v3213_v38 = vpop.f32.mrb[6].mxu0  ;;  %v3293_v7 = vpop.f32.mrb[6].mxu1 }
 0x48a   : > { %v3360_v8 = vmax.f32 %v3213_v38, 0.0  ;;  %v3376_v25 = vmax.f32 %v3293_v7, 0.0  ;;  %v3215_v62 = vpop.f32.mrb[7].mxu0  ;;  %v3295_v19 = vpop.f32.mrb[7].mxu1 }
 0x48c   : > { %3392 = vst.msk [vmem:[%s4515_s17 + $0x18] sm:$0xff] %vm2917_vm2, %v3360_v8  ;;  %3408 = vst.msk [vmem:[%s4515_s17 + $0x98] sm:$0xff] %vm2917_vm2, %v3376_v25 }
 0x490   : > { %v3218_v4 = vpop.f32.mrb[8].mxu0  ;;  %v3298_v51 = vpop.f32.mrb[8].mxu1 }
 0x491   : > { %v3361_v36 = vmax.f32 %v3218_v4, 0.0  ;;  %v3377_v3 = vmax.f32 %v3298_v51, 0.0  ;;  %v3220_v63 = vpop.f32.mrb[9].mxu0  ;;  %v3300_v37 = vpop.f32.mrb[9].mxu1 }
 0x493   : > { %3393 = vst.msk [vmem:[%s4515_s17 + $0x20] sm:$0xff] %vm2917_vm2, %v3361_v36  ;;  %3409 = vst.msk [vmem:[%s4515_s17 + $0xa0] sm:$0xff] %vm2917_vm2, %v3377_v3 }
 0x495   : > { %v3223_v14 = vpop.f32.mrb[10].mxu0  ;;  %v3303_v10 = vpop.f32.mrb[10].mxu1 }
 0x496   : > { %v3362_v44 = vmax.f32 %v3223_v14, 0.0  ;;  %v3378_v1 = vmax.f32 %v3303_v10, 0.0  ;;  %v3225_v61 = vpop.f32.mrb[11].mxu0  ;;  %v3305_v45 = vpop.f32.mrb[11].mxu1 }
 0x498   : > { %3394 = vst.msk [vmem:[%s4515_s17 + $0x28] sm:$0xff] %vm2917_vm2, %v3362_v44  ;;  %3410 = vst.msk [vmem:[%s4515_s17 + $0xa8] sm:$0xff] %vm2917_vm2, %v3378_v1 }
 0x49c   : > { %v3228_v18 = vpop.f32.mrb[12].mxu0  ;;  %v3308_v17 = vpop.f32.mrb[12].mxu1 }
 0x49d   : > { %v3363_v58 = vmax.f32 %v3228_v18, 0.0  ;;  %v3379_v34 = vmax.f32 %v3308_v17, 0.0  ;;  %v3230_v12 = vpop.f32.mrb[13].mxu0  ;;  %v3310_v23 = vpop.f32.mrb[13].mxu1 }
 0x49f   : > { %3395 = vst.msk [vmem:[%s4515_s17 + $0x30] sm:$0xff] %vm2917_vm2, %v3363_v58  ;;  %3411 = vst.msk [vmem:[%s4515_s17 + $0xb0] sm:$0xff] %vm2917_vm2, %v3379_v34 }
 0x4a1   : > { %v3233_v42 = vpop.f32.mrb[14].mxu0  ;;  %v3313_v41 = vpop.f32.mrb[14].mxu1 }
 0x4a2   : > { %v3364_v31 = vmax.f32 %v3233_v42, 0.0  ;;  %v3380_v20 = vmax.f32 %v3313_v41, 0.0  ;;  %v3235_v40 = vpop.f32.mrb[15].mxu0  ;;  %v3315_v54 = vpop.f32.mrb[15].mxu1 }
 0x4a4   : > { %3396 = vst.msk [vmem:[%s4515_s17 + $0x38] sm:$0xff] %vm2917_vm2, %v3364_v31  ;;  %3412 = vst.msk [vmem:[%s4515_s17 + $0xb8] sm:$0xff] %vm2917_vm2, %v3380_v20 }
 0x4a8   : > { %v3238_v15 = vpop.f32.mrb[16].mxu0  ;;  %v3318_v29 = vpop.f32.mrb[16].mxu1 }
 0x4a9   : > { %v3365_v48 = vmax.f32 %v3238_v15, 0.0  ;;  %v3381_v21 = vmax.f32 %v3318_v29, 0.0  ;;  %v3240_v49 = vpop.f32.mrb[17].mxu0  ;;  %v3320_v55 = vpop.f32.mrb[17].mxu1 }
 0x4ab   : > { %3397 = vst.msk [vmem:[%s4515_s17 + $0x40] sm:$0xff] %vm2917_vm2, %v3365_v48  ;;  %3413 = vst.msk [vmem:[%s4515_s17 + $0xc0] sm:$0xff] %vm2917_vm2, %v3381_v21 }
 0x4ad   : > { %v3243_v52 = vpop.f32.mrb[18].mxu0  ;;  %v3323_v11 = vpop.f32.mrb[18].mxu1 }
 0x4ae   : > { %v3366_v46 = vmax.f32 %v3243_v52, 0.0  ;;  %v3382_v16 = vmax.f32 %v3323_v11, 0.0  ;;  %v3245_v24 = vpop.f32.mrb[19].mxu0  ;;  %v3325_v32 = vpop.f32.mrb[19].mxu1 }
 0x4b0   : > { %3398 = vst.msk [vmem:[%s4515_s17 + $0x48] sm:$0xff] %vm2917_vm2, %v3366_v46  ;;  %3414 = vst.msk [vmem:[%s4515_s17 + $0xc8] sm:$0xff] %vm2917_vm2, %v3382_v16 }
 0x4b4   : > { %v3248_v22 = vpop.f32.mrb[20].mxu0  ;;  %v3328_v50 = vpop.f32.mrb[20].mxu1 }
 0x4b5   : > { %v3367_v39 = vmax.f32 %v3248_v22, 0.0  ;;  %v3383_v57 = vmax.f32 %v3328_v50, 0.0  ;;  %v3250_v59 = vpop.f32.mrb[21].mxu0  ;;  %v3330_v9 = vpop.f32.mrb[21].mxu1 }
 0x4b7   : > { %3399 = vst.msk [vmem:[%s4515_s17 + $0x50] sm:$0xff] %vm2917_vm2, %v3367_v39  ;;  %3415 = vst.msk [vmem:[%s4515_s17 + $0xd0] sm:$0xff] %vm2917_vm2, %v3383_v57 }
 0x4b9   : > { %v3253_v27 = vpop.f32.mrb[22].mxu0  ;;  %v3333_v13 = vpop.f32.mrb[22].mxu1 }
 0x4ba   : > { %v3368_v26 = vmax.f32 %v3253_v27, 0.0  ;;  %v3384_v28 = vmax.f32 %v3333_v13, 0.0  ;;  %v3255_v43 = vpop.f32.mrb[23].mxu0  ;;  %v3335_v30 = vpop.f32.mrb[23].mxu1 }
 0x4bc   : > { %3400 = vst.msk [vmem:[%s4515_s17 + $0x58] sm:$0xff] %vm2917_vm2, %v3368_v26  ;;  %3416 = vst.msk [vmem:[%s4515_s17 + $0xd8] sm:$0xff] %vm2917_vm2, %v3384_v28 }
 0x4c0   : > { %v3258_v35 = vpop.f32.mrb[24].mxu0  ;;  %v3338_v56 = vpop.f32.mrb[24].mxu1 }
 0x4c1   : > { %v3369_v2 = vmax.f32 %v3258_v35, 0.0  ;;  %v3385_v60 = vmax.f32 %v3338_v56, 0.0  ;;  %v3260_v33 = vpop.f32.mrb[25].mxu0  ;;  %v3340_v0 = vpop.f32.mrb[25].mxu1 }
 0x4c3   : > { %3401 = vst.msk [vmem:[%s4515_s17 + $0x60] sm:$0xff] %vm2917_vm2, %v3369_v2  ;;  %3417 = vst.msk [vmem:[%s4515_s17 + $0xe0] sm:$0xff] %vm2917_vm2, %v3385_v60 }
 0x4c8   : > { %v3263_v53 = vpop.f32.mrb[26].mxu0  ;;  %v3343_v5 = vpop.f32.mrb[26].mxu1 }
 0x4c9   : > { %v3370_v6 = vmax.f32 %v3263_v53, 0.0  ;;  %v3386_v47 = vmax.f32 %v3343_v5, 0.0  ;;  %v3265_v38 = vpop.f32.mrb[27].mxu0  ;;  %v3345_v7 = vpop.f32.mrb[27].mxu1 }
 0x4cb   : > { %3402 = vst.msk [vmem:[%s4515_s17 + $0x68] sm:$0xff] %vm2917_vm2, %v3370_v6  ;;  %3418 = vst.msk [vmem:[%s4515_s17 + $0xe8] sm:$0xff] %vm2917_vm2, %v3386_v47 }
 0x4d0   : > { %v3268_v8 = vpop.f32.mrb[28].mxu0  ;;  %v3348_v25 = vpop.f32.mrb[28].mxu1 }
 0x4d1   : > { %v3371_v62 = vmax.f32 %v3268_v8, 0.0  ;;  %v3387_v19 = vmax.f32 %v3348_v25, 0.0  ;;  %v3270_v4 = vpop.f32.mrb[29].mxu0  ;;  %v3350_v51 = vpop.f32.mrb[29].mxu1 }
 0x4d3   : > { %3403 = vst.msk [vmem:[%s4515_s17 + $0x70] sm:$0xff] %vm2917_vm2, %v3371_v62  ;;  %3419 = vst.msk [vmem:[%s4515_s17 + $0xf0] sm:$0xff] %vm2917_vm2, %v3387_v19 }
 0x4d8   : > { %v3273_v36 = vpop.f32.mrb[30].mxu0  ;;  %v3353_v3 = vpop.f32.mrb[30].mxu1 }
 0x4d9   : > { %v3372_v63 = vmax.f32 %v3273_v36, 0.0  ;;  %v3388_v37 = vmax.f32 %v3353_v3, 0.0  ;;  %v3275_v14 = vpop.f32.mrb[31].mxu0  ;;  %v3355_v10 = vpop.f32.mrb[31].mxu1 }
 0x4db   : > { %3404 = vst.msk [vmem:[%s4515_s17 + $0x78] sm:$0xff] %vm2917_vm2, %v3372_v63  ;;  %3420 = vst.msk [vmem:[%s4515_s17 + $0xf8] sm:$0xff] %vm2917_vm2, %v3388_v37 }
 0x4dc PF: > { %s15_s24 = sadd.s32 1, %s4293_s24   ;;  %s5812_s18 = smov %s4273_s19 }
 0x4dd   : > { %p12_p0 = scmp.ge.s32.totalorder %s15_s24, 6   ;;  %s5813_s19 = smov %s4383_s6 }
 0x4de   : > { %s5814_s20 = smov %s4285_s22  ;;  %s5815_s21 = smov %s4289_s23 }
 0x4df   : > { %s5816_s22 = smov %s5819_s25  ;;  %s5817_s23 = smov %s5823_s26 }
 0x4e0   :  { %14 = sbr.rel (!%p12_p0) target bundleno = 4 (0x4), region = 115 }

</bundles_post_ra>
